<compile_context>
chip_gen: v5e
topology: v5e:2x2
jax: 0.10.0
libtpu: 0.0.40
codegen_flags: <defaults>
</compile_context>

<pallas_src>
from functools import partial

import jax
import jax.numpy as jnp
from jax import lax
from jax.experimental import pallas as pl
from jax.experimental.pallas import tpu as pltpu

H_BERT = 768        # BERT hidden size (fc1 input)
H_FC1 = 384         # fc1 output (3*128, lane aligned)
H_FC2 = 160         # fc2 output (logical)
H_FC2_PAD = 256     # fc2 output padded to 2*128 lanes (zero-padded weights/bias)
VOCAB = 100         # demo vocab
V_PAD = 128         # vocab padded to one full lane (zero embedding rows)
EPS = 1e-15
BALL_EPS_F32 = 4e-3  # geoopt project() epsilon for float32
C = 1.0              # Poincare ball curvature used by MobiusLinear(c=1.0)

assert VOCAB <= V_PAD


# ---------- in-kernel hyperbolic helpers (traced inside the Pallas body) ----------
def _norm_inv(sq):
    """(clamped ||x||, 1/||x||) from a precomputed row sum-of-squares (EUP rsqrt)."""
    s = jnp.maximum(sq, EPS * EPS)
    inv = lax.rsqrt(s)
    return s * inv, inv


def _artanh(x):
    x = jnp.clip(x, -1.0 + 1e-7, 1.0 - 1e-7)
    # two EUP logs instead of one log + a VPU divide
    return 0.5 * (jnp.log(1.0 + x) - jnp.log(1.0 - x))


def _project_with_sq(x, x_sq, c=C):
    """geoopt PoincareBall.projx, returning the projected point AND its squared norm."""
    norm, inv = _norm_inv(x_sq)
    maxnorm = (1.0 - BALL_EPS_F32) / (c ** 0.5)
    cond = norm > maxnorm
    x_p = jnp.where(cond, x * (maxnorm * inv), x)
    sq_p = jnp.where(cond, maxnorm * maxnorm, x_sq)
    return x_p, sq_p


def _mobius_matvec(x, x_sq, w_t_bf16, c=C):
    """geoopt mobius_matvec (+ project).  Takes/returns the row squared norm so the
    callers never recompute cross-lane reductions.  Matmul in bf16, math in f32."""
    sqrt_c = c ** 0.5
    x_norm, x_inv = _norm_inv(x_sq)
    mx = jnp.dot(x.astype(jnp.bfloat16), w_t_bf16,
                 preferred_element_type=jnp.float32)
    mx_sq = jnp.sum(mx * mx, axis=-1, keepdims=True)          # 1 lane reduction
    mx_norm, mx_inv = _norm_inv(mx_sq)
    factor = jnp.tanh(mx_norm * x_inv * _artanh(sqrt_c * x_norm)) * (mx_inv / sqrt_c)
    res = factor * mx
    res_sq = (factor * factor) * mx_sq                         # analytic, no reduction
    all_zero = mx_sq == 0.0                                    # geoopt zero-row guard
    res = jnp.where(all_zero, 0.0, res)
    res_sq = jnp.where(all_zero, 0.0, res_sq)
    return _project_with_sq(res, res_sq, c)


def _mobius_add(x, x_sq, y, y_sq, c=C):
    """geoopt mobius_add(x, bias) + project; x_sq threaded in, y_sq batch-invariant."""
    xy = jnp.sum(x * y, axis=-1, keepdims=True)                # 1 lane reduction
    num = (1.0 + 2.0 * c * xy + c * y_sq) * x + (1.0 - c * x_sq) * y
    den = jnp.maximum(1.0 + 2.0 * c * xy + c * c * x_sq * y_sq, EPS)
    inv = pl.reciprocal(den, approx=True)
    inv = inv * (2.0 - den * inv)          # one Newton step -> ~f32-exact reciprocal
    out = num * inv
    out_sq = jnp.sum(out * out, axis=-1, keepdims=True)        # 1 lane reduction
    return _project_with_sq(out, out_sq, c)


# ------------------------------- Pallas kernel -------------------------------
def classifier_kernel(tok_ref, mask_ref, emb_ref, wp_ref, bp_ref,
                      w1t_ref, b1_ref, w2t_ref, b2_ref, out_ref):
    tok = tok_ref[...]                       # (Bt, S) int32 token ids
    mask = mask_ref[...]                     # (Bt, S) f32 attention mask
    bt, seq = tok.shape

    # --- fused embedding gather + masked mean --------------------------------
    # counts[b, v] = sum_s mask[b, s] * [tok[b, s] == v]; accumulated over S so the
    # live intermediate is only (Bt, V_PAD) — no (Bt, S, V) blowup, no axis=1 XLU
    # reduction.  tok_sum = counts @ emb_table == sum_s mask[b,s]*emb[tok[b,s]].
    # TODO(synk): for production S (512+) replace the static unroll with a
    # fori_loop over S-chunks, and for a real 30K BERT vocab switch to a
    # scalar-prefetch / manual DMA row gather instead of the one-hot histogram.
    vocab_iota = lax.broadcasted_iota(jnp.int32, (bt, V_PAD), 1)
    counts = jnp.zeros((bt, V_PAD), jnp.float32)
    tok_cnt = jnp.zeros((bt, 1), jnp.float32)
    for s in range(seq):                     # static trip count (compile-time S)
        m_s = mask[:, s:s + 1]
        counts = counts + jnp.where(vocab_iota == tok[:, s:s + 1], m_s, 0.0)
        tok_cnt = tok_cnt + m_s

    # counts are small integers (<= S), exact in bf16; emb table is stored bf16.
    tok_sum = jnp.dot(counts.astype(jnp.bfloat16), emb_ref[...],
                      preferred_element_type=jnp.float32)            # (Bt, 768)
    inv_cnt = pl.reciprocal(jnp.maximum(tok_cnt, 1.0), approx=True)  # EUP
    hidden = tok_sum * inv_cnt                                       # masked mean

    # --- pooled_output stand-in ----------------------------------------------
    # TODO(synk): the pretrained 12-layer BERT encoder cannot be reproduced
    # in-script; pooled_output is synthesized as masked-mean(embeddings) followed by
    # BERT's pooler head (tanh(Linear(.))), computed on the MXU in bf16.
    pooled = jnp.tanh(
        jnp.dot(hidden.astype(jnp.bfloat16), wp_ref[...],
                preferred_element_type=jnp.float32)
        + bp_ref[...])                                               # (Bt, 768) f32

    # --- tensor_exponential_map: tanh(||v||) * v / ||v|| ----------------------
    p_sq = jnp.sum(pooled * pooled, axis=-1, keepdims=True)          # 1 lane reduction
    p_norm, p_inv = _norm_inv(p_sq)
    t = jnp.tanh(p_norm)
    gamma = t * (pooled * p_inv)                                     # (Bt, 768)
    gamma_sq = (t * t) * (p_sq * p_inv * p_inv)                      # threaded, no reduce

    # batch-invariant bias squared norms: computed once per kernel ((1,F) -> (1,1))
    b1 = b1_ref[...]
    b1_sq = jnp.sum(b1 * b1, axis=-1, keepdims=True)
    b2 = b2_ref[...]
    b2_sq = jnp.sum(b2 * b2, axis=-1, keepdims=True)

    # --- fc1: MobiusLinear(768 -> 384) ----------------------------------------
    x, x_sq = _mobius_matvec(gamma, gamma_sq, w1t_ref[...])
    x, x_sq = _mobius_add(x, x_sq, b1, b1_sq)

    # --- fc2: MobiusLinear(384 -> 160), lane-padded to 256 --------------------
    x, x_sq = _mobius_matvec(x, x_sq, w2t_ref[...])
    x, x_sq = _mobius_add(x, x_sq, b2, b2_sq)

    out_ref[...] = x.astype(out_ref.dtype)                           # (Bt, 256)


# --------------------------------- wrapper -----------------------------------
def _round_up(x, m):
    return (x + m - 1) // m * m


def _cost_estimate(b_pad, seq):
    mm = V_PAD * H_BERT + H_BERT * H_BERT + H_BERT * H_FC1 + H_FC1 * H_FC2_PAD
    weight_bytes = 2 * mm + 4 * (H_BERT + H_FC1 + H_FC2_PAD)        # bf16 W + f32 biases
    io_bytes = b_pad * seq * (4 + 4) + b_pad * H_FC2_PAD * 4        # tok + mask + out
    return pl.CostEstimate(
        flops=2 * b_pad * mm,
        transcendentals=b_pad * (H_BERT + 32),
        bytes_accessed=weight_bytes + io_bytes,
    )


@partial(jax.jit, static_argnames=("block_b",))
def multiclass_classifier(tokens, masks, params, *, block_b=128):
    # block_b: 128 saturates the v5e MXU; use 256 on v6e/v7x so each TensorCore's
    # 2x256x256 MXU tiles are full after the 2-way megacore split.
    B, S = tokens.shape
    bt = min(block_b, _round_up(B, 8))
    b_pad = _round_up(B, bt)
    tok = jnp.pad(tokens.astype(jnp.int32), ((0, b_pad - B), (0, 0)))
    msk = jnp.pad(masks.astype(jnp.float32), ((0, b_pad - B), (0, 0)))  # mask as f32 (DMA trim)

    args = (
        tok, msk,
        params["emb_table"],                       # bf16 (128, 768)
        params["w_pool_t"], params["b_pool"],      # bf16 (768, 768), f32 (1, 768)
        params["w1_t"], params["b1"],              # bf16 (768, 384), f32 (1, 384)
        params["w2_t"], params["b2"],              # bf16 (384, 256), f32 (1, 256)
    )

    def const_spec(arr):
        shape = arr.shape
        # constant block index -> DMA'd once, VMEM-resident across all grid steps
        return pl.BlockSpec(shape, lambda i, _n=len(shape): (0,) * _n)

    in_specs = [
        pl.BlockSpec((bt, S), lambda i: (i, 0)),   # tokens, tiled over batch
        pl.BlockSpec((bt, S), lambda i: (i, 0)),   # mask, tiled over batch
        const_spec(params["emb_table"]),
        const_spec(params["w_pool_t"]),
        const_spec(params["b_pool"]),
        const_spec(params["w1_t"]),
        const_spec(params["b1"]),
        const_spec(params["w2_t"]),
        const_spec(params["b2"]),
    ]
    out_spec = pl.BlockSpec((bt, H_FC2_PAD), lambda i: (i, 0))

    out = pl.pallas_call(
        classifier_kernel,
        out_shape=jax.ShapeDtypeStruct((b_pad, H_FC2_PAD), jnp.float32),
        grid=(b_pad // bt,),
        in_specs=in_specs,
        out_specs=out_spec,
        compiler_params=pltpu.CompilerParams(
            dimension_semantics=("parallel",),      # v7x: shard batch over both TCs
            vmem_limit_bytes=32 * 1024 * 1024,      # safe on v7x's 64 MiB physical VMEM
        ),
        cost_estimate=_cost_estimate(b_pad, S),
    )(*args)
    # Padded batch rows and padded columns 160..255 are exact-zero pass-throughs.
    return out[:B, :H_FC2]


def init_params(key, vocab_size=VOCAB):
    ks = jax.random.split(key, 4)
    emb = jax.random.normal(ks[0], (vocab_size, H_BERT), jnp.float32) * 0.02
    emb_pad = jnp.zeros((V_PAD, H_BERT), jnp.float32).at[:vocab_size].set(emb)
    # BERT pooler dense (synthetic weights)
    w_pool = jax.random.normal(ks[1], (H_BERT, H_BERT), jnp.float32) * 0.02
    b_pool = jnp.zeros((1, H_BERT), jnp.float32)
    # MobiusLinear.reset_parameters(): weight = eye_ + rand*1e-3, bias = 0
    # NOTE: bf16 storage quantizes the 1e-3 perturbations (throughput config); keep an
    # f32 copy of w1/w2 outside this dict if bit-parity with the torch module is needed.
    w1 = jnp.eye(H_FC1, H_BERT, dtype=jnp.float32) + \
        jax.random.uniform(ks[2], (H_FC1, H_BERT), jnp.float32) * 1e-3
    w2 = jnp.eye(H_FC2, H_FC1, dtype=jnp.float32) + \
        jax.random.uniform(ks[3], (H_FC2, H_FC1), jnp.float32) * 1e-3
    # zero-pad fc2 output dim 160 -> 256 for lane alignment (exactness preserved)
    w2_t_pad = jnp.zeros((H_FC1, H_FC2_PAD), jnp.float32).at[:, :H_FC2].set(w2.T)
    return dict(
        emb_table=emb_pad.astype(jnp.bfloat16),
        w_pool_t=w_pool.T.astype(jnp.bfloat16),
        b_pool=b_pool,
        w1_t=w1.T.astype(jnp.bfloat16),
        b1=jnp.zeros((1, H_FC1), jnp.float32),
        w2_t=w2_t_pad.astype(jnp.bfloat16),
        b2=jnp.zeros((1, H_FC2_PAD), jnp.float32),
    )


if __name__ == "__main__":
    key = jax.random.PRNGKey(0)
    kp, kt, km = jax.random.split(key, 3)
    params = init_params(kp)

    B, S = 2, 8
    tokens = jax.random.randint(kt, (B, S), 0, VOCAB, dtype=jnp.int32)
    masks = (jax.random.uniform(km, (B, S)) > 0.25).astype(jnp.int32)
    masks = masks.at[:, 0].set(1)  # keep at least one unmasked token per row

    out = multiclass_classifier(tokens, masks, params)
    out = jax.block_until_ready(out)

    assert out.shape == (B, H_FC2), out.shape
    assert bool(jnp.all(jnp.isfinite(out)))
    # outputs live inside the unit Poincare ball
    assert bool(jnp.all(jnp.sum(out * out, axis=-1) < 1.0))
    print("KERNEL_OK")
</pallas_src>

<mosaic_0001>
module attributes {stable_mosaic.version = 11 : i64} {
  func.func @classifier_kernel(%arg0: i32, %arg1: memref<8x8xi32, #tpu.memory_space<vmem>>, %arg2: memref<8x8xf32, #tpu.memory_space<vmem>>, %arg3: memref<128x768xbf16, #tpu.memory_space<vmem>>, %arg4: memref<768x768xbf16, #tpu.memory_space<vmem>>, %arg5: memref<1x768xf32, #tpu.memory_space<vmem>>, %arg6: memref<768x384xbf16, #tpu.memory_space<vmem>>, %arg7: memref<1x384xf32, #tpu.memory_space<vmem>>, %arg8: memref<384x256xbf16, #tpu.memory_space<vmem>>, %arg9: memref<1x256xf32, #tpu.memory_space<vmem>>, %arg10: memref<8x256xf32, #tpu.memory_space<vmem>>) attributes {dimension_semantics = [#tpu.dimension_semantics<parallel>], iteration_bounds = array<i64: 1>, scalar_prefetch = 0 : i64, scratch_operands = 0 : i64, tpu.core_type = #tpu.core_type<tc>, window_params = [{transform_indices = @transform_0, window_bounds = array<i64: 8, 8>}, {transform_indices = @transform_1, window_bounds = array<i64: 8, 8>}, {pipeline_mode = #tpu.pipeline_mode<synchronous>, transform_indices = @transform_2, window_bounds = array<i64: 128, 768>}, {pipeline_mode = #tpu.pipeline_mode<synchronous>, transform_indices = @transform_3, window_bounds = array<i64: 768, 768>}, {pipeline_mode = #tpu.pipeline_mode<synchronous>, transform_indices = @transform_4, window_bounds = array<i64: 1, 768>}, {pipeline_mode = #tpu.pipeline_mode<synchronous>, transform_indices = @transform_5, window_bounds = array<i64: 768, 384>}, {pipeline_mode = #tpu.pipeline_mode<synchronous>, transform_indices = @transform_6, window_bounds = array<i64: 1, 384>}, {pipeline_mode = #tpu.pipeline_mode<synchronous>, transform_indices = @transform_7, window_bounds = array<i64: 384, 256>}, {pipeline_mode = #tpu.pipeline_mode<synchronous>, transform_indices = @transform_8, window_bounds = array<i64: 1, 256>}, {transform_indices = @transform_9, window_bounds = array<i64: 8, 256>}]} {
    %c0 = arith.constant 0 : index
    %c0_0 = arith.constant 0 : index
    %0 = vector.load %arg1[%c0, %c0_0] : memref<8x8xi32, #tpu.memory_space<vmem>>, vector<8x8xi32>
    %c0_1 = arith.constant 0 : index
    %c0_2 = arith.constant 0 : index
    %1 = vector.load %arg2[%c0_1, %c0_2] : memref<8x8xf32, #tpu.memory_space<vmem>>, vector<8x8xf32>
    %2 = tpu.iota {dimensions = array<i32: 1>} : vector<8x128xi32>
    %cst = arith.constant 0.000000e+00 : f32
    %3 = vector.broadcast %cst : f32 to vector<8x128xf32>
    %cst_3 = arith.constant 0.000000e+00 : f32
    %4 = vector.broadcast %cst_3 : f32 to vector<8x1xf32>
    %5 = vector.extract_strided_slice %1 {offsets = [0, 0], sizes = [8, 1], strides = [1, 1]} : vector<8x8xf32> to vector<8x1xf32>
    %6 = vector.extract_strided_slice %0 {offsets = [0, 0], sizes = [8, 1], strides = [1, 1]} : vector<8x8xi32> to vector<8x1xi32>
    %7 = vector.broadcast %6 : vector<8x1xi32> to vector<8x128xi32>
    %8 = arith.cmpi eq, %2, %7 : vector<8x128xi32>
    %cst_4 = arith.constant 0.000000e+00 : f32
    %9 = vector.shape_cast %5 : vector<8x1xf32> to vector<8x1xf32>
    %10 = vector.broadcast %9 : vector<8x1xf32> to vector<8x128xf32>
    %11 = vector.broadcast %cst_4 : f32 to vector<8x128xf32>
    %12 = arith.select %8, %10, %11 : vector<8x128xi1>, vector<8x128xf32>
    %13 = arith.addf %3, %12 : vector<8x128xf32>
    %14 = arith.addf %4, %5 : vector<8x1xf32>
    %15 = vector.extract_strided_slice %1 {offsets = [0, 1], sizes = [8, 1], strides = [1, 1]} : vector<8x8xf32> to vector<8x1xf32>
    %16 = vector.extract_strided_slice %0 {offsets = [0, 1], sizes = [8, 1], strides = [1, 1]} : vector<8x8xi32> to vector<8x1xi32>
    %17 = vector.broadcast %16 : vector<8x1xi32> to vector<8x128xi32>
    %18 = arith.cmpi eq, %2, %17 : vector<8x128xi32>
    %cst_5 = arith.constant 0.000000e+00 : f32
    %19 = vector.shape_cast %15 : vector<8x1xf32> to vector<8x1xf32>
    %20 = vector.broadcast %19 : vector<8x1xf32> to vector<8x128xf32>
    %21 = vector.broadcast %cst_5 : f32 to vector<8x128xf32>
    %22 = arith.select %18, %20, %21 : vector<8x128xi1>, vector<8x128xf32>
    %23 = arith.addf %13, %22 : vector<8x128xf32>
    %24 = arith.addf %14, %15 : vector<8x1xf32>
    %25 = vector.extract_strided_slice %1 {offsets = [0, 2], sizes = [8, 1], strides = [1, 1]} : vector<8x8xf32> to vector<8x1xf32>
    %26 = vector.extract_strided_slice %0 {offsets = [0, 2], sizes = [8, 1], strides = [1, 1]} : vector<8x8xi32> to vector<8x1xi32>
    %27 = vector.broadcast %26 : vector<8x1xi32> to vector<8x128xi32>
    %28 = arith.cmpi eq, %2, %27 : vector<8x128xi32>
    %cst_6 = arith.constant 0.000000e+00 : f32
    %29 = vector.shape_cast %25 : vector<8x1xf32> to vector<8x1xf32>
    %30 = vector.broadcast %29 : vector<8x1xf32> to vector<8x128xf32>
    %31 = vector.broadcast %cst_6 : f32 to vector<8x128xf32>
    %32 = arith.select %28, %30, %31 : vector<8x128xi1>, vector<8x128xf32>
    %33 = arith.addf %23, %32 : vector<8x128xf32>
    %34 = arith.addf %24, %25 : vector<8x1xf32>
    %35 = vector.extract_strided_slice %1 {offsets = [0, 3], sizes = [8, 1], strides = [1, 1]} : vector<8x8xf32> to vector<8x1xf32>
    %36 = vector.extract_strided_slice %0 {offsets = [0, 3], sizes = [8, 1], strides = [1, 1]} : vector<8x8xi32> to vector<8x1xi32>
    %37 = vector.broadcast %36 : vector<8x1xi32> to vector<8x128xi32>
    %38 = arith.cmpi eq, %2, %37 : vector<8x128xi32>
    %cst_7 = arith.constant 0.000000e+00 : f32
    %39 = vector.shape_cast %35 : vector<8x1xf32> to vector<8x1xf32>
    %40 = vector.broadcast %39 : vector<8x1xf32> to vector<8x128xf32>
    %41 = vector.broadcast %cst_7 : f32 to vector<8x128xf32>
    %42 = arith.select %38, %40, %41 : vector<8x128xi1>, vector<8x128xf32>
    %43 = arith.addf %33, %42 : vector<8x128xf32>
    %44 = arith.addf %34, %35 : vector<8x1xf32>
    %45 = vector.extract_strided_slice %1 {offsets = [0, 4], sizes = [8, 1], strides = [1, 1]} : vector<8x8xf32> to vector<8x1xf32>
    %46 = vector.extract_strided_slice %0 {offsets = [0, 4], sizes = [8, 1], strides = [1, 1]} : vector<8x8xi32> to vector<8x1xi32>
    %47 = vector.broadcast %46 : vector<8x1xi32> to vector<8x128xi32>
    %48 = arith.cmpi eq, %2, %47 : vector<8x128xi32>
    %cst_8 = arith.constant 0.000000e+00 : f32
    %49 = vector.shape_cast %45 : vector<8x1xf32> to vector<8x1xf32>
    %50 = vector.broadcast %49 : vector<8x1xf32> to vector<8x128xf32>
    %51 = vector.broadcast %cst_8 : f32 to vector<8x128xf32>
    %52 = arith.select %48, %50, %51 : vector<8x128xi1>, vector<8x128xf32>
    %53 = arith.addf %43, %52 : vector<8x128xf32>
    %54 = arith.addf %44, %45 : vector<8x1xf32>
    %55 = vector.extract_strided_slice %1 {offsets = [0, 5], sizes = [8, 1], strides = [1, 1]} : vector<8x8xf32> to vector<8x1xf32>
    %56 = vector.extract_strided_slice %0 {offsets = [0, 5], sizes = [8, 1], strides = [1, 1]} : vector<8x8xi32> to vector<8x1xi32>
    %57 = vector.broadcast %56 : vector<8x1xi32> to vector<8x128xi32>
    %58 = arith.cmpi eq, %2, %57 : vector<8x128xi32>
    %cst_9 = arith.constant 0.000000e+00 : f32
    %59 = vector.shape_cast %55 : vector<8x1xf32> to vector<8x1xf32>
    %60 = vector.broadcast %59 : vector<8x1xf32> to vector<8x128xf32>
    %61 = vector.broadcast %cst_9 : f32 to vector<8x128xf32>
    %62 = arith.select %58, %60, %61 : vector<8x128xi1>, vector<8x128xf32>
    %63 = arith.addf %53, %62 : vector<8x128xf32>
    %64 = arith.addf %54, %55 : vector<8x1xf32>
    %65 = vector.extract_strided_slice %1 {offsets = [0, 6], sizes = [8, 1], strides = [1, 1]} : vector<8x8xf32> to vector<8x1xf32>
    %66 = vector.extract_strided_slice %0 {offsets = [0, 6], sizes = [8, 1], strides = [1, 1]} : vector<8x8xi32> to vector<8x1xi32>
    %67 = vector.broadcast %66 : vector<8x1xi32> to vector<8x128xi32>
    %68 = arith.cmpi eq, %2, %67 : vector<8x128xi32>
    %cst_10 = arith.constant 0.000000e+00 : f32
    %69 = vector.shape_cast %65 : vector<8x1xf32> to vector<8x1xf32>
    %70 = vector.broadcast %69 : vector<8x1xf32> to vector<8x128xf32>
    %71 = vector.broadcast %cst_10 : f32 to vector<8x128xf32>
    %72 = arith.select %68, %70, %71 : vector<8x128xi1>, vector<8x128xf32>
    %73 = arith.addf %63, %72 : vector<8x128xf32>
    %74 = arith.addf %64, %65 : vector<8x1xf32>
    %75 = vector.extract_strided_slice %1 {offsets = [0, 7], sizes = [8, 1], strides = [1, 1]} : vector<8x8xf32> to vector<8x1xf32>
    %76 = vector.extract_strided_slice %0 {offsets = [0, 7], sizes = [8, 1], strides = [1, 1]} : vector<8x8xi32> to vector<8x1xi32>
    %77 = vector.broadcast %76 : vector<8x1xi32> to vector<8x128xi32>
    %78 = arith.cmpi eq, %2, %77 : vector<8x128xi32>
    %cst_11 = arith.constant 0.000000e+00 : f32
    %79 = vector.shape_cast %75 : vector<8x1xf32> to vector<8x1xf32>
    %80 = vector.broadcast %79 : vector<8x1xf32> to vector<8x128xf32>
    %81 = vector.broadcast %cst_11 : f32 to vector<8x128xf32>
    %82 = arith.select %78, %80, %81 : vector<8x128xi1>, vector<8x128xf32>
    %83 = arith.addf %73, %82 : vector<8x128xf32>
    %84 = arith.addf %74, %75 : vector<8x1xf32>
    %85 = arith.truncf %83 : vector<8x128xf32> to vector<8x128xbf16>
    %c0_12 = arith.constant 0 : index
    %c0_13 = arith.constant 0 : index
    %86 = vector.load %arg3[%c0_12, %c0_13] : memref<128x768xbf16, #tpu.memory_space<vmem>>, vector<128x768xbf16>
    %cst_14 = arith.constant dense<0.000000e+00> : vector<8x768xf32>
    %87 = tpu.matmul %85, %86, %cst_14 {dimension_numbers = #tpu.dot_dimension_numbers<[1], [0], [0], [1], [0, 0, 1, 1], [], []>} : vector<8x128xbf16>, vector<128x768xbf16>, vector<8x768xf32> -> vector<8x768xf32>
    %cst_15 = arith.constant 1.000000e+00 : f32
    %88 = vector.broadcast %cst_15 : f32 to vector<8x1xf32>
    %89 = arith.maximumf %84, %88 : vector<8x1xf32>
    %90 = tpu.reciprocal %89 {approx = true} : vector<8x1xf32> -> vector<8x1xf32>
    %91 = vector.broadcast %90 : vector<8x1xf32> to vector<8x768xf32>
    %92 = arith.mulf %87, %91 : vector<8x768xf32>
    %93 = arith.truncf %92 : vector<8x768xf32> to vector<8x768xbf16>
    %c0_16 = arith.constant 0 : index
    %c0_17 = arith.constant 0 : index
    %94 = vector.load %arg4[%c0_16, %c0_17] : memref<768x768xbf16, #tpu.memory_space<vmem>>, vector<768x768xbf16>
    %cst_18 = arith.constant dense<0.000000e+00> : vector<8x768xf32>
    %95 = tpu.matmul %93, %94, %cst_18 {dimension_numbers = #tpu.dot_dimension_numbers<[1], [0], [0], [1], [0, 0, 1, 1], [], []>} : vector<8x768xbf16>, vector<768x768xbf16>, vector<8x768xf32> -> vector<8x768xf32>
    %c0_19 = arith.constant 0 : index
    %c0_20 = arith.constant 0 : index
    %96 = vector.load %arg5[%c0_19, %c0_20] : memref<1x768xf32, #tpu.memory_space<vmem>>, vector<1x768xf32>
    %97 = vector.broadcast %96 : vector<1x768xf32> to vector<8x768xf32>
    %98 = arith.addf %95, %97 : vector<8x768xf32>
    %99 = math.tanh %98 : vector<8x768xf32>
    %100 = arith.mulf %99, %99 : vector<8x768xf32>
    %cst_21 = arith.constant dense<0.000000e+00> : vector<8xf32>
    %101 = vector.multi_reduction <add>, %100, %cst_21 [1] : vector<8x768xf32> to vector<8xf32>
    %102 = vector.shape_cast %101 : vector<8xf32> to vector<8x1xf32>
    %cst_22 = arith.constant 1.000000e-30 : f32
    %103 = vector.broadcast %cst_22 : f32 to vector<8x1xf32>
    %104 = arith.maximumf %102, %103 : vector<8x1xf32>
    %105 = math.rsqrt %104 : vector<8x1xf32>
    %106 = arith.mulf %104, %105 : vector<8x1xf32>
    %107 = math.tanh %106 : vector<8x1xf32>
    %108 = vector.broadcast %105 : vector<8x1xf32> to vector<8x768xf32>
    %109 = arith.mulf %99, %108 : vector<8x768xf32>
    %110 = vector.broadcast %107 : vector<8x1xf32> to vector<8x768xf32>
    %111 = arith.mulf %110, %109 : vector<8x768xf32>
    %112 = arith.mulf %107, %107 : vector<8x1xf32>
    %113 = arith.mulf %102, %105 : vector<8x1xf32>
    %114 = arith.mulf %113, %105 : vector<8x1xf32>
    %115 = arith.mulf %112, %114 : vector<8x1xf32>
    %c0_23 = arith.constant 0 : index
    %c0_24 = arith.constant 0 : index
    %116 = vector.load %arg7[%c0_23, %c0_24] : memref<1x384xf32, #tpu.memory_space<vmem>>, vector<1x384xf32>
    %117 = arith.mulf %116, %116 : vector<1x384xf32>
    %cst_25 = arith.constant dense<0.000000e+00> : vector<1xf32>
    %118 = vector.multi_reduction <add>, %117, %cst_25 [1] : vector<1x384xf32> to vector<1xf32>
    %119 = vector.shape_cast %118 : vector<1xf32> to vector<1x1xf32>
    %c0_26 = arith.constant 0 : index
    %c0_27 = arith.constant 0 : index
    %120 = vector.load %arg9[%c0_26, %c0_27] : memref<1x256xf32, #tpu.memory_space<vmem>>, vector<1x256xf32>
    %121 = arith.mulf %120, %120 : vector<1x256xf32>
    %cst_28 = arith.constant dense<0.000000e+00> : vector<1xf32>
    %122 = vector.multi_reduction <add>, %121, %cst_28 [1] : vector<1x256xf32> to vector<1xf32>
    %123 = vector.shape_cast %122 : vector<1xf32> to vector<1x1xf32>
    %c0_29 = arith.constant 0 : index
    %c0_30 = arith.constant 0 : index
    %124 = vector.load %arg6[%c0_29, %c0_30] : memref<768x384xbf16, #tpu.memory_space<vmem>>, vector<768x384xbf16>
    %cst_31 = arith.constant 1.000000e-30 : f32
    %125 = vector.broadcast %cst_31 : f32 to vector<8x1xf32>
    %126 = arith.maximumf %115, %125 : vector<8x1xf32>
    %127 = math.rsqrt %126 : vector<8x1xf32>
    %128 = arith.mulf %126, %127 : vector<8x1xf32>
    %129 = arith.truncf %111 : vector<8x768xf32> to vector<8x768xbf16>
    %cst_32 = arith.constant dense<0.000000e+00> : vector<8x384xf32>
    %130 = tpu.matmul %129, %124, %cst_32 {dimension_numbers = #tpu.dot_dimension_numbers<[1], [0], [0], [1], [0, 0, 1, 1], [], []>} : vector<8x768xbf16>, vector<768x384xbf16>, vector<8x384xf32> -> vector<8x384xf32>
    %131 = arith.mulf %130, %130 : vector<8x384xf32>
    %cst_33 = arith.constant dense<0.000000e+00> : vector<8xf32>
    %132 = vector.multi_reduction <add>, %131, %cst_33 [1] : vector<8x384xf32> to vector<8xf32>
    %133 = vector.shape_cast %132 : vector<8xf32> to vector<8x1xf32>
    %cst_34 = arith.constant 1.000000e-30 : f32
    %134 = vector.broadcast %cst_34 : f32 to vector<8x1xf32>
    %135 = arith.maximumf %133, %134 : vector<8x1xf32>
    %136 = math.rsqrt %135 : vector<8x1xf32>
    %137 = arith.mulf %135, %136 : vector<8x1xf32>
    %138 = arith.mulf %137, %127 : vector<8x1xf32>
    %cst_35 = arith.constant 1.000000e+00 : f32
    %139 = vector.broadcast %cst_35 : f32 to vector<8x1xf32>
    %140 = arith.mulf %139, %128 : vector<8x1xf32>
    %cst_36 = arith.constant -0.99999988 : f32
    %cst_37 = arith.constant 0.99999988 : f32
    %141 = vector.broadcast %cst_36 : f32 to vector<8x1xf32>
    %142 = arith.maximumf %141, %140 : vector<8x1xf32>
    %143 = vector.broadcast %cst_37 : f32 to vector<8x1xf32>
    %144 = arith.minimumf %143, %142 : vector<8x1xf32>
    %cst_38 = arith.constant 1.000000e+00 : f32
    %145 = vector.broadcast %cst_38 : f32 to vector<8x1xf32>
    %146 = arith.addf %145, %144 : vector<8x1xf32>
    %147 = math.log %146 : vector<8x1xf32>
    %cst_39 = arith.constant 1.000000e+00 : f32
    %148 = vector.broadcast %cst_39 : f32 to vector<8x1xf32>
    %149 = arith.subf %148, %144 : vector<8x1xf32>
    %150 = math.log %149 : vector<8x1xf32>
    %151 = arith.subf %147, %150 : vector<8x1xf32>
    %cst_40 = arith.constant 5.000000e-01 : f32
    %152 = vector.broadcast %cst_40 : f32 to vector<8x1xf32>
    %153 = arith.mulf %152, %151 : vector<8x1xf32>
    %154 = arith.mulf %138, %153 : vector<8x1xf32>
    %155 = math.tanh %154 : vector<8x1xf32>
    %cst_41 = arith.constant 1.000000e+00 : f32
    %156 = vector.broadcast %cst_41 : f32 to vector<8x1xf32>
    %157 = arith.divf %136, %156 : vector<8x1xf32>
    %158 = arith.mulf %155, %157 : vector<8x1xf32>
    %159 = vector.broadcast %158 : vector<8x1xf32> to vector<8x384xf32>
    %160 = arith.mulf %159, %130 : vector<8x384xf32>
    %161 = arith.mulf %158, %158 : vector<8x1xf32>
    %162 = arith.mulf %161, %133 : vector<8x1xf32>
    %cst_42 = arith.constant 0.000000e+00 : f32
    %163 = vector.broadcast %cst_42 : f32 to vector<8x1xf32>
    %164 = arith.cmpf oeq, %133, %163 : vector<8x1xf32>
    %cst_43 = arith.constant 0.000000e+00 : f32
    %165 = vector.shape_cast %164 : vector<8x1xi1> to vector<8x1xi1>
    %166 = vector.broadcast %165 : vector<8x1xi1> to vector<8x384xi1>
    %167 = vector.broadcast %cst_43 : f32 to vector<8x384xf32>
    %168 = arith.select %166, %167, %160 : vector<8x384xi1>, vector<8x384xf32>
    %cst_44 = arith.constant 0.000000e+00 : f32
    %169 = vector.broadcast %cst_44 : f32 to vector<8x1xf32>
    %170 = arith.select %164, %169, %162 : vector<8x1xi1>, vector<8x1xf32>
    %cst_45 = arith.constant 1.000000e-30 : f32
    %171 = vector.broadcast %cst_45 : f32 to vector<8x1xf32>
    %172 = arith.maximumf %170, %171 : vector<8x1xf32>
    %173 = math.rsqrt %172 : vector<8x1xf32>
    %174 = arith.mulf %172, %173 : vector<8x1xf32>
    %cst_46 = arith.constant 0.995999991 : f32
    %175 = vector.broadcast %cst_46 : f32 to vector<8x1xf32>
    %176 = arith.cmpf ogt, %174, %175 : vector<8x1xf32>
    %cst_47 = arith.constant 0.995999991 : f32
    %177 = vector.broadcast %cst_47 : f32 to vector<8x1xf32>
    %178 = arith.mulf %177, %173 : vector<8x1xf32>
    %179 = vector.broadcast %178 : vector<8x1xf32> to vector<8x384xf32>
    %180 = arith.mulf %168, %179 : vector<8x384xf32>
    %181 = vector.shape_cast %176 : vector<8x1xi1> to vector<8x1xi1>
    %182 = vector.broadcast %181 : vector<8x1xi1> to vector<8x384xi1>
    %183 = arith.select %182, %180, %168 : vector<8x384xi1>, vector<8x384xf32>
    %cst_48 = arith.constant 9.920160e-01 : f32
    %184 = vector.broadcast %cst_48 : f32 to vector<8x1xf32>
    %185 = arith.select %176, %184, %170 : vector<8x1xi1>, vector<8x1xf32>
    %186 = vector.broadcast %116 : vector<1x384xf32> to vector<8x384xf32>
    %187 = arith.mulf %183, %186 : vector<8x384xf32>
    %cst_49 = arith.constant dense<0.000000e+00> : vector<8xf32>
    %188 = vector.multi_reduction <add>, %187, %cst_49 [1] : vector<8x384xf32> to vector<8xf32>
    %189 = vector.shape_cast %188 : vector<8xf32> to vector<8x1xf32>
    %cst_50 = arith.constant 2.000000e+00 : f32
    %190 = vector.broadcast %cst_50 : f32 to vector<8x1xf32>
    %191 = arith.mulf %190, %189 : vector<8x1xf32>
    %cst_51 = arith.constant 1.000000e+00 : f32
    %192 = vector.broadcast %cst_51 : f32 to vector<8x1xf32>
    %193 = arith.addf %192, %191 : vector<8x1xf32>
    %cst_52 = arith.constant 1.000000e+00 : f32
    %194 = vector.broadcast %cst_52 : f32 to vector<1x1xf32>
    %195 = arith.mulf %194, %119 : vector<1x1xf32>
    %196 = vector.broadcast %195 : vector<1x1xf32> to vector<8x1xf32>
    %197 = arith.addf %193, %196 : vector<8x1xf32>
    %198 = vector.broadcast %197 : vector<8x1xf32> to vector<8x384xf32>
    %199 = arith.mulf %198, %183 : vector<8x384xf32>
    %cst_53 = arith.constant 1.000000e+00 : f32
    %200 = vector.broadcast %cst_53 : f32 to vector<8x1xf32>
    %201 = arith.mulf %200, %185 : vector<8x1xf32>
    %cst_54 = arith.constant 1.000000e+00 : f32
    %202 = vector.broadcast %cst_54 : f32 to vector<8x1xf32>
    %203 = arith.subf %202, %201 : vector<8x1xf32>
    %204 = vector.broadcast %203 : vector<8x1xf32> to vector<8x384xf32>
    %205 = vector.broadcast %116 : vector<1x384xf32> to vector<8x384xf32>
    %206 = arith.mulf %204, %205 : vector<8x384xf32>
    %207 = arith.addf %199, %206 : vector<8x384xf32>
    %cst_55 = arith.constant 2.000000e+00 : f32
    %208 = vector.broadcast %cst_55 : f32 to vector<8x1xf32>
    %209 = arith.mulf %208, %189 : vector<8x1xf32>
    %cst_56 = arith.constant 1.000000e+00 : f32
    %210 = vector.broadcast %cst_56 : f32 to vector<8x1xf32>
    %211 = arith.addf %210, %209 : vector<8x1xf32>
    %cst_57 = arith.constant 1.000000e+00 : f32
    %212 = vector.broadcast %cst_57 : f32 to vector<8x1xf32>
    %213 = arith.mulf %212, %185 : vector<8x1xf32>
    %214 = vector.broadcast %119 : vector<1x1xf32> to vector<8x1xf32>
    %215 = arith.mulf %213, %214 : vector<8x1xf32>
    %216 = arith.addf %211, %215 : vector<8x1xf32>
    %cst_58 = arith.constant 1.000000e-15 : f32
    %217 = vector.broadcast %cst_58 : f32 to vector<8x1xf32>
    %218 = arith.maximumf %216, %217 : vector<8x1xf32>
    %219 = tpu.reciprocal %218 {approx = true} : vector<8x1xf32> -> vector<8x1xf32>
    %220 = arith.mulf %218, %219 : vector<8x1xf32>
    %cst_59 = arith.constant 2.000000e+00 : f32
    %221 = vector.broadcast %cst_59 : f32 to vector<8x1xf32>
    %222 = arith.subf %221, %220 : vector<8x1xf32>
    %223 = arith.mulf %219, %222 : vector<8x1xf32>
    %224 = vector.broadcast %223 : vector<8x1xf32> to vector<8x384xf32>
    %225 = arith.mulf %207, %224 : vector<8x384xf32>
    %226 = arith.mulf %225, %225 : vector<8x384xf32>
    %cst_60 = arith.constant dense<0.000000e+00> : vector<8xf32>
    %227 = vector.multi_reduction <add>, %226, %cst_60 [1] : vector<8x384xf32> to vector<8xf32>
    %228 = vector.shape_cast %227 : vector<8xf32> to vector<8x1xf32>
    %cst_61 = arith.constant 1.000000e-30 : f32
    %229 = vector.broadcast %cst_61 : f32 to vector<8x1xf32>
    %230 = arith.maximumf %228, %229 : vector<8x1xf32>
    %231 = math.rsqrt %230 : vector<8x1xf32>
    %232 = arith.mulf %230, %231 : vector<8x1xf32>
    %cst_62 = arith.constant 0.995999991 : f32
    %233 = vector.broadcast %cst_62 : f32 to vector<8x1xf32>
    %234 = arith.cmpf ogt, %232, %233 : vector<8x1xf32>
    %cst_63 = arith.constant 0.995999991 : f32
    %235 = vector.broadcast %cst_63 : f32 to vector<8x1xf32>
    %236 = arith.mulf %235, %231 : vector<8x1xf32>
    %237 = vector.broadcast %236 : vector<8x1xf32> to vector<8x384xf32>
    %238 = arith.mulf %225, %237 : vector<8x384xf32>
    %239 = vector.shape_cast %234 : vector<8x1xi1> to vector<8x1xi1>
    %240 = vector.broadcast %239 : vector<8x1xi1> to vector<8x384xi1>
    %241 = arith.select %240, %238, %225 : vector<8x384xi1>, vector<8x384xf32>
    %cst_64 = arith.constant 9.920160e-01 : f32
    %242 = vector.broadcast %cst_64 : f32 to vector<8x1xf32>
    %243 = arith.select %234, %242, %228 : vector<8x1xi1>, vector<8x1xf32>
    %c0_65 = arith.constant 0 : index
    %c0_66 = arith.constant 0 : index
    %244 = vector.load %arg8[%c0_65, %c0_66] : memref<384x256xbf16, #tpu.memory_space<vmem>>, vector<384x256xbf16>
    %cst_67 = arith.constant 1.000000e-30 : f32
    %245 = vector.broadcast %cst_67 : f32 to vector<8x1xf32>
    %246 = arith.maximumf %243, %245 : vector<8x1xf32>
    %247 = math.rsqrt %246 : vector<8x1xf32>
    %248 = arith.mulf %246, %247 : vector<8x1xf32>
    %249 = arith.truncf %241 : vector<8x384xf32> to vector<8x384xbf16>
    %cst_68 = arith.constant dense<0.000000e+00> : vector<8x256xf32>
    %250 = tpu.matmul %249, %244, %cst_68 {dimension_numbers = #tpu.dot_dimension_numbers<[1], [0], [0], [1], [0, 0, 1, 1], [], []>} : vector<8x384xbf16>, vector<384x256xbf16>, vector<8x256xf32> -> vector<8x256xf32>
    %251 = arith.mulf %250, %250 : vector<8x256xf32>
    %cst_69 = arith.constant dense<0.000000e+00> : vector<8xf32>
    %252 = vector.multi_reduction <add>, %251, %cst_69 [1] : vector<8x256xf32> to vector<8xf32>
    %253 = vector.shape_cast %252 : vector<8xf32> to vector<8x1xf32>
    %cst_70 = arith.constant 1.000000e-30 : f32
    %254 = vector.broadcast %cst_70 : f32 to vector<8x1xf32>
    %255 = arith.maximumf %253, %254 : vector<8x1xf32>
    %256 = math.rsqrt %255 : vector<8x1xf32>
    %257 = arith.mulf %255, %256 : vector<8x1xf32>
    %258 = arith.mulf %257, %247 : vector<8x1xf32>
    %cst_71 = arith.constant 1.000000e+00 : f32
    %259 = vector.broadcast %cst_71 : f32 to vector<8x1xf32>
    %260 = arith.mulf %259, %248 : vector<8x1xf32>
    %cst_72 = arith.constant -0.99999988 : f32
    %cst_73 = arith.constant 0.99999988 : f32
    %261 = vector.broadcast %cst_72 : f32 to vector<8x1xf32>
    %262 = arith.maximumf %261, %260 : vector<8x1xf32>
    %263 = vector.broadcast %cst_73 : f32 to vector<8x1xf32>
    %264 = arith.minimumf %263, %262 : vector<8x1xf32>
    %cst_74 = arith.constant 1.000000e+00 : f32
    %265 = vector.broadcast %cst_74 : f32 to vector<8x1xf32>
    %266 = arith.addf %265, %264 : vector<8x1xf32>
    %267 = math.log %266 : vector<8x1xf32>
    %cst_75 = arith.constant 1.000000e+00 : f32
    %268 = vector.broadcast %cst_75 : f32 to vector<8x1xf32>
    %269 = arith.subf %268, %264 : vector<8x1xf32>
    %270 = math.log %269 : vector<8x1xf32>
    %271 = arith.subf %267, %270 : vector<8x1xf32>
    %cst_76 = arith.constant 5.000000e-01 : f32
    %272 = vector.broadcast %cst_76 : f32 to vector<8x1xf32>
    %273 = arith.mulf %272, %271 : vector<8x1xf32>
    %274 = arith.mulf %258, %273 : vector<8x1xf32>
    %275 = math.tanh %274 : vector<8x1xf32>
    %cst_77 = arith.constant 1.000000e+00 : f32
    %276 = vector.broadcast %cst_77 : f32 to vector<8x1xf32>
    %277 = arith.divf %256, %276 : vector<8x1xf32>
    %278 = arith.mulf %275, %277 : vector<8x1xf32>
    %279 = vector.broadcast %278 : vector<8x1xf32> to vector<8x256xf32>
    %280 = arith.mulf %279, %250 : vector<8x256xf32>
    %281 = arith.mulf %278, %278 : vector<8x1xf32>
    %282 = arith.mulf %281, %253 : vector<8x1xf32>
    %cst_78 = arith.constant 0.000000e+00 : f32
    %283 = vector.broadcast %cst_78 : f32 to vector<8x1xf32>
    %284 = arith.cmpf oeq, %253, %283 : vector<8x1xf32>
    %cst_79 = arith.constant 0.000000e+00 : f32
    %285 = vector.shape_cast %284 : vector<8x1xi1> to vector<8x1xi1>
    %286 = vector.broadcast %285 : vector<8x1xi1> to vector<8x256xi1>
    %287 = vector.broadcast %cst_79 : f32 to vector<8x256xf32>
    %288 = arith.select %286, %287, %280 : vector<8x256xi1>, vector<8x256xf32>
    %cst_80 = arith.constant 0.000000e+00 : f32
    %289 = vector.broadcast %cst_80 : f32 to vector<8x1xf32>
    %290 = arith.select %284, %289, %282 : vector<8x1xi1>, vector<8x1xf32>
    %cst_81 = arith.constant 1.000000e-30 : f32
    %291 = vector.broadcast %cst_81 : f32 to vector<8x1xf32>
    %292 = arith.maximumf %290, %291 : vector<8x1xf32>
    %293 = math.rsqrt %292 : vector<8x1xf32>
    %294 = arith.mulf %292, %293 : vector<8x1xf32>
    %cst_82 = arith.constant 0.995999991 : f32
    %295 = vector.broadcast %cst_82 : f32 to vector<8x1xf32>
    %296 = arith.cmpf ogt, %294, %295 : vector<8x1xf32>
    %cst_83 = arith.constant 0.995999991 : f32
    %297 = vector.broadcast %cst_83 : f32 to vector<8x1xf32>
    %298 = arith.mulf %297, %293 : vector<8x1xf32>
    %299 = vector.broadcast %298 : vector<8x1xf32> to vector<8x256xf32>
    %300 = arith.mulf %288, %299 : vector<8x256xf32>
    %301 = vector.shape_cast %296 : vector<8x1xi1> to vector<8x1xi1>
    %302 = vector.broadcast %301 : vector<8x1xi1> to vector<8x256xi1>
    %303 = arith.select %302, %300, %288 : vector<8x256xi1>, vector<8x256xf32>
    %cst_84 = arith.constant 9.920160e-01 : f32
    %304 = vector.broadcast %cst_84 : f32 to vector<8x1xf32>
    %305 = arith.select %296, %304, %290 : vector<8x1xi1>, vector<8x1xf32>
    %306 = vector.broadcast %120 : vector<1x256xf32> to vector<8x256xf32>
    %307 = arith.mulf %303, %306 : vector<8x256xf32>
    %cst_85 = arith.constant dense<0.000000e+00> : vector<8xf32>
    %308 = vector.multi_reduction <add>, %307, %cst_85 [1] : vector<8x256xf32> to vector<8xf32>
    %309 = vector.shape_cast %308 : vector<8xf32> to vector<8x1xf32>
    %cst_86 = arith.constant 2.000000e+00 : f32
    %310 = vector.broadcast %cst_86 : f32 to vector<8x1xf32>
    %311 = arith.mulf %310, %309 : vector<8x1xf32>
    %cst_87 = arith.constant 1.000000e+00 : f32
    %312 = vector.broadcast %cst_87 : f32 to vector<8x1xf32>
    %313 = arith.addf %312, %311 : vector<8x1xf32>
    %cst_88 = arith.constant 1.000000e+00 : f32
    %314 = vector.broadcast %cst_88 : f32 to vector<1x1xf32>
    %315 = arith.mulf %314, %123 : vector<1x1xf32>
    %316 = vector.broadcast %315 : vector<1x1xf32> to vector<8x1xf32>
    %317 = arith.addf %313, %316 : vector<8x1xf32>
    %318 = vector.broadcast %317 : vector<8x1xf32> to vector<8x256xf32>
    %319 = arith.mulf %318, %303 : vector<8x256xf32>
    %cst_89 = arith.constant 1.000000e+00 : f32
    %320 = vector.broadcast %cst_89 : f32 to vector<8x1xf32>
    %321 = arith.mulf %320, %305 : vector<8x1xf32>
    %cst_90 = arith.constant 1.000000e+00 : f32
    %322 = vector.broadcast %cst_90 : f32 to vector<8x1xf32>
    %323 = arith.subf %322, %321 : vector<8x1xf32>
    %324 = vector.broadcast %323 : vector<8x1xf32> to vector<8x256xf32>
    %325 = vector.broadcast %120 : vector<1x256xf32> to vector<8x256xf32>
    %326 = arith.mulf %324, %325 : vector<8x256xf32>
    %327 = arith.addf %319, %326 : vector<8x256xf32>
    %cst_91 = arith.constant 2.000000e+00 : f32
    %328 = vector.broadcast %cst_91 : f32 to vector<8x1xf32>
    %329 = arith.mulf %328, %309 : vector<8x1xf32>
    %cst_92 = arith.constant 1.000000e+00 : f32
    %330 = vector.broadcast %cst_92 : f32 to vector<8x1xf32>
    %331 = arith.addf %330, %329 : vector<8x1xf32>
    %cst_93 = arith.constant 1.000000e+00 : f32
    %332 = vector.broadcast %cst_93 : f32 to vector<8x1xf32>
    %333 = arith.mulf %332, %305 : vector<8x1xf32>
    %334 = vector.broadcast %123 : vector<1x1xf32> to vector<8x1xf32>
    %335 = arith.mulf %333, %334 : vector<8x1xf32>
    %336 = arith.addf %331, %335 : vector<8x1xf32>
    %cst_94 = arith.constant 1.000000e-15 : f32
    %337 = vector.broadcast %cst_94 : f32 to vector<8x1xf32>
    %338 = arith.maximumf %336, %337 : vector<8x1xf32>
    %339 = tpu.reciprocal %338 {approx = true} : vector<8x1xf32> -> vector<8x1xf32>
    %340 = arith.mulf %338, %339 : vector<8x1xf32>
    %cst_95 = arith.constant 2.000000e+00 : f32
    %341 = vector.broadcast %cst_95 : f32 to vector<8x1xf32>
    %342 = arith.subf %341, %340 : vector<8x1xf32>
    %343 = arith.mulf %339, %342 : vector<8x1xf32>
    %344 = vector.broadcast %343 : vector<8x1xf32> to vector<8x256xf32>
    %345 = arith.mulf %327, %344 : vector<8x256xf32>
    %346 = arith.mulf %345, %345 : vector<8x256xf32>
    %cst_96 = arith.constant dense<0.000000e+00> : vector<8xf32>
    %347 = vector.multi_reduction <add>, %346, %cst_96 [1] : vector<8x256xf32> to vector<8xf32>
    %348 = vector.shape_cast %347 : vector<8xf32> to vector<8x1xf32>
    %cst_97 = arith.constant 1.000000e-30 : f32
    %349 = vector.broadcast %cst_97 : f32 to vector<8x1xf32>
    %350 = arith.maximumf %348, %349 : vector<8x1xf32>
    %351 = math.rsqrt %350 : vector<8x1xf32>
    %352 = arith.mulf %350, %351 : vector<8x1xf32>
    %cst_98 = arith.constant 0.995999991 : f32
    %353 = vector.broadcast %cst_98 : f32 to vector<8x1xf32>
    %354 = arith.cmpf ogt, %352, %353 : vector<8x1xf32>
    %cst_99 = arith.constant 0.995999991 : f32
    %355 = vector.broadcast %cst_99 : f32 to vector<8x1xf32>
    %356 = arith.mulf %355, %351 : vector<8x1xf32>
    %357 = vector.broadcast %356 : vector<8x1xf32> to vector<8x256xf32>
    %358 = arith.mulf %345, %357 : vector<8x256xf32>
    %359 = vector.shape_cast %354 : vector<8x1xi1> to vector<8x1xi1>
    %360 = vector.broadcast %359 : vector<8x1xi1> to vector<8x256xi1>
    %361 = arith.select %360, %358, %345 : vector<8x256xi1>, vector<8x256xf32>
    %c0_100 = arith.constant 0 : index
    %c0_101 = arith.constant 0 : index
    %362 = vector.load %arg10[%c0_100, %c0_101] : memref<8x256xf32, #tpu.memory_space<vmem>>, vector<8x256xf32>
    tpu.vector_store %arg10[%c0_100, %c0_101], %361 {strides = array<i32>} : memref<8x256xf32, #tpu.memory_space<vmem>>, vector<8x256xf32>,
    return
  }
  func.func @transform_0(%arg0: i32) -> (i32, i32) {
    %c0_i32 = arith.constant 0 : i32
    %c0_i32_0 = arith.constant 0 : i32
    return %arg0, %c0_i32 : i32, i32
  }
  func.func @transform_1(%arg0: i32) -> (i32, i32) {
    %c0_i32 = arith.constant 0 : i32
    %c0_i32_0 = arith.constant 0 : i32
    return %arg0, %c0_i32 : i32, i32
  }
  func.func @transform_2(%arg0: i32) -> (i32, i32) {
    %c0_i32 = arith.constant 0 : i32
    %c0_i32_0 = arith.constant 0 : i32
    %c0_i32_1 = arith.constant 0 : i32
    return %c0_i32, %c0_i32_0 : i32, i32
  }
  func.func @transform_3(%arg0: i32) -> (i32, i32) {
    %c0_i32 = arith.constant 0 : i32
    %c0_i32_0 = arith.constant 0 : i32
    %c0_i32_1 = arith.constant 0 : i32
    return %c0_i32, %c0_i32_0 : i32, i32
  }
  func.func @transform_4(%arg0: i32) -> (i32, i32) {
    %c0_i32 = arith.constant 0 : i32
    %c0_i32_0 = arith.constant 0 : i32
    %c0_i32_1 = arith.constant 0 : i32
    return %c0_i32, %c0_i32_0 : i32, i32
  }
  func.func @transform_5(%arg0: i32) -> (i32, i32) {
    %c0_i32 = arith.constant 0 : i32
    %c0_i32_0 = arith.constant 0 : i32
    %c0_i32_1 = arith.constant 0 : i32
    return %c0_i32, %c0_i32_0 : i32, i32
  }
  func.func @transform_6(%arg0: i32) -> (i32, i32) {
    %c0_i32 = arith.constant 0 : i32
    %c0_i32_0 = arith.constant 0 : i32
    %c0_i32_1 = arith.constant 0 : i32
    return %c0_i32, %c0_i32_0 : i32, i32
  }
  func.func @transform_7(%arg0: i32) -> (i32, i32) {
    %c0_i32 = arith.constant 0 : i32
    %c0_i32_0 = arith.constant 0 : i32
    %c0_i32_1 = arith.constant 0 : i32
    return %c0_i32, %c0_i32_0 : i32, i32
  }
  func.func @transform_8(%arg0: i32) -> (i32, i32) {
    %c0_i32 = arith.constant 0 : i32
    %c0_i32_0 = arith.constant 0 : i32
    %c0_i32_1 = arith.constant 0 : i32
    return %c0_i32, %c0_i32_0 : i32, i32
  }
  func.func @transform_9(%arg0: i32) -> (i32, i32) {
    %c0_i32 = arith.constant 0 : i32
    %c0_i32_0 = arith.constant 0 : i32
    return %arg0, %c0_i32 : i32, i32
  }
}

</mosaic_0001>

<bundles_post_ra>
// kernel: multiclass_classifier.1
= control target key start
LH: loop header
LB: loop body
LE: loop exit
PB: predicated region body
PF: predicated region fallthrough
CT: control target
= control target key end

     0   :  { %14 = vsyncpa [#allocation3], 0  ;;  %s8109_s0 = inlined_call_operand.vmem [shape: s32[8,8], index: 0, kind: input, shape index: {}]   ;;  %s8110_s1 = inlined_call_operand.vmem [shape: f32[8,8], index: 1, kind: input, shape index: {}]   ;;  %s8111_s2 = inlined_call_operand.hbm [shape: bf16[128,768], index: 2, kind: input, shape index: {}]   ;;  %s8112_s3 = inlined_call_operand.hbm [shape: bf16[768,768], index: 3, kind: input, shape index: {}]   ;;  %s8113_s4 = inlined_call_operand.hbm [shape: f32[1,768], index: 4, kind: input, shape index: {}]   ;;  %s8114_s5 = inlined_call_operand.hbm [shape: bf16[768,384], index: 5, kind: input, shape index: {}]   ;;  %s8115_s6 = inlined_call_operand.hbm [shape: f32[1,384], index: 6, kind: input, shape index: {}]   ;;  %s8116_s7 = inlined_call_operand.hbm [shape: bf16[384,256], index: 7, kind: input, shape index: {}]   ;;  %s8117_s8 = inlined_call_operand.hbm [shape: f32[1,256], index: 8, kind: input, shape index: {}]   ;;  %s8118_s9 = inlined_call_operand.vmem [shape: f32[8,256], index: 9, kind: output, shape index: {}]  }
   0x1   :  { %15 = vsyncpa [#allocation5], 0 }
   0x2   :  { %16 = vsyncpa [#allocation8], 0 }
   0x3   :  { %17 = vsyncpa [#allocation11], 0  ;;  %s39_s11 = sshll.u32 %s8112_s3, 4  ;;  %s7691_s12 = smov [#allocation4]   ;;  %s40_s11 = int_to_ptr.hbm [resolvable:$true] %s39_s11 }
   0x4   :  { %s41_s13 = sshll.u32 %s7691_s12, 4  ;;  %s63_s16 = sshll.u32 %s8114_s5, 4  ;;  %s42_s13 = int_to_ptr.vmem [resolvable:$true] %s41_s13  ;;  %s64_s16 = int_to_ptr.hbm [resolvable:$true] %s63_s16 }
   0x5   :  { %s7692_s17 = smov 384   ;;  %s7693_s18 = smov 24  }
   0x6   :  { %47 = dma.hbm_to_vmem [thread:$0]  %s40_s11, 36864, %s42_s13, [#allocation5], %s7692_s17, %s7692_s17, %s7693_s18  }
   0x7   :  { %s7694_s19 = smov [#allocation7]   ;;  %s7695_s21 = smov 192  }
   0x8   :  { %s65_s20 = sshll.u32 %s7694_s19, 4  ;;  %s7696_s22 = smov 12   ;;  %s66_s20 = int_to_ptr.vmem [resolvable:$true] %s65_s20 }
   0x9   :  { %71 = dma.hbm_to_vmem [thread:$0]  %s64_s16, 18432, %s66_s20, [#allocation8], %s7695_s21, %s7695_s21, %s7696_s22  }
   0xa   :  { %s87_s24 = sshll.u32 %s8116_s7, 4  ;;  %s7697_s25 = smov [#allocation10]   ;;  %s88_s24 = int_to_ptr.hbm [resolvable:$true] %s87_s24 }
   0xb   :  { %s89_s26 = sshll.u32 %s7697_s25, 4  ;;  %s26_s28 = sshll.u32 %s8111_s2, 4  ;;  %s90_s26 = int_to_ptr.vmem [resolvable:$true] %s89_s26  ;;  %s27_s28 = int_to_ptr.hbm [resolvable:$true] %s26_s28 }
   0xc   :  { %s7698_s29 = smov 128   ;;  %s7699_s30 = smov 8  }
   0xd   :  { %95 = dma.hbm_to_vmem [thread:$0]  %s88_s24, 6144, %s90_s26, [#allocation11], %s7698_s29, %s7698_s29, %s7699_s30  }
   0xe   :  { %s7700_s10 = smov [#allocation2]   ;;  %s53_s14 = sshll.u32 %s8113_s4, 4  ;;  %s54_s14 = int_to_ptr.hbm [resolvable:$true] %s53_s14 }
   0xf   :  { %s28_s11 = sshll.u32 %s7700_s10, 4  ;;  %s77_s16 = sshll.u32 %s8115_s6, 4  ;;  %s29_s11 = int_to_ptr.vmem [resolvable:$true] %s28_s11  ;;  %s78_s16 = int_to_ptr.hbm [resolvable:$true] %s77_s16 }
  0x10   :  { %34 = dma.hbm_to_vmem [thread:$0]  %s27_s28, 6144, %s29_s11, [#allocation3], %s7692_s17, %s7692_s17, %s7693_s18  }
  0x11   :  { %s7701_s19 = smov [#allocation6]   ;;  %s7702_s2 = smov [#allocation9]  }
  0x12   :  { %s55_s20 = sshll.u32 %s7701_s19, 4  ;;  %s79_s21 = sshll.u32 %s7702_s2, 4  ;;  %s56_s20 = int_to_ptr.vmem [resolvable:$true] %s55_s20  ;;  %s80_s21 = int_to_ptr.vmem [resolvable:$true] %s79_s21 }
  0x13   :  { %58 = dma.hbm_to_vmem [thread:$0]  %s54_s14, 96, %s56_s20, [#allocation5]  }
  0x14   :  { %s101_s3 = sshll.u32 %s8117_s8, 4  ;;  %s7703_s4 = smov [#allocation12]   ;;  %s102_s3 = int_to_ptr.hbm [resolvable:$true] %s101_s3 }
  0x15   :  { %82 = dma.hbm_to_vmem [thread:$0]  %s78_s16, 48, %s80_s21, [#allocation8]  }
  0x16   :  { %s103_s17 = sshll.u32 %s7703_s4, 4  ;;  %s104_s17 = int_to_ptr.vmem [resolvable:$true] %s103_s17 }
  0x17   :  { %106 = dma.hbm_to_vmem [thread:$0]  %s102_s3, 32, %s104_s17, [#allocation11]  }
  0x18   :  { %7683 = dma.done.wait [#allocation3], 6144  }
  0x19   :  { %7684 = vsyncadd [#allocation3], 4294961152 }
  0x1a   :  { %7685 = dma.done.wait [#allocation5], 36960  }
  0x1b   :  { %7686 = vsyncadd [#allocation5], 4294930336 }
  0x1c   :  { %7687 = dma.done.wait [#allocation8], 18480  }
  0x1d   :  { %7688 = vsyncadd [#allocation8], 4294948816 }
  0x1e   :  { %7689 = dma.done.wait [#allocation11], 6176  }
  0x1f   :  { %7690 = vsyncadd [#allocation11], 4294961120  ;;  %v7704_v0 = vmov 0   ;;  %v7705_v1 = vmov 2   ;;  %v7793_v2 = vld [vmem:[%s8110_s1] sm:$0xff]  ;;  %v7706_v4 = vmov 1  }
  0x20   :  { %7450 = vset.pattern.permute.xlu1 %v7704_v0  ;;  %7448 = vset.pattern.permute.xlu0 %v7704_v0  ;;  %v135_v3 = vld [vmem:[%s8109_s0] sm:$0xff]  ;;  %v7707_v5 = vmov 3   ;;  %v7708_v6 = vmov 4   ;;  %v7709_v7 = vmov 6   ;;  %v7710_v8 = vmov 5   ;;  %s7711_s0 = smov 125  }
  0x21   :  { %7452 = vset.pattern.permute.xlu2 %v7705_v1  ;;  %145 = vperm.xlu1 %7450, %v7793_v2   ;;  %s7712_s1 = smov 122   ;;  %v7713_v9 = vmov 7   ;;  %s7714_s25 = smov 127   ;;  %v4948_v10 = vld [vmem:[#allocation2 + $0x150] sm:$0xf]  ;;  %vm2902_vm11 = vcmask 1040384  }
  0x22   :  { %140 = vperm.xlu0 %7448, %v135_v3   ;;  %166 = vperm.xlu2 %7452, %v135_v3   ;;  %s7715_s26 = smov 126   ;;  %s7716_s27 = smov 124   ;;  %v6937_v11 = vld [vmem:[#allocation2 + $0x164] sm:$0xf0]  ;;  %v6934_v12 = vld [vmem:[#allocation2 + $0x154] sm:$0xf] }
  0x23   :  { %s7717_s5 = smov 123   ;;  %s7718_s28 = smov 121   ;;  %v4949_v13 = vor.u32 %v6937_v11, %v4948_v10  ;;  %v4950_v14 = vld [vmem:[#allocation2 + $0x168] sm:$0xf0]  ;;  %v4924_v16 = vld [vmem:[#allocation2 + $0x120] sm:$0xf] }
  0x24   :  { %v4953_v15 = vor.u32 %v6934_v12, %v4950_v14  ;;  %v6931_v17 = vld [vmem:[#allocation2 + $0x134] sm:$0xf0]  ;;  %v6928_v18 = vld [vmem:[#allocation2 + $0x124] sm:$0xf]  ;;  %v4926_v20 = vld [vmem:[#allocation2 + $0x138] sm:$0xf0] }
  0x25   :  { %538 = vmatpush.bf16.msra.mxu0 %v4949_v13  ;;  %v4925_v19 = vor.u32 %v6931_v17, %v4924_v16  ;;  %v4929_v21 = vor.u32 %v6928_v18, %v4926_v20  ;;  %v4900_v22 = vld [vmem:[#allocation2 + $0xf0] sm:$0xf]  ;;  %v6925_v23 = vld [vmem:[#allocation2 + $0x104] sm:$0xf0]  ;;  %v6922_v24 = vld [vmem:[#allocation2 + $0xf4] sm:$0xf] }
  0x26   :  { %551 = vmatpush.bf16.msra.mxu1 %v4953_v15  ;;  %v4901_v25 = vor.u32 %v6925_v23, %v4900_v22  ;;  %v4902_v26 = vld [vmem:[#allocation2 + $0x108] sm:$0xf0]  ;;  %v4876_v28 = vld [vmem:[#allocation2 + $0xc0] sm:$0xf]  ;;  %v6919_v29 = vld [vmem:[#allocation2 + $0xd4] sm:$0xf0] }
  0x27   :  { %v4905_v27 = vor.u32 %v6922_v24, %v4902_v26  ;;  %v6916_v30 = vld [vmem:[#allocation2 + $0xc4] sm:$0xf]  ;;  %v4877_v31 = vor.u32 %v6919_v29, %v4876_v28  ;;  %v4878_v32 = vld [vmem:[#allocation2 + $0xd8] sm:$0xf0]  ;;  %v4956_v33 = vld [vmem:[#allocation2 + $0x158] sm:$0xf] }
  0x28   :  { %v6938_v34 = vld [vmem:[#allocation2 + $0x16c] sm:$0xf0]  ;;  %v4881_v35 = vor.u32 %v6916_v30, %v4878_v32  ;;  %v6935_v37 = vld [vmem:[#allocation2 + $0x15c] sm:$0xf]  ;;  %v4958_v38 = vld [vmem:[#allocation2 + $0x170] sm:$0xf0] }
  0x29   :  { %7451 = vset.pattern.permute.xlu1 %v7706_v4  ;;  %539 = vmatpush.bf16.msra.mxu0 %v4925_v19  ;;  %v4957_v36 = vor.u32 %v6938_v34, %v4956_v33  ;;  %v4961_v39 = vor.u32 %v6935_v37, %v4958_v38  ;;  %v4852_v40 = vld [vmem:[#allocation2 + $0x90] sm:$0xf]  ;;  %v6913_v41 = vld [vmem:[#allocation2 + $0xa4] sm:$0xf0]  ;;  %v6910_v42 = vld [vmem:[#allocation2 + $0x94] sm:$0xf] }
  0x2a   :  { %7449 = vset.pattern.permute.xlu0 %v7706_v4  ;;  %156 = vperm.xlu1 %7451, %v7793_v2   ;;  %v4853_v43 = vor.u32 %v6913_v41, %v4852_v40  ;;  %v4854_v44 = vld [vmem:[#allocation2 + $0xa8] sm:$0xf0]  ;;  %v4932_v45 = vld [vmem:[#allocation2 + $0x128] sm:$0xf]  ;;  %v6932_v46 = vld [vmem:[#allocation2 + $0x13c] sm:$0xf0] }
  0x2b   :  { %152 = vperm.xlu0 %7449, %v135_v3   ;;  %170 = vperm.xlu2 %7452, %v7793_v2   ;;  %v4857_v47 = vor.u32 %v6910_v42, %v4854_v44  ;;  %v4933_v48 = vor.u32 %v6932_v46, %v4932_v45  ;;  %v6929_v49 = vld [vmem:[#allocation2 + $0x12c] sm:$0xf]  ;;  %v4934_v50 = vld [vmem:[#allocation2 + $0x140] sm:$0xf0]  ;;  %v4828_v52 = vld [vmem:[#allocation2 + $0x60] sm:$0xf] }
  0x2c   :  { %552 = vmatpush.bf16.msra.mxu1 %v4929_v21  ;;  %564 = vmatpush.bf16.msra.mxu2 %v4957_v36  ;;  %v4937_v51 = vor.u32 %v6929_v49, %v4934_v50  ;;  %v6907_v53 = vld [vmem:[#allocation2 + $0x74] sm:$0xf0]  ;;  %v6904_v54 = vld [vmem:[#allocation2 + $0x64] sm:$0xf]  ;;  %v4830_v56 = vld [vmem:[#allocation2 + $0x78] sm:$0xf0] }
  0x2d   :  { %540 = vmatpush.bf16.msra.mxu0 %v4901_v25  ;;  %577 = vmatpush.bf16.msra.mxu3 %v4961_v39  ;;  %v4829_v55 = vor.u32 %v6907_v53, %v4828_v52  ;;  %v4908_v57 = vld [vmem:[#allocation2 + $0xf8] sm:$0xf]  ;;  %v6926_v58 = vld [vmem:[#allocation2 + $0x10c] sm:$0xf0]  ;;  %v4833_v60 = vor.u32 %v6904_v54, %v4830_v56  ;;  %v6923_v62 = vld [vmem:[#allocation2 + $0xfc] sm:$0xf] }
  0x2e   :  { %v4909_v61 = vor.u32 %v6926_v58, %v4908_v57  ;;  %v4910_v63 = vld [vmem:[#allocation2 + $0x110] sm:$0xf0]  ;;  %v4804_v1 = vld [vmem:[#allocation2 + $0x30] sm:$0xf]  ;;  %v6917_v11 = vld [vmem:[#allocation2 + $0xcc] sm:$0xf] }
  0x2f   :  { %v6898_v4 = vld [vmem:[#allocation2 + $0x34] sm:$0xf]  ;;  %v4886_v12 = vld [vmem:[#allocation2 + $0xe0] sm:$0xf0]  ;;  %v4780_v13 = vld [vmem:[#allocation2] sm:$0xf] }
  0x30   :  { %553 = vmatpush.bf16.msra.mxu1 %v4905_v27  ;;  %565 = vmatpush.bf16.msra.mxu2 %v4933_v48  ;;  %v4889_v15 = vor.u32 %v6917_v11, %v4886_v12  ;;  %v6895_v16 = vld [vmem:[#allocation2 + $0x14] sm:$0xf0]  ;;  %v6892_v17 = vld [vmem:[#allocation2 + $0x4] sm:$0xf]  ;;  %v4782_v18 = vld [vmem:[#allocation2 + $0x18] sm:$0xf0]  ;;  %v137_v12 = vlaneseq }
  0x31   :  { %541 = vmatpush.bf16.msra.mxu0 %v4877_v31  ;;  %578 = vmatpush.bf16.msra.mxu3 %v4937_v51  ;;  %v4781_v19 = vor.u32 %v6895_v16, %v4780_v13  ;;  %v4785_v20 = vor.u32 %v6892_v17, %v4782_v18  ;;  %v4860_v21 = vld [vmem:[#allocation2 + $0x98] sm:$0xf]  ;;  %v6914_v22 = vld [vmem:[#allocation2 + $0xac] sm:$0xf0]  ;;  %v6911_v24 = vld [vmem:[#allocation2 + $0x9c] sm:$0xf] }
  0x32   :  { %7453 = vset.pattern.permute.xlu1 %v7707_v5  ;;  %v4861_v23 = vor.u32 %v6914_v22, %v4860_v21  ;;  %v4862_v25 = vld [vmem:[#allocation2 + $0xb0] sm:$0xf0]  ;;  %v4964_v26 = vld [vmem:[#allocation2 + $0x160] sm:$0xf]  ;;  %v6939_v28 = vld [vmem:[#allocation2 + $0x174] sm:$0xf0] }
  0x33   :  { %7455 = vset.pattern.permute.xlu0 %v7708_v6  ;;  %180 = vperm.xlu1 %7453, %v135_v3   ;;  %v4865_v27 = vor.u32 %v6911_v24, %v4862_v25  ;;  %v6936_v29 = vld [vmem:[#allocation2 + $0x164] sm:$0xf]  ;;  %v4966_v30 = vld [vmem:[#allocation2 + $0x178] sm:$0xf0]  ;;  %v4965_v32 = vor.u32 %v6939_v28, %v4964_v26  ;;  %v4836_v34 = vld [vmem:[#allocation2 + $0x68] sm:$0xf] }
  0x34   :  { %194 = vperm.xlu0 %7455, %v135_v3   ;;  %7454 = vset.pattern.permute.xlu2 %v7707_v5  ;;  %v4969_v33 = vor.u32 %v6936_v29, %v4966_v30  ;;  %v6905_v36 = vld [vmem:[#allocation2 + $0x6c] sm:$0xf]  ;;  %v4838_v38 = vld [vmem:[#allocation2 + $0x80] sm:$0xf0]  ;;  %v4940_v39 = vld [vmem:[#allocation2 + $0x130] sm:$0xf] }
  0x35   :  { %184 = vperm.xlu2 %7454, %v7793_v2   ;;  %554 = vmatpush.bf16.msra.mxu1 %v4881_v35  ;;  %v6908_v35 = vld [vmem:[#allocation2 + $0x7c] sm:$0xf0]  ;;  %v6933_v40 = vld [vmem:[#allocation2 + $0x144] sm:$0xf0]  ;;  %v4841_v41 = vor.u32 %v6905_v36, %v4838_v38  ;;  %v4942_v44 = vld [vmem:[#allocation2 + $0x148] sm:$0xf0] }
  0x36   :  { %542 = vmatpush.bf16.msra.mxu0 %v4853_v43  ;;  %566 = vmatpush.bf16.msra.mxu2 %v4909_v61  ;;  %v4837_v37 = vor.u32 %v6908_v35, %v4836_v34  ;;  %v4941_v42 = vor.u32 %v6933_v40, %v4940_v39  ;;  %v6930_v43 = vld [vmem:[#allocation2 + $0x134] sm:$0xf]  ;;  %v4812_v45 = vld [vmem:[#allocation2 + $0x38] sm:$0xf]  ;;  %v6902_v48 = vld [vmem:[#allocation2 + $0x4c] sm:$0xf0] }
  0x37   :  { %v6899_v49 = vld [vmem:[#allocation2 + $0x3c] sm:$0xf]  ;;  %v4814_v50 = vld [vmem:[#allocation2 + $0x50] sm:$0xf0]  ;;  %v4813_v51 = vor.u32 %v6902_v48, %v4812_v45  ;;  %v4916_v53 = vld [vmem:[#allocation2 + $0x100] sm:$0xf] }
  0x38   :  { %v4817_v52 = vor.u32 %v6899_v49, %v4814_v50  ;;  %v6927_v54 = vld [vmem:[#allocation2 + $0x114] sm:$0xf0]  ;;  %v4918_v57 = vld [vmem:[#allocation2 + $0x118] sm:$0xf0]  ;;  %v4868_v13 = vld [vmem:[#allocation2 + $0xa0] sm:$0xf] }
  0x39   :  { %555 = vmatpush.bf16.msra.mxu1 %v4857_v47  ;;  %v4945_v47 = vor.u32 %v6930_v43, %v4942_v44  ;;  %v4917_v56 = vor.u32 %v6927_v54, %v4916_v53  ;;  %v6912_v16 = vld [vmem:[#allocation2 + $0xa4] sm:$0xf]  ;;  %v4870_v18 = vld [vmem:[#allocation2 + $0xb8] sm:$0xf0]  ;;  %v6909_v21 = vld [vmem:[#allocation2 + $0x84] sm:$0xf0] }
  0x3a   :  { %543 = vmatpush.bf16.msra.mxu0 %v4829_v55  ;;  %v6924_v55 = vld [vmem:[#allocation2 + $0x104] sm:$0xf]  ;;  %v6906_v22 = vld [vmem:[#allocation2 + $0x74] sm:$0xf]  ;;  %v4820_v29 = vld [vmem:[#allocation2 + $0x40] sm:$0xf] }
  0x3b   :  { %7456 = vset.pattern.permute.xlu1 %v7708_v6  ;;  %v4806_v6 = vld [vmem:[#allocation2 + $0x48] sm:$0xf0]  ;;  %v4921_v58 = vor.u32 %v6924_v55, %v4918_v57  ;;  %v6903_v30 = vld [vmem:[#allocation2 + $0x54] sm:$0xf0]  ;;  %v4796_v38 = vld [vmem:[#allocation2 + $0x10] sm:$0xf] }
  0x3c   :  { %7460 = vset.pattern.permute.xlu0 %v7709_v7  ;;  %198 = vperm.xlu1 %7456, %v7793_v2   ;;  %v4821_v35 = vor.u32 %v6903_v30, %v4820_v29  ;;  %v6897_v39 = vld [vmem:[#allocation2 + $0x24] sm:$0xf0]  ;;  %v6894_v40 = vld [vmem:[#allocation2 + $0x14] sm:$0xf]  ;;  %v4798_v44 = vld [vmem:[#allocation2 + $0x28] sm:$0xf0] }
  0x3d   :  { %226 = vperm.xlu0 %7460, %v7793_v2   ;;  %7457 = vset.pattern.permute.xlu2 %v7710_v8  ;;  %v4797_v43 = vor.u32 %v6897_v39, %v4796_v38  ;;  %v5692_v30 = vld [vmem:[#allocation4 + $0x5a0] sm:$0xf] }
  0x3e   :  { %208 = vperm.xlu2 %7457, %v135_v3   ;;  %556 = vmatpush.bf16.msra.mxu1 %v4833_v60 }
  0x44   :  { %7458 = vset.pattern.permute.xlu1 %v7710_v8  ;;  %v6920_v8 = vld [vmem:[#allocation2 + $0xdc] sm:$0xf0] }
  0x45   :  { %189 = vrot.lane.b32.xlu0 %v7793_v2, %s7711_s0  ;;  %212 = vperm.xlu1 %7458, %v7793_v2  }
  0x46   :  { %7464 = vset.pattern.permute.xlu0 %v7704_v0  ;;  %7459 = vset.pattern.permute.xlu2 %v7709_v7  ;;  %v4884_v7 = vld [vmem:[#allocation2 + $0xc8] sm:$0xf] }
  0x47   :  { %222 = vperm.xlu2 %7459, %v135_v3   ;;  %v4885_v10 = vor.u32 %v6920_v8, %v4884_v7  ;;  %v6918_v8 = vld [vmem:[#allocation2 + $0xd4] sm:$0xf] }
  0x49   :  { %567 = vmatpush.bf16.msra.mxu2 %v4885_v10 }
  0x4d   :  { %231 = vrot.lane.b32.xlu0 %v7793_v2, %s7712_s1  ;;  %7461 = vset.pattern.permute.xlu1 %v7713_v9 }
  0x4e   :  { %236 = vperm.xlu1 %7461, %v135_v3   ;;  %v6901_v3 = vld [vmem:[#allocation2 + $0x44] sm:$0xf0]  ;;  %568 = vmatpush.bf16.msra.mxu2 %v4861_v23  ;;  %v138_v23 = vand.u32 127, %v137_v12 }
  0x4f   :  { %7462 = vset.pattern.permute.xlu2 %v7713_v9  ;;  %v4805_v5 = vor.u32 %v6901_v3, %v4804_v1  ;;  %v4809_v9 = vor.u32 %v6898_v4, %v4806_v6  ;;  %v4790_v3 = vld [vmem:[#allocation2 + $0x20] sm:$0xf0]  ;;  %v4892_v4 = vld [vmem:[#allocation2 + $0xd0] sm:$0xf]  ;;  %v7081_v12 = vld [vmem:[#allocation4 + $0x464] sm:$0xf0] }
  0x50   :  { %240 = vperm.xlu2 %7462, %v7793_v2  }
  0x51   :  { %544 = vmatpush.bf16.msra.mxu0 %v4805_v5  ;;  %557 = vmatpush.bf16.msra.mxu1 %v4809_v9  ;;  %v6921_v5 = vld [vmem:[#allocation2 + $0xe4] sm:$0xf0]  ;;  %v4894_v9 = vld [vmem:[#allocation2 + $0xe8] sm:$0xf0] }
  0x52   :  { %569 = vmatpush.bf16.msra.mxu2 %v4837_v37  ;;  %v4893_v7 = vor.u32 %v6921_v5, %v4892_v4  ;;  %v4897_v10 = vor.u32 %v6918_v8, %v4894_v9  ;;  %v7033_v4 = vld [vmem:[#allocation4 + $0x2e4] sm:$0xf0]  ;;  %v5116_v5 = vld [vmem:[#allocation4 + $0x120] sm:$0xf] }
  0x53   :  { %v5308_v9 = vld [vmem:[#allocation4 + $0x2a0] sm:$0xf] }
  0x55   :  { %545 = vmatpush.bf16.msra.mxu0 %v4781_v19  ;;  %558 = vmatpush.bf16.msra.mxu1 %v4785_v20  ;;  %v4873_v19 = vor.u32 %v6912_v16, %v4870_v18  ;;  %v4844_v20 = vld [vmem:[#allocation2 + $0x70] sm:$0xf] }
  0x56   :  { %161 = vrot.lane.b32.xlu1 %v7793_v2, %s7714_s25  ;;  %570 = vmatpush.bf16.msra.mxu2 %v4813_v51  ;;  %v4845_v26 = vor.u32 %v6909_v21, %v4844_v20  ;;  %v5092_v20 = vld [vmem:[#allocation4 + $0xf0] sm:$0xf]  ;;  %v6973_v21 = vld [vmem:[#allocation4 + $0x104] sm:$0xf0] }
  0x58   :  { %175 = vrot.lane.b32.xlu2 %v7793_v2, %s7715_s26 }
  0x59   :  { %7463 = vset.pattern.permute.xlu2 %v7704_v0  ;;  %v4913_v0 = vor.u32 %v6923_v62, %v4910_v63  ;;  %590 = vmatpush.bf16.msrb.mxu0 %v4965_v32  ;;  %v4788_v62 = vld [vmem:[#allocation2 + $0x8] sm:$0xf]  ;;  %v6896_v63 = vld [vmem:[#allocation2 + $0x1c] sm:$0xf0]  ;;  %v6900_v32 = vld [vmem:[#allocation2 + $0x44] sm:$0xf] }
  0x5a   :  { %603 = vmatpush.bf16.msrb.mxu1 %v4969_v33  ;;  %v4789_v1 = vor.u32 %v6896_v63, %v4788_v62  ;;  %v4822_v33 = vld [vmem:[#allocation2 + $0x58] sm:$0xf0]  ;;  %v6985_v63 = vld [vmem:[#allocation4 + $0x164] sm:$0xf0] }
  0x5b   :  { %579 = vmatpush.bf16.msra.mxu3 %v4913_v0  ;;  %v6893_v0 = vld [vmem:[#allocation2 + $0xc] sm:$0xf]  ;;  %v4825_v36 = vor.u32 %v6900_v32, %v4822_v33  ;;  %v7123_v32 = vld [vmem:[#allocation4 + $0x5b4] sm:$0xf0] }
  0x5c   :  { %v4793_v6 = vor.u32 %v6893_v0, %v4790_v3  ;;  %571 = vmatpush.bf16.msra.mxu2 %v4789_v1  ;;  %v5332_v0 = vld [vmem:[#allocation4 + $0x2d0] sm:$0xf] }
  0x5d   :  { %591 = vmatpush.bf16.msrb.mxu0 %v4941_v42  ;;  %v5333_v8 = vor.u32 %v7033_v4, %v5332_v0  ;;  %v5620_v0 = vld [vmem:[#allocation4 + $0x510] sm:$0xf] }
  0x5e   :  { %203 = vrot.lane.b32.xlu1 %v7793_v2, %s7716_s27  ;;  %604 = vmatpush.bf16.msrb.mxu1 %v4945_v47  ;;  %v4801_v47 = vor.u32 %v6894_v40, %v4798_v44  ;;  %v5068_v40 = vld [vmem:[#allocation4 + $0xc0] sm:$0xf]  ;;  %v7015_v44 = vld [vmem:[#allocation4 + $0x254] sm:$0xf0] }
  0x5f   :  { %580 = vmatpush.bf16.msra.mxu3 %v4889_v15  ;;  %v6915_v15 = vld [vmem:[#allocation2 + $0xb4] sm:$0xf0] }
  0x60   :  { %217 = vrot.lane.b32.xlu2 %v7793_v2, %s7717_s5  ;;  %v4869_v17 = vor.u32 %v6915_v15, %v4868_v13  ;;  %v5716_v13 = vld [vmem:[#allocation4 + $0x5d0] sm:$0xf]  ;;  %v7129_v15 = vld [vmem:[#allocation4 + $0x5e4] sm:$0xf0] }
  0x61   :  { %592 = vmatpush.bf16.msrb.mxu0 %v4917_v56 }
  0x62   :  { %605 = vmatpush.bf16.msrb.mxu1 %v4921_v58 }
  0x63   :  { %581 = vmatpush.bf16.msra.mxu3 %v4865_v27  ;;  %v4846_v27 = vld [vmem:[#allocation2 + $0x88] sm:$0xf0] }
  0x64   :  { %v4849_v28 = vor.u32 %v6906_v22, %v4846_v27  ;;  %v7075_v27 = vld [vmem:[#allocation4 + $0x434] sm:$0xf0] }
  0x65   :  { %593 = vmatpush.bf16.msrb.mxu0 %v4893_v7 }
  0x66   :  { %245 = vrot.lane.b32.xlu1 %v7793_v2, %s7718_s28  ;;  %606 = vmatpush.bf16.msrb.mxu1 %v4897_v10  ;;  %v7027_v10 = vld [vmem:[#allocation4 + $0x2b4] sm:$0xf0] }
  0x67   :  { %582 = vmatpush.bf16.msra.mxu3 %v4841_v41 }
  0x69   :  { %594 = vmatpush.bf16.msrb.mxu0 %v4869_v17 }
  0x6a   :  { %607 = vmatpush.bf16.msrb.mxu1 %v4873_v19  ;;  %v5717_v19 = vor.u32 %v7129_v15, %v5716_v13  ;;  %v5404_v13 = vld [vmem:[#allocation4 + $0x360] sm:$0xf]  ;;  %v7051_v15 = vld [vmem:[#allocation4 + $0x374] sm:$0xf0] }
  0x6b   :  { %583 = vmatpush.bf16.msra.mxu3 %v4817_v52 }
  0x6d   :  { %595 = vmatpush.bf16.msrb.mxu0 %v4845_v26  ;;  %v5500_v26 = vld [vmem:[#allocation4 + $0x420] sm:$0xf] }
  0x6e   :  { %608 = vmatpush.bf16.msrb.mxu1 %v4849_v28  ;;  %v7021_v28 = vld [vmem:[#allocation4 + $0x284] sm:$0xf0]  ;;  %v5501_v29 = vor.u32 %v7075_v27, %v5500_v26  ;;  %v5405_v26 = vor.u32 %v7051_v15, %v5404_v13  ;;  %v6970_v13 = vld [vmem:[#allocation4 + $0xf4] sm:$0xf]  ;;  %v5094_v15 = vld [vmem:[#allocation4 + $0x108] sm:$0xf0] }
  0x6f   :  { %584 = vmatpush.bf16.msra.mxu3 %v4793_v6  ;;  %v6979_v6 = vld [vmem:[#allocation4 + $0x134] sm:$0xf0] }
  0x71   :  { %596 = vmatpush.bf16.msrb.mxu0 %v4821_v35  ;;  %v5476_v35 = vld [vmem:[#allocation4 + $0x3f0] sm:$0xf] }
  0x72   :  { %609 = vmatpush.bf16.msrb.mxu1 %v4825_v36  ;;  %v7069_v36 = vld [vmem:[#allocation4 + $0x404] sm:$0xf0] }
  0x73   :  { %2390 = vmatpush.bf16.msrb.mxu3 %v5333_v8  ;;  %v6955_v8 = vld [vmem:[#allocation4 + $0x74] sm:$0xf0] }
  0x75   :  { %597 = vmatpush.bf16.msrb.mxu0 %v4797_v43  ;;  %v5260_v43 = vld [vmem:[#allocation4 + $0x240] sm:$0xf] }
  0x76   :  { %610 = vmatpush.bf16.msrb.mxu1 %v4801_v47 }
  0x7c   :  { %v7813_v59 = vpop.permute.xlu2 %166 }
  0x7d   :  { %vm168_vm2 = vcmp.eq.s32.totalorder %v138_v23, %v7813_v59 }
  0x85   :  { %v7817_v31 = vpop.permute.xlu2 %170 }
  0x86   :  { %v173_v49 = vsel %vm168_vm2, %v7817_v31, 0.0 }
  0x8f   :  { %v7821_v61 = vpop.permute.xlu2 %184 }
  0x93   :  { %v7815_v14 = vpop.permute.xlu1 %145 }
  0x94   :  { %v141_v60 = vpop.permute.xlu0 %140 }
  0x95   :  { %vm142_vm1 = vcmp.eq.s32.totalorder %v138_v23, %v141_v60 }
  0x96   :  { %v148_v41 = vsel %vm142_vm1, %v7815_v14, 0.0 }
  0x98   :  { %v209_v25 = vpop.permute.xlu2 %208 }
  0x99   :  { %vm210_vm5 = vcmp.eq.s32.totalorder %v138_v23, %v209_v25  ;;  %v5284_v25 = vld [vmem:[#allocation4 + $0x270] sm:$0xf] }
  0x9a   :  { %v5285_v39 = vor.u32 %v7021_v28, %v5284_v25  ;;  %v6997_v25 = vld [vmem:[#allocation4 + $0x1c4] sm:$0xf0]  ;;  %v5380_v28 = vld [vmem:[#allocation4 + $0x330] sm:$0xf] }
  0x9c   :  { %v7819_v46 = vpop.permute.xlu1 %156 }
  0x9d   :  { %v153_v24 = vpop.permute.xlu0 %152 }
  0x9e   :  { %vm154_vm0 = vcmp.eq.s32.totalorder %v138_v23, %v153_v24  ;;  %v5309_v24 = vor.u32 %v7027_v10, %v5308_v9  ;;  %v5212_v9 = vld [vmem:[#allocation4 + $0x1e0] sm:$0xf]  ;;  %v7003_v10 = vld [vmem:[#allocation4 + $0x1f4] sm:$0xf0] }
  0x9f   :  { %v159_v37 = vsel %vm154_vm0, %v7819_v46, 0.0 }
  0xa0   :  { %v160_v45 = vadd.f32 %v159_v37, %v148_v41  ;;  %v5668_v37 = vld [vmem:[#allocation4 + $0x570] sm:$0xf]  ;;  %2391 = vmatpush.bf16.msrb.mxu3 %v5309_v24  ;;  %v6967_v41 = vld [vmem:[#allocation4 + $0xd4] sm:$0xf0] }
  0xa1   :  { %v223_v48 = vpop.permute.xlu2 %222  ;;  %v5188_v24 = vld [vmem:[#allocation4 + $0x1b0] sm:$0xf] }
  0xa2   :  { %v174_v50 = vadd.f32 %v173_v49, %v160_v45  ;;  %vm224_vm6 = vcmp.eq.s32.totalorder %v138_v23, %v223_v48  ;;  %v5477_v45 = vor.u32 %v7069_v36, %v5476_v35  ;;  %v5452_v48 = vld [vmem:[#allocation4 + $0x3c0] sm:$0xf]  ;;  %v7063_v49 = vld [vmem:[#allocation4 + $0x3d4] sm:$0xf0]  ;;  %v5189_v35 = vor.u32 %v6997_v25, %v5188_v24 }
  0xa3   :  { %v6943_v36 = vld [vmem:[#allocation4 + $0x14] sm:$0xf0]  ;;  %v5097_v24 = vor.u32 %v6970_v13, %v5094_v15  ;;  %v6988_v15 = vld [vmem:[#allocation4 + $0x184] sm:$0xf] }
  0xa4   :  { %2392 = vmatpush.bf16.msrb.mxu3 %v5285_v39  ;;  %v7177_v39 = vld [vmem:[#allocation4 + $0x764] sm:$0xf0] }
  0xa5   :  { %v181_v11 = vpop.permute.xlu1 %180 }
  0xa6   :  { %v195_v42 = vpop.permute.xlu0 %194  ;;  %vm182_vm3 = vcmp.eq.s32.totalorder %v138_v23, %v181_v11  ;;  %v5524_v11 = vld [vmem:[#allocation4 + $0x450] sm:$0xf] }
  0xa7   :  { %vm196_vm4 = vcmp.eq.s32.totalorder %v138_v23, %v195_v42  ;;  %v187_v46 = vsel %vm182_vm3, %v7821_v61, 0.0  ;;  %v5140_v61 = vld [vmem:[#allocation4 + $0x150] sm:$0xf]  ;;  %v5525_v18 = vor.u32 %v7081_v12, %v5524_v11  ;;  %v7117_v42 = vld [vmem:[#allocation4 + $0x584] sm:$0xf0] }
  0xa8   :  { %v188_v52 = vadd.f32 %v187_v46, %v174_v50  ;;  %v5141_v3 = vor.u32 %v6985_v63, %v5140_v61  ;;  %v5669_v47 = vor.u32 %v7117_v42, %v5668_v37  ;;  %v5644_v46 = vld [vmem:[#allocation4 + $0x540] sm:$0xf]  ;;  %v7111_v50 = vld [vmem:[#allocation4 + $0x554] sm:$0xf0]  ;;  %v7057_v63 = vld [vmem:[#allocation4 + $0x3a4] sm:$0xf0] }
  0xa9   :  { %v5164_v37 = vld [vmem:[#allocation4 + $0x180] sm:$0xf] }
  0xaa   :  { %v241_v57 = vpop.permute.xlu2 %240  ;;  %2377 = vmatpush.bf16.msrb.mxu2 %v5141_v3  ;;  %v7105_v3 = vld [vmem:[#allocation4 + $0x524] sm:$0xf0] }
  0xab   :  { %v5621_v12 = vor.u32 %v7105_v3, %v5620_v0  ;;  %v5118_v0 = vld [vmem:[#allocation4 + $0x138] sm:$0xf0]  ;;  %v7024_v3 = vld [vmem:[#allocation4 + $0x2a4] sm:$0xf] }
  0xae   :  { %v199_v34 = vpop.permute.xlu1 %198 }
  0xaf   :  { %v201_v51 = vsel %vm196_vm4, %v199_v34, 0.0  ;;  %v227_v59 = vpop.permute.xlu0 %226  ;;  %v5693_v34 = vor.u32 %v7123_v32, %v5692_v30  ;;  %v5572_v30 = vld [vmem:[#allocation4 + $0x4b0] sm:$0xf]  ;;  %v7093_v32 = vld [vmem:[#allocation4 + $0x4c4] sm:$0xf0] }
  0xb0   :  { %v202_v54 = vadd.f32 %v201_v51, %v188_v52  ;;  %v229_v56 = vsel %vm224_vm6, %v227_v59, 0.0  ;;  %v5044_v59 = vld [vmem:[#allocation4 + $0x90] sm:$0xf]  ;;  %v5573_v42 = vor.u32 %v7093_v32, %v5572_v30 }
  0xb1   :  { %v5812_v32 = vld [vmem:[#allocation4 + $0x690] sm:$0xf] }
  0xb2   :  { %v176_v7 = vpop.permute.xlu2 %175 }
  0xb7   :  { %v213_v14 = vpop.permute.xlu1 %212  ;;  %v190_v17 = vpop.permute.xlu0 %189 }
  0xb8   :  { %v215_v53 = vsel %vm210_vm5, %v213_v14, 0.0 }
  0xb9   :  { %v216_v55 = vadd.f32 %v215_v53, %v202_v54  ;;  %v5069_v53 = vor.u32 %v6967_v41, %v5068_v40  ;;  %v5261_v54 = vor.u32 %v7015_v44, %v5260_v43  ;;  %v6100_v40 = vld [vmem:[#allocation4 + $0x8d0] sm:$0xf]  ;;  %v7225_v43 = vld [vmem:[#allocation4 + $0x8e4] sm:$0xf0]  ;;  %v5356_v44 = vld [vmem:[#allocation4 + $0x300] sm:$0xf] }
  0xba   :  { %v218_v51 = vpop.permute.xlu2 %217 }
  0xbb   :  { %v230_v60 = vadd.f32 %v229_v56, %v216_v55  ;;  %v6961_v55 = vld [vmem:[#allocation4 + $0xa4] sm:$0xf0]  ;;  %2393 = vmatpush.bf16.msrb.mxu3 %v5261_v54  ;;  %v6101_v54 = vor.u32 %v7225_v43, %v6100_v40  ;;  %v7147_v40 = vld [vmem:[#allocation4 + $0x674] sm:$0xf0] }
  0xbf   :  { %v232_v56 = vpop.permute.xlu0 %231 }
  0xc0   :  { %v237_v58 = vpop.permute.xlu1 %236 }
  0xc1   :  { %vm238_vm7 = vcmp.eq.s32.totalorder %v138_v23, %v237_v58  ;;  %v5117_v23 = vor.u32 %v6979_v6, %v5116_v5  ;;  %v7009_v58 = vld [vmem:[#allocation4 + $0x224] sm:$0xf0]  ;;  %v5045_v5 = vor.u32 %v6961_v55, %v5044_v59  ;;  %v5884_v59 = vld [vmem:[#allocation4 + $0x720] sm:$0xf] }
  0xc2   :  { %v243_v31 = vsel %vm238_vm7, %v241_v57, 0.0  ;;  %v5236_v57 = vld [vmem:[#allocation4 + $0x210] sm:$0xf] }
  0xc3   :  { %v244_v62 = vadd.f32 %v243_v31, %v230_v60  ;;  %2378 = vmatpush.bf16.msrb.mxu2 %v5117_v23  ;;  %v5453_v60 = vor.u32 %v7063_v49, %v5452_v48  ;;  %v5645_v31 = vor.u32 %v7111_v50, %v5644_v46  ;;  %v5237_v6 = vor.u32 %v7009_v58, %v5236_v57  ;;  %v6949_v23 = vld [vmem:[#allocation4 + $0x44] sm:$0xf0]  ;;  %v7087_v48 = vld [vmem:[#allocation4 + $0x494] sm:$0xf0]  ;;  %v6982_v49 = vld [vmem:[#allocation4 + $0x154] sm:$0xf] }
  0xc4   :  { %v6076_v57 = vld [vmem:[#allocation4 + $0x8a0] sm:$0xf]  ;;  %v7219_v58 = vld [vmem:[#allocation4 + $0x8b4] sm:$0xf0] }
  0xc5   :  { %v7828_v1 = vpack.c.bf16 %v244_v62, %v244_v62  ;;  %v5428_v62 = vld [vmem:[#allocation4 + $0x390] sm:$0xf]  ;;  %2394 = vmatpush.bf16.msrb.mxu3 %v5237_v6  ;;  %v6077_v6 = vor.u32 %v7219_v58, %v6076_v57  ;;  %v7000_v57 = vld [vmem:[#allocation4 + $0x1e4] sm:$0xf] }
  0xc6   :  { %v5429_v11 = vor.u32 %v7057_v63, %v5428_v62  ;;  %v6976_v63 = vld [vmem:[#allocation4 + $0x124] sm:$0xf] }
  0xc7   :  { %546 = vmatmul.bf16.vlgmr.msra.gmra.mxu0 %v7828_v1  ;;  %559 = vmatmul.bf16.vlgmr.msra.gmra.mxu1 %v7828_v1 }
  0xc8   :  { %572 = vmatmul.bf16.vlgmr.msra.gmra.mxu2 %v7828_v1  ;;  %585 = vmatmul.bf16.vlgmr.msra.gmra.mxu3 %v7828_v1  ;;  %v162_v16 = vpop.permute.xlu1 %161 }
  0xc9   :  { %v164_v22 = vadd.f32 %v162_v16, %v7793_v2  ;;  %2403 = vmatpush.bf16.msra.mxu0 %v5525_v18  ;;  %2416 = vmatpush.bf16.msra.mxu1 %v5717_v19  ;;  %v5093_v2 = vor.u32 %v6973_v21, %v5092_v20  ;;  %v5596_v16 = vld [vmem:[#allocation4 + $0x4e0] sm:$0xf]  ;;  %v5213_v21 = vor.u32 %v7003_v10, %v5212_v9  ;;  %v6052_v9 = vld [vmem:[#allocation4 + $0x870] sm:$0xf]  ;;  %v7213_v10 = vld [vmem:[#allocation4 + $0x884] sm:$0xf0] }
  0xcb   :  { %v178_v33 = vadd.f32 %v176_v7, %v164_v22  ;;  %2379 = vmatpush.bf16.msrb.mxu2 %v5093_v2  ;;  %v5020_v7 = vld [vmem:[#allocation4 + $0x60] sm:$0xf]  ;;  %v4996_v22 = vld [vmem:[#allocation4 + $0x30] sm:$0xf]  ;;  %2395 = vmatpush.bf16.msrb.mxu3 %v5213_v21  ;;  %v7159_v21 = vld [vmem:[#allocation4 + $0x6d4] sm:$0xf0] }
  0xcc   :  { %v5021_v20 = vor.u32 %v6955_v8, %v5020_v7  ;;  %v5908_v2 = vld [vmem:[#allocation4 + $0x750] sm:$0xf]  ;;  %v7165_v8 = vld [vmem:[#allocation4 + $0x704] sm:$0xf0] }
  0xcd   :  { %v192_v38 = vadd.f32 %v190_v17, %v178_v33  ;;  %2404 = vmatpush.bf16.msra.mxu0 %v5501_v29  ;;  %2417 = vmatpush.bf16.msra.mxu1 %v5693_v34  ;;  %v7099_v17 = vld [vmem:[#allocation4 + $0x4f4] sm:$0xf0]  ;;  %v7045_v29 = vld [vmem:[#allocation4 + $0x344] sm:$0xf0]  ;;  %v4972_v33 = vld [vmem:[#allocation4] sm:$0xf]  ;;  %v4997_v34 = vor.u32 %v6949_v23, %v4996_v22 }
  0xce   :  { %v5597_v27 = vor.u32 %v7099_v17, %v5596_v16  ;;  %v5381_v41 = vor.u32 %v7045_v29, %v5380_v28  ;;  %v4973_v46 = vor.u32 %v6943_v36, %v4972_v33  ;;  %v5860_v7 = vld [vmem:[#allocation4 + $0x6f0] sm:$0xf]  ;;  %v7018_v16 = vld [vmem:[#allocation4 + $0x274] sm:$0xf]  ;;  %v5286_v17 = vld [vmem:[#allocation4 + $0x288] sm:$0xf0] }
  0xcf   :  { %2380 = vmatpush.bf16.msrb.mxu2 %v5069_v53  ;;  %2396 = vmatpush.bf16.msrb.mxu3 %v5189_v35  ;;  %v5909_v53 = vor.u32 %v7177_v39, %v5908_v2  ;;  %v6028_v22 = vld [vmem:[#allocation4 + $0x840] sm:$0xf]  ;;  %v7207_v23 = vld [vmem:[#allocation4 + $0x854] sm:$0xf0]  ;;  %v5289_v25 = vor.u32 %v7018_v16, %v5286_v17  ;;  %v7012_v28 = vld [vmem:[#allocation4 + $0x244] sm:$0xf] }
  0xd0   :  { %v204_v14 = vpop.permute.xlu1 %203  ;;  %v5262_v29 = vld [vmem:[#allocation4 + $0x258] sm:$0xf0]  ;;  %v6029_v30 = vor.u32 %v7207_v23, %v6028_v22  ;;  %v7153_v33 = vld [vmem:[#allocation4 + $0x6a4] sm:$0xf0]  ;;  %v5788_v39 = vld [vmem:[#allocation4 + $0x660] sm:$0xf] }
  0xd1   :  { %v206_v52 = vadd.f32 %v204_v14, %v192_v38  ;;  %2405 = vmatpush.bf16.msra.mxu0 %v5477_v45  ;;  %2418 = vmatpush.bf16.msra.mxu1 %v5669_v47  ;;  %v6991_v38 = vld [vmem:[#allocation4 + $0x194] sm:$0xf0]  ;;  %v5548_v47 = vld [vmem:[#allocation4 + $0x480] sm:$0xf]  ;;  %v5142_v14 = vld [vmem:[#allocation4 + $0x168] sm:$0xf0]  ;;  %v5789_v43 = vor.u32 %v7147_v40, %v5788_v39 }
  0xd2   :  { %v7039_v45 = vld [vmem:[#allocation4 + $0x314] sm:$0xf0]  ;;  %v5165_v50 = vor.u32 %v6991_v38, %v5164_v37  ;;  %v5145_v62 = vor.u32 %v6982_v49, %v5142_v14  ;;  %v7201_v35 = vld [vmem:[#allocation4 + $0x824] sm:$0xf0]  ;;  %v5265_v37 = vor.u32 %v7012_v28, %v5262_v29  ;;  %v5813_v38 = vor.u32 %v7153_v33, %v5812_v32  ;;  %v5764_v14 = vld [vmem:[#allocation4 + $0x630] sm:$0xf] }
  0xd3   :  { %v220_v61 = vadd.f32 %v218_v51, %v206_v52  ;;  %2381 = vmatpush.bf16.msrb.mxu2 %v5045_v5  ;;  %v7030_v51 = vld [vmem:[#allocation4 + $0x2d4] sm:$0xf]  ;;  %v5334_v52 = vld [vmem:[#allocation4 + $0x2e8] sm:$0xf0]  ;;  %v5166_v16 = vld [vmem:[#allocation4 + $0x198] sm:$0xf0] }
  0xd4   :  { %2397 = vmatpush.bf16.msrb.mxu3 %v5165_v50  ;;  %v5169_v17 = vor.u32 %v6988_v15, %v5166_v16  ;;  %v5718_v22 = vld [vmem:[#allocation4 + $0x5e8] sm:$0xf0]  ;;  %v7072_v29 = vld [vmem:[#allocation4 + $0x424] sm:$0xf]  ;;  %v5502_v32 = vld [vmem:[#allocation4 + $0x438] sm:$0xf0] }
  0xd5   :  { %v234_v4 = vadd.f32 %v232_v56, %v220_v61  ;;  %2406 = vmatpush.bf16.msra.mxu0 %v5453_v60  ;;  %2419 = vmatpush.bf16.msra.mxu1 %v5645_v31  ;;  %v7171_v56 = vld [vmem:[#allocation4 + $0x734] sm:$0xf0]  ;;  %v5357_v60 = vor.u32 %v7039_v45, %v5356_v44  ;;  %v5549_v31 = vor.u32 %v7087_v48, %v5548_v47  ;;  %v6958_v45 = vld [vmem:[#allocation4 + $0x94] sm:$0xf]  ;;  %v5046_v47 = vld [vmem:[#allocation4 + $0xa8] sm:$0xf0] }
  0xd6   :  { %v5337_v61 = vor.u32 %v7030_v51, %v5334_v52  ;;  %v5885_v5 = vor.u32 %v7171_v56, %v5884_v59  ;;  %v7006_v48 = vld [vmem:[#allocation4 + $0x214] sm:$0xf]  ;;  %v5049_v49 = vor.u32 %v6958_v45, %v5046_v47  ;;  %v7141_v51 = vld [vmem:[#allocation4 + $0x644] sm:$0xf0]  ;;  %v5956_v52 = vld [vmem:[#allocation4 + $0x7b0] sm:$0xf] }
  0xd7   :  { %598 = vmatmul.bf16.vlgmr.msrb.gmra.mxu0 %v7828_v1  ;;  %611 = vmatmul.bf16.vlgmr.msrb.gmra.mxu1 %v7828_v1  ;;  %v5022_v56 = vld [vmem:[#allocation4 + $0x78] sm:$0xf0]  ;;  %v7120_v33 = vld [vmem:[#allocation4 + $0x5a4] sm:$0xf]  ;;  %v6102_v39 = vld [vmem:[#allocation4 + $0x8e8] sm:$0xf0] }
  0xd8   :  { %v246_v18 = vpop.permute.xlu1 %245  ;;  %2382 = vmatpush.bf16.msrb.mxu2 %v5021_v20  ;;  %2442 = vmatpush.bf16.msra.mxu3 %v6101_v54  ;;  %v5836_v20 = vld [vmem:[#allocation4 + $0x6c0] sm:$0xf]  ;;  %v7189_v54 = vld [vmem:[#allocation4 + $0x7c4] sm:$0xf0]  ;;  %v7066_v40 = vld [vmem:[#allocation4 + $0x3f4] sm:$0xf] }
  0xd9   :  { %v248_v19 = vadd.f32 %v246_v18, %v234_v4  ;;  %2407 = vmatpush.bf16.msra.mxu0 %v5429_v11  ;;  %2420 = vmatpush.bf16.msra.mxu1 %v5621_v12  ;;  %v5310_v4 = vld [vmem:[#allocation4 + $0x2b8] sm:$0xf0]  ;;  %v5121_v11 = vor.u32 %v6976_v63, %v5118_v0  ;;  %v5861_v18 = vor.u32 %v7165_v8, %v5860_v7  ;;  %v5932_v63 = vld [vmem:[#allocation4 + $0x780] sm:$0xf]  ;;  %v6994_v7 = vld [vmem:[#allocation4 + $0x1b4] sm:$0xf] }
  0xda   :  { %v5313_v12 = vor.u32 %v7024_v3, %v5310_v4  ;;  %v5957_v59 = vor.u32 %v7189_v54, %v5956_v52  ;;  %v7183_v3 = vld [vmem:[#allocation4 + $0x794] sm:$0xf0]  ;;  %v5190_v8 = vld [vmem:[#allocation4 + $0x1c8] sm:$0xf0]  ;;  %v7168_v52 = vld [vmem:[#allocation4 + $0x724] sm:$0xf] }
  0xdb   :  { %v616_v1 = vmax.f32 %v248_v19, 1.0  ;;  %v6053_v19 = vor.u32 %v7213_v10, %v6052_v9  ;;  %v5933_v4 = vor.u32 %v7183_v3, %v5932_v63  ;;  %v5193_v10 = vor.u32 %v6994_v7, %v5190_v8  ;;  %v5670_v45 = vld [vmem:[#allocation4 + $0x588] sm:$0xf0]  ;;  %v7102_v16 = vld [vmem:[#allocation4 + $0x514] sm:$0xf] }
  0xdc   :  { %2383 = vmatpush.bf16.msrb.mxu2 %v4997_v34  ;;  %2443 = vmatpush.bf16.msra.mxu3 %v6077_v6  ;;  %v6004_v34 = vld [vmem:[#allocation4 + $0x810] sm:$0xf]  ;;  %v4998_v6 = vld [vmem:[#allocation4 + $0x48] sm:$0xf0] }
  0xdd   :  { %7465 = vrcp.f32 %v616_v1  ;;  %2408 = vmatpush.bf16.msra.mxu0 %v5405_v26  ;;  %2421 = vmatpush.bf16.msra.mxu1 %v5597_v27  ;;  %v6964_v26 = vld [vmem:[#allocation4 + $0xc4] sm:$0xf]  ;;  %v5070_v27 = vld [vmem:[#allocation4 + $0xd8] sm:$0xf0]  ;;  %v5837_v1 = vor.u32 %v7159_v21, %v5836_v20  ;;  %v6005_v2 = vor.u32 %v7201_v35, %v6004_v34  ;;  %v5526_v20 = vld [vmem:[#allocation4 + $0x468] sm:$0xf0] }
  0xde   :  { %v5073_v36 = vor.u32 %v6964_v26, %v5070_v27  ;;  %v7126_v21 = vld [vmem:[#allocation4 + $0x5d4] sm:$0xf]  ;;  %v5694_v34 = vld [vmem:[#allocation4 + $0x5b8] sm:$0xf0]  ;;  %v5862_v3 = vld [vmem:[#allocation4 + $0x708] sm:$0xf0] }
  0xdf   :  { %v5721_v28 = vor.u32 %v7126_v21, %v5718_v22  ;;  %v7174_v35 = vld [vmem:[#allocation4 + $0x754] sm:$0xf]  ;;  %v6054_v7 = vld [vmem:[#allocation4 + $0x888] sm:$0xf0]  ;;  %v7156_v22 = vld [vmem:[#allocation4 + $0x6c4] sm:$0xf] }
  0xe0   :  { %2384 = vmatpush.bf16.msrb.mxu2 %v4973_v46  ;;  %2444 = vmatpush.bf16.msra.mxu3 %v6053_v19  ;;  %v5238_v46 = vld [vmem:[#allocation4 + $0x228] sm:$0xf0] }
  0xe1   :  { %2409 = vmatpush.bf16.msra.mxu0 %v5381_v41  ;;  %2422 = vmatpush.bf16.msra.mxu1 %v5573_v42  ;;  %v5980_v41 = vld [vmem:[#allocation4 + $0x7e0] sm:$0xf]  ;;  %v7195_v42 = vld [vmem:[#allocation4 + $0x7f4] sm:$0xf0]  ;;  %v5241_v50 = vor.u32 %v7006_v48, %v5238_v46  ;;  %v5430_v15 = vld [vmem:[#allocation4 + $0x3a8] sm:$0xf0] }
  0xe2   :  { %v5981_v44 = vor.u32 %v7195_v42, %v5980_v41  ;;  %v5478_v41 = vld [vmem:[#allocation4 + $0x408] sm:$0xf0] }
  0xe3   :  { %v7466_v55 = vpop.eup %7465 }
  0xe4   :  { %620 = vperm.xlu2 %7463, %v7466_v55   ;;  %2429 = vmatpush.bf16.msra.mxu2 %v5909_v53  ;;  %v5765_v53 = vor.u32 %v7141_v51, %v5764_v14  ;;  %v6952_v55 = vld [vmem:[#allocation4 + $0x64] sm:$0xf]  ;;  %v5481_v51 = vor.u32 %v7066_v40, %v5478_v41 }
  0xe5   :  { %2410 = vmatpush.bf16.msra.mxu0 %v5357_v60  ;;  %2423 = vmatpush.bf16.msra.mxu1 %v5549_v31  ;;  %v5025_v58 = vor.u32 %v6952_v55, %v5022_v56  ;;  %v5214_v60 = vld [vmem:[#allocation4 + $0x1f8] sm:$0xf0]  ;;  %v7216_v56 = vld [vmem:[#allocation4 + $0x8a4] sm:$0xf] }
  0xe6   :  { %2445 = vmatpush.bf16.msra.mxu3 %v6029_v30  ;;  %v5217_v31 = vor.u32 %v7000_v57, %v5214_v60  ;;  %v6078_v57 = vld [vmem:[#allocation4 + $0x8b8] sm:$0xf0] }
  0xe7   :  { %v5454_v60 = vld [vmem:[#allocation4 + $0x3d8] sm:$0xf0]  ;;  %v6081_v63 = vor.u32 %v7216_v56, %v6078_v57  ;;  %v7036_v56 = vld [vmem:[#allocation4 + $0x304] sm:$0xf] }
  0xe8   :  { %2430 = vmatpush.bf16.msra.mxu2 %v5885_v5  ;;  %v6946_v5 = vld [vmem:[#allocation4 + $0x34] sm:$0xf]  ;;  %v5358_v57 = vld [vmem:[#allocation4 + $0x318] sm:$0xf0] }
  0xe9   :  { %2455 = vmatpush.bf16.msrb.mxu0 %v5145_v62  ;;  %2468 = vmatpush.bf16.msrb.mxu1 %v5337_v61  ;;  %v5740_v62 = vld [vmem:[#allocation4 + $0x600] sm:$0xf]  ;;  %v7135_v61 = vld [vmem:[#allocation4 + $0x614] sm:$0xf0]  ;;  %v5001_v9 = vor.u32 %v6946_v5, %v4998_v6  ;;  %v7210_v6 = vld [vmem:[#allocation4 + $0x874] sm:$0xf] }
  0xea   :  { %2446 = vmatpush.bf16.msra.mxu3 %v6005_v2  ;;  %v5741_v0 = vor.u32 %v7135_v61, %v5740_v62  ;;  %v5697_v2 = vor.u32 %v7120_v33, %v5694_v34  ;;  %v5646_v62 = vld [vmem:[#allocation4 + $0x558] sm:$0xf0]  ;;  %v6057_v21 = vor.u32 %v7210_v6, %v6054_v7  ;;  %v7096_v34 = vld [vmem:[#allocation4 + $0x4e4] sm:$0xf]  ;;  %v7186_v6 = vld [vmem:[#allocation4 + $0x7b4] sm:$0xf] }
  0xeb   :  { %v5406_v33 = vld [vmem:[#allocation4 + $0x378] sm:$0xf0]  ;;  %v5958_v7 = vld [vmem:[#allocation4 + $0x7c8] sm:$0xf0] }
  0xec   :  { %2431 = vmatpush.bf16.msra.mxu2 %v5861_v18  ;;  %v7078_v18 = vld [vmem:[#allocation4 + $0x454] sm:$0xf] }
  0xed   :  { %2456 = vmatpush.bf16.msrb.mxu0 %v5121_v11  ;;  %2469 = vmatpush.bf16.msrb.mxu1 %v5313_v12  ;;  %v6940_v11 = vld [vmem:[#allocation4 + $0x4] sm:$0xf]  ;;  %v4974_v12 = vld [vmem:[#allocation4 + $0x18] sm:$0xf0]  ;;  %v5529_v27 = vor.u32 %v7078_v18, %v5526_v20 }
  0xee   :  { %2447 = vmatpush.bf16.msra.mxu3 %v5981_v44  ;;  %v4977_v13 = vor.u32 %v6940_v11, %v4974_v12  ;;  %v7114_v44 = vld [vmem:[#allocation4 + $0x574] sm:$0xf] }
  0xef   :  { %v5673_v55 = vor.u32 %v7114_v44, %v5670_v45  ;;  %v5382_v45 = vld [vmem:[#allocation4 + $0x348] sm:$0xf0] }
  0xf0   :  { %2432 = vmatpush.bf16.msra.mxu2 %v5837_v1 }
  0xf1   :  { %2457 = vmatpush.bf16.msrb.mxu0 %v5097_v24  ;;  %2470 = vmatpush.bf16.msrb.mxu1 %v5289_v25 }
  0xf2   :  { %2448 = vmatpush.bf16.msra.mxu3 %v5957_v59 }
  0xf4   :  { %2433 = vmatpush.bf16.msra.mxu2 %v5813_v38  ;;  %v5505_v38 = vor.u32 %v7072_v29, %v5502_v32  ;;  %v7048_v32 = vld [vmem:[#allocation4 + $0x364] sm:$0xf] }
  0xf5   :  { %2458 = vmatpush.bf16.msrb.mxu0 %v5073_v36  ;;  %2471 = vmatpush.bf16.msrb.mxu1 %v5265_v37  ;;  %v5910_v36 = vld [vmem:[#allocation4 + $0x768] sm:$0xf0]  ;;  %v7222_v37 = vld [vmem:[#allocation4 + $0x8d4] sm:$0xf]  ;;  %v5409_v40 = vor.u32 %v7048_v32, %v5406_v33 }
  0xf6   :  { %2449 = vmatpush.bf16.msra.mxu3 %v5933_v4  ;;  %v6105_v14 = vor.u32 %v7222_v37, %v6102_v39  ;;  %v7150_v37 = vld [vmem:[#allocation4 + $0x694] sm:$0xf]  ;;  %v6006_v39 = vld [vmem:[#allocation4 + $0x828] sm:$0xf0] }
  0xf8   :  { %2434 = vmatpush.bf16.msra.mxu2 %v5789_v43 }
  0xf9   :  { %2459 = vmatpush.bf16.msrb.mxu0 %v5049_v49  ;;  %2472 = vmatpush.bf16.msrb.mxu1 %v5241_v50  ;;  %v5913_v50 = vor.u32 %v7174_v35, %v5910_v36  ;;  %v5598_v35 = vld [vmem:[#allocation4 + $0x4f8] sm:$0xf0] }
  0xfa   :  { %v5601_v41 = vor.u32 %v7096_v34, %v5598_v35  ;;  %v5100_v34 = vld [vmem:[#allocation4 + $0xf8] sm:$0xf] }
  0xfc   :  { %2435 = vmatpush.bf16.msra.mxu2 %v5765_v53  ;;  %v5886_v53 = vld [vmem:[#allocation4 + $0x738] sm:$0xf0] }
  0xfd   :  { %2460 = vmatpush.bf16.msrb.mxu0 %v5025_v58  ;;  %2473 = vmatpush.bf16.msrb.mxu1 %v5217_v31  ;;  %v7060_v58 = vld [vmem:[#allocation4 + $0x3c4] sm:$0xf]  ;;  %v5889_v61 = vor.u32 %v7168_v52, %v5886_v53  ;;  %v5982_v52 = vld [vmem:[#allocation4 + $0x7f8] sm:$0xf0] }
  0xfe   :  { %v7108_v31 = vld [vmem:[#allocation4 + $0x544] sm:$0xf]  ;;  %v5457_v4 = vor.u32 %v7060_v58, %v5454_v60  ;;  %v5550_v60 = vld [vmem:[#allocation4 + $0x498] sm:$0xf0] }
  0xff   :  { %v5649_v5 = vor.u32 %v7108_v31, %v5646_v62  ;;  %v7084_v58 = vld [vmem:[#allocation4 + $0x484] sm:$0xf]  ;;  %v5148_v31 = vld [vmem:[#allocation4 + $0x158] sm:$0xf]  ;;  %v6986_v62 = vld [vmem:[#allocation4 + $0x16c] sm:$0xf0] }
 0x100   :  { %2436 = vmatpush.bf16.msra.mxu2 %v5741_v0  ;;  %v7162_v0 = vld [vmem:[#allocation4 + $0x6f4] sm:$0xf] }
 0x101   :  { %2461 = vmatpush.bf16.msrb.mxu0 %v5001_v9  ;;  %2474 = vmatpush.bf16.msrb.mxu1 %v5193_v10  ;;  %v7054_v10 = vld [vmem:[#allocation4 + $0x394] sm:$0xf] }
 0x105   :  { %2462 = vmatpush.bf16.msrb.mxu0 %v4977_v13  ;;  %2475 = vmatpush.bf16.msrb.mxu1 %v5169_v17  ;;  %v5865_v13 = vor.u32 %v7162_v0, %v5862_v3  ;;  %v5622_v17 = vld [vmem:[#allocation4 + $0x528] sm:$0xf0]  ;;  %v5340_v0 = vld [vmem:[#allocation4 + $0x2d8] sm:$0xf]  ;;  %v7034_v3 = vld [vmem:[#allocation4 + $0x2ec] sm:$0xf0] }
 0x106   :  { %v5625_v29 = vor.u32 %v7102_v16, %v5622_v17  ;;  %v5961_v17 = vor.u32 %v7186_v6, %v5958_v7 }
 0x13e   :  { %v7837_v19 = vpop.permute.xlu2 %620 }
 0x144   :  { %v547_v23 = vpop.f32.mrf.mxu0  ;;  %v560_v24 = vpop.f32.mrf.mxu1 }
 0x145   :  { %v623_v25 = vmul.f32 %v7837_v19, %v547_v23  ;;  %v624_v26 = vmul.f32 %v7837_v19, %v560_v24  ;;  %v5838_v23 = vld [vmem:[#allocation4 + $0x6d8] sm:$0xf0]  ;;  %v7204_v24 = vld [vmem:[#allocation4 + $0x844] sm:$0xf] }
 0x147   :  { %v7841_v1 = vpack.c.bf16 %v623_v25, %v623_v25  ;;  %v7843_v30 = vpack.c.bf16 %v624_v26, %v624_v26  ;;  %v6030_v25 = vld [vmem:[#allocation4 + $0x858] sm:$0xf0] }
 0x148   :  { %v6033_v36 = vor.u32 %v7204_v24, %v6030_v25  ;;  %v5532_v24 = vld [vmem:[#allocation4 + $0x458] sm:$0xf]  ;;  %v7082_v25 = vld [vmem:[#allocation4 + $0x46c] sm:$0xf0] }
 0x149   :  { %2385 = vmatmul.bf16.vlgmr.msrb.gmra.mxu2 %v7841_v1  ;;  %2398 = vmatmul.bf16.vlgmr.msrb.gmra.mxu3 %v7843_v30 }
 0x14a   :  { %2481 = vmatpush.bf16.msrb.mxu2 %v5529_v27  ;;  %2494 = vmatpush.bf16.msrb.mxu3 %v5721_v28  ;;  %v5433_v28 = vor.u32 %v7054_v10, %v5430_v15  ;;  %v5149_v10 = vor.u32 %v6986_v62, %v5148_v31  ;;  %v5316_v15 = vld [vmem:[#allocation4 + $0x2a8] sm:$0xf]  ;;  %v5244_v31 = vld [vmem:[#allocation4 + $0x218] sm:$0xf]  ;;  %v7010_v62 = vld [vmem:[#allocation4 + $0x22c] sm:$0xf0] }
 0x14b   :  { %v573_v42 = vpop.f32.mrf.mxu2  ;;  %v586_v43 = vpop.f32.mrf.mxu3  ;;  %v5245_v7 = vor.u32 %v7010_v62, %v5244_v31  ;;  %v5364_v31 = vld [vmem:[#allocation4 + $0x308] sm:$0xf]  ;;  %v7040_v62 = vld [vmem:[#allocation4 + $0x31c] sm:$0xf0] }
 0x14c   :  { %v625_v47 = vmul.f32 %v7837_v19, %v573_v42  ;;  %v626_v48 = vmul.f32 %v7837_v19, %v586_v43  ;;  %v549_v49 = vpop.f32.mrf.mxu0  ;;  %v562_v46 = vpop.f32.mrf.mxu1  ;;  %v7042_v42 = vld [vmem:[#allocation4 + $0x334] sm:$0xf] }
 0x14d   :  { %v5385_v53 = vor.u32 %v7042_v42, %v5382_v45  ;;  %v5700_v42 = vld [vmem:[#allocation4 + $0x5a8] sm:$0xf] }
 0x14e   :  { %v7849_v54 = vpack.c.bf16 %v625_v47, %v625_v47  ;;  %v7851_v59 = vpack.c.bf16 %v626_v48, %v626_v48  ;;  %2482 = vmatpush.bf16.msrb.mxu2 %v5505_v38  ;;  %2495 = vmatpush.bf16.msrb.mxu3 %v5697_v2  ;;  %v5814_v38 = vld [vmem:[#allocation4 + $0x6a8] sm:$0xf0]  ;;  %v7198_v2 = vld [vmem:[#allocation4 + $0x814] sm:$0xf] }
 0x14f   :  { %v7090_v47 = vld [vmem:[#allocation4 + $0x4b4] sm:$0xf]  ;;  %v5574_v48 = vld [vmem:[#allocation4 + $0x4c8] sm:$0xf0]  ;;  %v5817_v49 = vor.u32 %v7150_v37, %v5814_v38  ;;  %v6009_v46 = vor.u32 %v7198_v2, %v6006_v39  ;;  %v5292_v37 = vld [vmem:[#allocation4 + $0x278] sm:$0xf]  ;;  %v5533_v2 = vor.u32 %v7082_v25, %v5532_v24 }
 0x150   :  { %2411 = vmatmul.bf16.vlgmr.msra.gmra.mxu0 %v7849_v54  ;;  %2424 = vmatmul.bf16.vlgmr.msra.gmra.mxu1 %v7851_v59  ;;  %v7022_v38 = vld [vmem:[#allocation4 + $0x28c] sm:$0xf0]  ;;  %v5196_v24 = vld [vmem:[#allocation4 + $0x1b8] sm:$0xf] }
 0x151   :  { %2507 = vmatpush.bf16.msra.mxu0 %v5913_v50  ;;  %2520 = vmatpush.bf16.msra.mxu1 %v6105_v14  ;;  %v7144_v50 = vld [vmem:[#allocation4 + $0x664] sm:$0xf]  ;;  %v5790_v14 = vld [vmem:[#allocation4 + $0x678] sm:$0xf0]  ;;  %v5293_v45 = vor.u32 %v7022_v38, %v5292_v37  ;;  %v6998_v25 = vld [vmem:[#allocation4 + $0x1cc] sm:$0xf0] }
 0x152   :  { %2483 = vmatpush.bf16.msrb.mxu2 %v5481_v51  ;;  %2496 = vmatpush.bf16.msrb.mxu3 %v5673_v55  ;;  %v7192_v51 = vld [vmem:[#allocation4 + $0x7e4] sm:$0xf]  ;;  %v5577_v55 = vor.u32 %v7090_v47, %v5574_v48  ;;  %v5076_v47 = vld [vmem:[#allocation4 + $0xc8] sm:$0xf]  ;;  %v6968_v48 = vld [vmem:[#allocation4 + $0xdc] sm:$0xf0] }
 0x153   :  { %v575_v8 = vpop.f32.mrf.mxu2  ;;  %v588_v9 = vpop.f32.mrf.mxu3  ;;  %v4980_v37 = vld [vmem:[#allocation4 + $0x8] sm:$0xf]  ;;  %v6944_v38 = vld [vmem:[#allocation4 + $0x1c] sm:$0xf0] }
 0x154   :  { %v599_v11 = vpop.f32.mrf.mxu0  ;;  %v612_v12 = vpop.f32.mrf.mxu1  ;;  %v5361_v8 = vor.u32 %v7036_v56, %v5358_v57  ;;  %v5553_v9 = vor.u32 %v7084_v58, %v5550_v60  ;;  %v5077_v56 = vor.u32 %v6968_v48, %v5076_v47  ;;  %v5052_v58 = vld [vmem:[#allocation4 + $0x98] sm:$0xf]  ;;  %v6962_v60 = vld [vmem:[#allocation4 + $0xac] sm:$0xf0] }
 0x155   :  { %2508 = vmatpush.bf16.msra.mxu0 %v5889_v61  ;;  %2521 = vmatpush.bf16.msra.mxu1 %v6081_v63  ;;  %v627_v18 = vmul.f32 %v7837_v19, %v599_v11  ;;  %v628_v20 = vmul.f32 %v7837_v19, %v612_v12  ;;  %v5841_v19 = vor.u32 %v7156_v22, %v5838_v23  ;;  %v5124_v12 = vld [vmem:[#allocation4 + $0x128] sm:$0xf]  ;;  %v7180_v22 = vld [vmem:[#allocation4 + $0x784] sm:$0xf]  ;;  %v5934_v23 = vld [vmem:[#allocation4 + $0x798] sm:$0xf0] }
 0x156   :  { %2484 = vmatpush.bf16.msrb.mxu2 %v5457_v4  ;;  %2497 = vmatpush.bf16.msrb.mxu3 %v5649_v5  ;;  %v5793_v61 = vor.u32 %v7144_v50, %v5790_v14  ;;  %v5985_v63 = vor.u32 %v7192_v51, %v5982_v52  ;;  %v7138_v4 = vld [vmem:[#allocation4 + $0x634] sm:$0xf]  ;;  %v5766_v5 = vld [vmem:[#allocation4 + $0x648] sm:$0xf0]  ;;  %v5341_v11 = vor.u32 %v7034_v3, %v5340_v0  ;;  %v5484_v51 = vld [vmem:[#allocation4 + $0x3f8] sm:$0xf] }
 0x157   :  { %v7857_v26 = vpack.c.bf16 %v627_v18, %v627_v18  ;;  %v7859_v27 = vpack.c.bf16 %v628_v20, %v628_v20  ;;  %v5769_v16 = vor.u32 %v7138_v4, %v5766_v5  ;;  %v7028_v18 = vld [vmem:[#allocation4 + $0x2bc] sm:$0xf0]  ;;  %v7132_v20 = vld [vmem:[#allocation4 + $0x604] sm:$0xf]  ;;  %v7070_v52 = vld [vmem:[#allocation4 + $0x40c] sm:$0xf0]  ;;  %v5053_v6 = vor.u32 %v6962_v60, %v5052_v58 }
 0x158   :  { %v5317_v33 = vor.u32 %v7028_v18, %v5316_v15  ;;  %v5460_v0 = vld [vmem:[#allocation4 + $0x3c8] sm:$0xf]  ;;  %v7064_v3 = vld [vmem:[#allocation4 + $0x3dc] sm:$0xf0]  ;;  %v5436_v15 = vld [vmem:[#allocation4 + $0x398] sm:$0xf] }
 0x159   :  { %2509 = vmatpush.bf16.msra.mxu0 %v5865_v13  ;;  %2522 = vmatpush.bf16.msra.mxu1 %v6057_v21  ;;  %v6980_v13 = vld [vmem:[#allocation4 + $0x13c] sm:$0xf0]  ;;  %v5742_v21 = vld [vmem:[#allocation4 + $0x618] sm:$0xf0]  ;;  %v5652_v4 = vld [vmem:[#allocation4 + $0x548] sm:$0xf] }
 0x15a   :  { %2437 = vmatmul.bf16.vlgmr.msra.gmra.mxu2 %v7857_v26  ;;  %2450 = vmatmul.bf16.vlgmr.msra.gmra.mxu3 %v7859_v27  ;;  %v5125_v32 = vor.u32 %v6980_v13, %v5124_v12  ;;  %v5745_v35 = vor.u32 %v7132_v20, %v5742_v21  ;;  %v7112_v5 = vld [vmem:[#allocation4 + $0x55c] sm:$0xf0]  ;;  %v5461_v12 = vor.u32 %v7064_v3, %v5460_v0  ;;  %v7106_v18 = vld [vmem:[#allocation4 + $0x52c] sm:$0xf0]  ;;  %v5388_v47 = vld [vmem:[#allocation4 + $0x338] sm:$0xf] }
 0x15b   :  { %2485 = vmatpush.bf16.msrb.mxu2 %v5433_v28  ;;  %2498 = vmatpush.bf16.msrb.mxu3 %v5625_v29  ;;  %v5724_v28 = vld [vmem:[#allocation4 + $0x5d8] sm:$0xf]  ;;  %v7130_v29 = vld [vmem:[#allocation4 + $0x5ec] sm:$0xf0]  ;;  %v5653_v13 = vor.u32 %v7112_v5, %v5652_v4  ;;  %v7220_v60 = vld [vmem:[#allocation4 + $0x8bc] sm:$0xf0] }
 0x15c   :  { %v601_v43 = vpop.f32.mrf.mxu0  ;;  %v614_v44 = vpop.f32.mrf.mxu1  ;;  %v5725_v39 = vor.u32 %v7130_v29, %v5724_v28  ;;  %v7046_v48 = vld [vmem:[#allocation4 + $0x34c] sm:$0xf0]  ;;  %v6983_v0 = vld [vmem:[#allocation4 + $0x15c] sm:$0xf]  ;;  %v5150_v3 = vld [vmem:[#allocation4 + $0x170] sm:$0xf0] }
 0x15d   :  { %2510 = vmatpush.bf16.msra.mxu0 %v5841_v19  ;;  %2523 = vmatpush.bf16.msra.mxu1 %v6033_v36  ;;  %v5937_v19 = vor.u32 %v7180_v22, %v5934_v23  ;;  %v6974_v36 = vld [vmem:[#allocation4 + $0x10c] sm:$0xf0]  ;;  %v7124_v43 = vld [vmem:[#allocation4 + $0x5bc] sm:$0xf0]  ;;  %v5004_v22 = vld [vmem:[#allocation4 + $0x38] sm:$0xf] }
 0x15e   :  { %v5101_v44 = vor.u32 %v6974_v36, %v5100_v34  ;;  %v5701_v14 = vor.u32 %v7124_v43, %v5700_v42  ;;  %v6950_v23 = vld [vmem:[#allocation4 + $0x4c] sm:$0xf0]  ;;  %v5604_v34 = vld [vmem:[#allocation4 + $0x4e8] sm:$0xf]  ;;  %v5197_v36 = vor.u32 %v6998_v25, %v5196_v24  ;;  %v7031_v4 = vld [vmem:[#allocation4 + $0x2dc] sm:$0xf] }
 0x15f   :  { %2486 = vmatpush.bf16.msrb.mxu2 %v5409_v40  ;;  %2499 = vmatpush.bf16.msrb.mxu3 %v5601_v41  ;;  %v5508_v40 = vld [vmem:[#allocation4 + $0x428] sm:$0xf]  ;;  %v7076_v41 = vld [vmem:[#allocation4 + $0x43c] sm:$0xf0]  ;;  %v5342_v5 = vld [vmem:[#allocation4 + $0x2f0] sm:$0xf0] }
 0x160   :  { %2463 = vmatmul.bf16.vlgmr.msrb.gmra.mxu0 %v7841_v1  ;;  %2476 = vmatmul.bf16.vlgmr.msrb.gmra.mxu1 %v7843_v30  ;;  %v5509_v50 = vor.u32 %v7076_v41, %v5508_v40  ;;  %v5916_v40 = vld [vmem:[#allocation4 + $0x758] sm:$0xf]  ;;  %v7178_v41 = vld [vmem:[#allocation4 + $0x76c] sm:$0xf0]  ;;  %v5844_v24 = vld [vmem:[#allocation4 + $0x6c8] sm:$0xf] }
 0x161   :  { %2511 = vmatpush.bf16.msra.mxu0 %v5817_v49  ;;  %2524 = vmatpush.bf16.msra.mxu1 %v6009_v46  ;;  %v5268_v49 = vld [vmem:[#allocation4 + $0x248] sm:$0xf]  ;;  %v7016_v46 = vld [vmem:[#allocation4 + $0x25c] sm:$0xf0] }
 0x162   :  { %v5269_v57 = vor.u32 %v7016_v46, %v5268_v49  ;;  %v5580_v49 = vld [vmem:[#allocation4 + $0x4b8] sm:$0xf]  ;;  %v7094_v46 = vld [vmem:[#allocation4 + $0x4cc] sm:$0xf0]  ;;  %v7160_v25 = vld [vmem:[#allocation4 + $0x6dc] sm:$0xf0] }
 0x163   :  { %2487 = vmatpush.bf16.msrb.mxu2 %v5385_v53  ;;  %2500 = vmatpush.bf16.msrb.mxu3 %v5577_v55  ;;  %v5676_v53 = vld [vmem:[#allocation4 + $0x578] sm:$0xf]  ;;  %v7118_v55 = vld [vmem:[#allocation4 + $0x58c] sm:$0xf0]  ;;  %v5581_v58 = vor.u32 %v7094_v46, %v5580_v49 }
 0x165   :  { %2512 = vmatpush.bf16.msra.mxu0 %v5793_v61  ;;  %2525 = vmatpush.bf16.msra.mxu1 %v5985_v63  ;;  %v5485_v61 = vor.u32 %v7070_v52, %v5484_v51  ;;  %v5677_v63 = vor.u32 %v7118_v55, %v5676_v53  ;;  %v5917_v51 = vor.u32 %v7178_v41, %v5916_v40  ;;  %v5892_v53 = vld [vmem:[#allocation4 + $0x728] sm:$0xf]  ;;  %v7172_v55 = vld [vmem:[#allocation4 + $0x73c] sm:$0xf0] }
 0x167   :  { %2488 = vmatpush.bf16.msrb.mxu2 %v5361_v8  ;;  %2501 = vmatpush.bf16.msrb.mxu3 %v5553_v9  ;;  %v5028_v8 = vld [vmem:[#allocation4 + $0x68] sm:$0xf]  ;;  %v6956_v9 = vld [vmem:[#allocation4 + $0x7c] sm:$0xf0] }
 0x168   :  { %v5029_v20 = vor.u32 %v6956_v9, %v5028_v8  ;;  %v5365_v8 = vor.u32 %v7040_v62, %v5364_v31 }
 0x169   :  { %2513 = vmatpush.bf16.msra.mxu0 %v5769_v16  ;;  %2526 = vmatpush.bf16.msra.mxu1 %v5961_v17  ;;  %v7058_v16 = vld [vmem:[#allocation4 + $0x3ac] sm:$0xf0]  ;;  %v5628_v17 = vld [vmem:[#allocation4 + $0x518] sm:$0xf] }
 0x16a   :  { %2489 = vmatmul.bf16.vlgmr.msrb.gmra.mxu2 %v7849_v54  ;;  %2502 = vmatmul.bf16.vlgmr.msrb.gmra.mxu3 %v7851_v59  ;;  %v5437_v28 = vor.u32 %v7058_v16, %v5436_v15  ;;  %v5629_v29 = vor.u32 %v7106_v18, %v5628_v17  ;;  %v6060_v15 = vld [vmem:[#allocation4 + $0x878] sm:$0xf]  ;;  %v7214_v16 = vld [vmem:[#allocation4 + $0x88c] sm:$0xf0]  ;;  %v6977_v17 = vld [vmem:[#allocation4 + $0x12c] sm:$0xf] }
 0x16b   :  { %2533 = vmatpush.bf16.msra.mxu2 %v5149_v10  ;;  %2546 = vmatpush.bf16.msra.mxu3 %v5341_v11  ;;  %v5220_v10 = vld [vmem:[#allocation4 + $0x1e8] sm:$0xf]  ;;  %v7004_v11 = vld [vmem:[#allocation4 + $0x1fc] sm:$0xf0]  ;;  %v5126_v18 = vld [vmem:[#allocation4 + $0x140] sm:$0xf0] }
 0x16c   :  { %v5221_v21 = vor.u32 %v7004_v11, %v5220_v10  ;;  %v5868_v10 = vld [vmem:[#allocation4 + $0x6f8] sm:$0xf]  ;;  %v7166_v11 = vld [vmem:[#allocation4 + $0x70c] sm:$0xf0] }
 0x16d   :  { %2514 = vmatpush.bf16.msra.mxu0 %v5745_v35  ;;  %2527 = vmatpush.bf16.msra.mxu1 %v5937_v19  ;;  %v7100_v35 = vld [vmem:[#allocation4 + $0x4fc] sm:$0xf0]  ;;  %v5005_v19 = vor.u32 %v6950_v23, %v5004_v22  ;;  %v5869_v22 = vor.u32 %v7166_v11, %v5868_v10  ;;  %v6061_v23 = vor.u32 %v7214_v16, %v6060_v15  ;;  %v5940_v15 = vld [vmem:[#allocation4 + $0x788] sm:$0xf] }
 0x16e   :  { %v5605_v43 = vor.u32 %v7100_v35, %v5604_v34  ;;  %v6971_v34 = vld [vmem:[#allocation4 + $0xfc] sm:$0xf]  ;;  %v5102_v35 = vld [vmem:[#allocation4 + $0x110] sm:$0xf0] }
 0x16f   :  { %2534 = vmatpush.bf16.msra.mxu2 %v5125_v32  ;;  %2547 = vmatpush.bf16.msra.mxu3 %v5317_v33  ;;  %v5412_v32 = vld [vmem:[#allocation4 + $0x368] sm:$0xf]  ;;  %v7052_v33 = vld [vmem:[#allocation4 + $0x37c] sm:$0xf0]  ;;  %v5105_v40 = vor.u32 %v6971_v34, %v5102_v35 }
 0x170   :  { %2515 = vmatmul.bf16.vlgmr.msra.gmra.mxu0 %v7857_v26  ;;  %2528 = vmatmul.bf16.vlgmr.msra.gmra.mxu1 %v7859_v27  ;;  %v5413_v42 = vor.u32 %v7052_v33, %v5412_v32  ;;  %v6036_v32 = vld [vmem:[#allocation4 + $0x848] sm:$0xf]  ;;  %v7208_v33 = vld [vmem:[#allocation4 + $0x85c] sm:$0xf0] }
 0x171   :  { %2559 = vmatpush.bf16.msrb.mxu0 %v5533_v2  ;;  %2572 = vmatpush.bf16.msrb.mxu1 %v5725_v39  ;;  %v5172_v2 = vld [vmem:[#allocation4 + $0x188] sm:$0xf]  ;;  %v6992_v39 = vld [vmem:[#allocation4 + $0x19c] sm:$0xf0] }
 0x173   :  { %2535 = vmatpush.bf16.msra.mxu2 %v5101_v44  ;;  %2548 = vmatpush.bf16.msra.mxu3 %v5293_v45  ;;  %v6108_v44 = vld [vmem:[#allocation4 + $0x8d8] sm:$0xf]  ;;  %v7226_v45 = vld [vmem:[#allocation4 + $0x8ec] sm:$0xf0] }
 0x174   :  { %v6109_v52 = vor.u32 %v7226_v45, %v6108_v44  ;;  %v6965_v44 = vld [vmem:[#allocation4 + $0xcc] sm:$0xf]  ;;  %v5078_v45 = vld [vmem:[#allocation4 + $0xe0] sm:$0xf0] }
 0x175   :  { %2560 = vmatpush.bf16.msrb.mxu0 %v5509_v50  ;;  %2573 = vmatpush.bf16.msrb.mxu1 %v5701_v14  ;;  %v4981_v50 = vor.u32 %v6944_v38, %v4980_v37  ;;  %v5173_v14 = vor.u32 %v6992_v39, %v5172_v2  ;;  %v5845_v37 = vor.u32 %v7160_v25, %v5844_v24  ;;  %v5820_v2 = vld [vmem:[#allocation4 + $0x698] sm:$0xf]  ;;  %v7154_v39 = vld [vmem:[#allocation4 + $0x6ac] sm:$0xf0]  ;;  %v6947_v24 = vld [vmem:[#allocation4 + $0x3c] sm:$0xf] }
 0x176   :  { %v6037_v38 = vor.u32 %v7208_v33, %v6036_v32  ;;  %v5821_v49 = vor.u32 %v7154_v39, %v5820_v2  ;;  %v5006_v25 = vld [vmem:[#allocation4 + $0x50] sm:$0xf0]  ;;  %v5702_v39 = vld [vmem:[#allocation4 + $0x5c0] sm:$0xf0] }
 0x177   :  { %2536 = vmatpush.bf16.msra.mxu2 %v5077_v56  ;;  %2549 = vmatpush.bf16.msra.mxu3 %v5269_v57  ;;  %v6084_v56 = vld [vmem:[#allocation4 + $0x8a8] sm:$0xf]  ;;  %v5389_v57 = vor.u32 %v7046_v48, %v5388_v47  ;;  %v7013_v47 = vld [vmem:[#allocation4 + $0x24c] sm:$0xf]  ;;  %v5270_v48 = vld [vmem:[#allocation4 + $0x260] sm:$0xf0] }
 0x179   :  { %2561 = vmatpush.bf16.msrb.mxu0 %v5485_v61  ;;  %2574 = vmatpush.bf16.msrb.mxu1 %v5677_v63  ;;  %v5556_v61 = vld [vmem:[#allocation4 + $0x488] sm:$0xf]  ;;  %v7088_v63 = vld [vmem:[#allocation4 + $0x49c] sm:$0xf0] }
 0x17a   :  { %v5557_v9 = vor.u32 %v7088_v63, %v5556_v61  ;;  %v5772_v61 = vld [vmem:[#allocation4 + $0x638] sm:$0xf]  ;;  %v7142_v63 = vld [vmem:[#allocation4 + $0x64c] sm:$0xf0] }
 0x17b   :  { %2537 = vmatpush.bf16.msra.mxu2 %v5053_v6  ;;  %2550 = vmatpush.bf16.msra.mxu3 %v5245_v7  ;;  %v5893_v6 = vor.u32 %v7172_v55, %v5892_v53  ;;  %v6085_v7 = vor.u32 %v7220_v60, %v6084_v56  ;;  %v5988_v53 = vld [vmem:[#allocation4 + $0x7e8] sm:$0xf]  ;;  %v7196_v55 = vld [vmem:[#allocation4 + $0x7fc] sm:$0xf0]  ;;  %v6959_v56 = vld [vmem:[#allocation4 + $0x9c] sm:$0xf]  ;;  %v5773_v10 = vor.u32 %v7142_v63, %v5772_v61 }
 0x17c   :  { %v5246_v60 = vld [vmem:[#allocation4 + $0x230] sm:$0xf0]  ;;  %v5989_v62 = vor.u32 %v7196_v55, %v5988_v53 }
 0x17d   :  { %2562 = vmatpush.bf16.msrb.mxu0 %v5461_v12  ;;  %2575 = vmatpush.bf16.msrb.mxu1 %v5653_v13  ;;  %v5153_v12 = vor.u32 %v6983_v0, %v5150_v3  ;;  %v5345_v13 = vor.u32 %v7031_v4, %v5342_v5  ;;  %v5964_v4 = vld [vmem:[#allocation4 + $0x7b8] sm:$0xf]  ;;  %v7190_v5 = vld [vmem:[#allocation4 + $0x7cc] sm:$0xf0] }
 0x17e   :  { %v5965_v11 = vor.u32 %v7190_v5, %v5964_v4 }
 0x17f   :  { %2538 = vmatpush.bf16.msra.mxu2 %v5029_v20  ;;  %2551 = vmatpush.bf16.msra.mxu3 %v5221_v21  ;;  %v7025_v20 = vld [vmem:[#allocation4 + $0x2ac] sm:$0xf]  ;;  %v5318_v21 = vld [vmem:[#allocation4 + $0x2c0] sm:$0xf0] }
 0x181   :  { %2563 = vmatpush.bf16.msrb.mxu0 %v5437_v28  ;;  %2576 = vmatpush.bf16.msrb.mxu1 %v5629_v29  ;;  %v5129_v28 = vor.u32 %v6977_v17, %v5126_v18  ;;  %v5321_v29 = vor.u32 %v7025_v20, %v5318_v21  ;;  %v7184_v18 = vld [vmem:[#allocation4 + $0x79c] sm:$0xf0]  ;;  %v7079_v20 = vld [vmem:[#allocation4 + $0x45c] sm:$0xf]  ;;  %v5534_v21 = vld [vmem:[#allocation4 + $0x470] sm:$0xf0] }
 0x182   :  { %v5941_v33 = vor.u32 %v7184_v18, %v5940_v15  ;;  %v5537_v34 = vor.u32 %v7079_v20, %v5534_v21  ;;  %v7055_v15 = vld [vmem:[#allocation4 + $0x39c] sm:$0xf]  ;;  %v5630_v21 = vld [vmem:[#allocation4 + $0x530] sm:$0xf0] }
 0x183   :  { %2539 = vmatpush.bf16.msra.mxu2 %v5005_v19  ;;  %2552 = vmatpush.bf16.msra.mxu3 %v5197_v36  ;;  %v7019_v19 = vld [vmem:[#allocation4 + $0x27c] sm:$0xf]  ;;  %v5294_v36 = vld [vmem:[#allocation4 + $0x290] sm:$0xf0] }
 0x184   :  { %v5297_v41 = vor.u32 %v7019_v19, %v5294_v36  ;;  %v7073_v19 = vld [vmem:[#allocation4 + $0x42c] sm:$0xf]  ;;  %v5510_v36 = vld [vmem:[#allocation4 + $0x440] sm:$0xf0]  ;;  %v7103_v20 = vld [vmem:[#allocation4 + $0x51c] sm:$0xf] }
 0x185   :  { %2564 = vmatpush.bf16.msrb.mxu0 %v5413_v42  ;;  %2577 = vmatpush.bf16.msrb.mxu1 %v5605_v43  ;;  %v6012_v42 = vld [vmem:[#allocation4 + $0x818] sm:$0xf]  ;;  %v7202_v43 = vld [vmem:[#allocation4 + $0x82c] sm:$0xf0] }
 0x186   :  { %v6013_v46 = vor.u32 %v7202_v43, %v6012_v42  ;;  %v6989_v42 = vld [vmem:[#allocation4 + $0x18c] sm:$0xf]  ;;  %v5174_v43 = vld [vmem:[#allocation4 + $0x1a0] sm:$0xf0] }
 0x187   :  { %2540 = vmatpush.bf16.msra.mxu2 %v4981_v50  ;;  %2553 = vmatpush.bf16.msra.mxu3 %v5173_v14  ;;  %v5796_v50 = vld [vmem:[#allocation4 + $0x668] sm:$0xf]  ;;  %v7148_v14 = vld [vmem:[#allocation4 + $0x67c] sm:$0xf0] }
 0x188   :  { %v5797_v31 = vor.u32 %v7148_v14, %v5796_v50  ;;  %v5177_v14 = vor.u32 %v6989_v42, %v5174_v43  ;;  %v7043_v42 = vld [vmem:[#allocation4 + $0x33c] sm:$0xf]  ;;  %v5390_v43 = vld [vmem:[#allocation4 + $0x350] sm:$0xf0] }
 0x189   :  { %2565 = vmatpush.bf16.msrb.mxu0 %v5389_v57  ;;  %2578 = vmatpush.bf16.msrb.mxu1 %v5581_v58  ;;  %v5054_v57 = vld [vmem:[#allocation4 + $0xb0] sm:$0xf0]  ;;  %v7007_v58 = vld [vmem:[#allocation4 + $0x21c] sm:$0xf] }
 0x18a   :  { %2541 = vmatmul.bf16.vlgmr.msra.gmra.mxu2 %v7841_v1  ;;  %2554 = vmatmul.bf16.vlgmr.msra.gmra.mxu3 %v7843_v30  ;;  %v5057_v0 = vor.u32 %v6959_v56, %v5054_v57  ;;  %v5249_v3 = vor.u32 %v7007_v58, %v5246_v60  ;;  %v7115_v56 = vld [vmem:[#allocation4 + $0x57c] sm:$0xf]  ;;  %v5678_v57 = vld [vmem:[#allocation4 + $0x590] sm:$0xf0]  ;;  %v7169_v58 = vld [vmem:[#allocation4 + $0x72c] sm:$0xf] }
 0x18b   :  { %2585 = vmatpush.bf16.msrb.mxu2 %v5917_v51  ;;  %2598 = vmatpush.bf16.msrb.mxu3 %v6109_v52  ;;  %v5081_v51 = vor.u32 %v6965_v44, %v5078_v45  ;;  %v5273_v52 = vor.u32 %v7013_v47, %v5270_v48  ;;  %v7175_v44 = vld [vmem:[#allocation4 + $0x75c] sm:$0xf]  ;;  %v5918_v45 = vld [vmem:[#allocation4 + $0x770] sm:$0xf0]  ;;  %v5894_v60 = vld [vmem:[#allocation4 + $0x740] sm:$0xf0]  ;;  %v5681_v63 = vor.u32 %v7115_v56, %v5678_v57 }
 0x18c   :  { %v7223_v47 = vld [vmem:[#allocation4 + $0x8dc] sm:$0xf]  ;;  %v6110_v48 = vld [vmem:[#allocation4 + $0x8f0] sm:$0xf0]  ;;  %v5921_v53 = vor.u32 %v7175_v44, %v5918_v45  ;;  %v5897_v4 = vor.u32 %v7169_v58, %v5894_v60  ;;  %v7085_v56 = vld [vmem:[#allocation4 + $0x48c] sm:$0xf] }
 0x18d   :  { %2566 = vmatpush.bf16.msrb.mxu0 %v5365_v8  ;;  %2579 = vmatpush.bf16.msrb.mxu1 %v5557_v9  ;;  %v7001_v8 = vld [vmem:[#allocation4 + $0x1ec] sm:$0xf]  ;;  %v5222_v9 = vld [vmem:[#allocation4 + $0x200] sm:$0xf0]  ;;  %v6113_v55 = vor.u32 %v7223_v47, %v6110_v48  ;;  %v7091_v47 = vld [vmem:[#allocation4 + $0x4bc] sm:$0xf] }
 0x18e   :  { %v5225_v17 = vor.u32 %v7001_v8, %v5222_v9  ;;  %v7163_v8 = vld [vmem:[#allocation4 + $0x6fc] sm:$0xf]  ;;  %v5870_v9 = vld [vmem:[#allocation4 + $0x710] sm:$0xf0]  ;;  %v5558_v60 = vld [vmem:[#allocation4 + $0x4a0] sm:$0xf0] }
 0x18f   :  { %2586 = vmatpush.bf16.msrb.mxu2 %v5893_v6  ;;  %2599 = vmatpush.bf16.msrb.mxu3 %v6085_v7  ;;  %v6953_v6 = vld [vmem:[#allocation4 + $0x6c] sm:$0xf]  ;;  %v5030_v7 = vld [vmem:[#allocation4 + $0x80] sm:$0xf0]  ;;  %v5582_v48 = vld [vmem:[#allocation4 + $0x4d0] sm:$0xf0] }
 0x190   :  { %2567 = vmatmul.bf16.vlgmr.msrb.gmra.mxu0 %v7849_v54  ;;  %2580 = vmatmul.bf16.vlgmr.msrb.gmra.mxu1 %v7851_v59  ;;  %v5033_v16 = vor.u32 %v6953_v6, %v5030_v7  ;;  %v7109_v6 = vld [vmem:[#allocation4 + $0x54c] sm:$0xf]  ;;  %v5654_v7 = vld [vmem:[#allocation4 + $0x560] sm:$0xf0] }
 0x191   :  { %2611 = vmatpush.bf16.msra.mxu0 %v5153_v12  ;;  %2624 = vmatpush.bf16.msra.mxu1 %v5345_v13  ;;  %v5748_v12 = vld [vmem:[#allocation4 + $0x608] sm:$0xf]  ;;  %v7136_v13 = vld [vmem:[#allocation4 + $0x61c] sm:$0xf0] }
 0x192   :  { %v5749_v32 = vor.u32 %v7136_v13, %v5748_v12  ;;  %v5657_v13 = vor.u32 %v7109_v6, %v5654_v7  ;;  %v5561_v7 = vor.u32 %v7085_v56, %v5558_v60  ;;  %v6963_v60 = vld [vmem:[#allocation4 + $0xb4] sm:$0xf0] }
 0x193   :  { %2587 = vmatpush.bf16.msrb.mxu2 %v5869_v22  ;;  %2600 = vmatpush.bf16.msrb.mxu3 %v6061_v23  ;;  %v7127_v22 = vld [vmem:[#allocation4 + $0x5dc] sm:$0xf]  ;;  %v5726_v23 = vld [vmem:[#allocation4 + $0x5f0] sm:$0xf0] }
 0x194   :  { %v5729_v35 = vor.u32 %v7127_v22, %v5726_v23  ;;  %v7157_v22 = vld [vmem:[#allocation4 + $0x6cc] sm:$0xf]  ;;  %v5846_v23 = vld [vmem:[#allocation4 + $0x6e0] sm:$0xf0] }
 0x195   :  { %2612 = vmatpush.bf16.msra.mxu0 %v5129_v28  ;;  %2625 = vmatpush.bf16.msra.mxu1 %v5321_v29  ;;  %v6995_v28 = vld [vmem:[#allocation4 + $0x1bc] sm:$0xf]  ;;  %v5198_v29 = vld [vmem:[#allocation4 + $0x1d0] sm:$0xf0] }
 0x196   :  { %v5201_v2 = vor.u32 %v6995_v28, %v5198_v29  ;;  %v5633_v29 = vor.u32 %v7103_v20, %v5630_v21  ;;  %v7181_v20 = vld [vmem:[#allocation4 + $0x78c] sm:$0xf]  ;;  %v5942_v21 = vld [vmem:[#allocation4 + $0x7a0] sm:$0xf0] }
 0x197   :  { %2588 = vmatpush.bf16.msrb.mxu2 %v5845_v37  ;;  %2601 = vmatpush.bf16.msrb.mxu3 %v6037_v38  ;;  %v7121_v37 = vld [vmem:[#allocation4 + $0x5ac] sm:$0xf]  ;;  %v5009_v38 = vor.u32 %v6947_v24, %v5006_v25  ;;  %v6038_v25 = vld [vmem:[#allocation4 + $0x860] sm:$0xf0] }
 0x198   :  { %v7205_v24 = vld [vmem:[#allocation4 + $0x84c] sm:$0xf] }
 0x199   :  { %2613 = vmatpush.bf16.msra.mxu0 %v5105_v40  ;;  %2626 = vmatpush.bf16.msra.mxu1 %v5297_v41  ;;  %v6941_v40 = vld [vmem:[#allocation4 + $0xc] sm:$0xf]  ;;  %v4982_v41 = vld [vmem:[#allocation4 + $0x20] sm:$0xf0] }
 0x19a   :  { %v4985_v50 = vor.u32 %v6941_v40, %v4982_v41 }
 0x19b   :  { %2589 = vmatpush.bf16.msrb.mxu2 %v5821_v49  ;;  %2602 = vmatpush.bf16.msrb.mxu3 %v6013_v46  ;;  %v5513_v49 = vor.u32 %v7073_v19, %v5510_v36  ;;  %v5705_v46 = vor.u32 %v7121_v37, %v5702_v39  ;;  %v7097_v19 = vld [vmem:[#allocation4 + $0x4ec] sm:$0xf]  ;;  %v5606_v36 = vld [vmem:[#allocation4 + $0x500] sm:$0xf0]  ;;  %v7151_v37 = vld [vmem:[#allocation4 + $0x69c] sm:$0xf] }
 0x19c   :  { %v6014_v39 = vld [vmem:[#allocation4 + $0x830] sm:$0xf0]  ;;  %v5609_v41 = vor.u32 %v7097_v19, %v5606_v36 }
 0x19d   :  { %2614 = vmatpush.bf16.msra.mxu0 %v5081_v51  ;;  %2627 = vmatpush.bf16.msra.mxu1 %v5273_v52  ;;  %v7067_v51 = vld [vmem:[#allocation4 + $0x3fc] sm:$0xf]  ;;  %v5486_v52 = vld [vmem:[#allocation4 + $0x410] sm:$0xf0] }
 0x19e   :  { %v5489_v61 = vor.u32 %v7067_v51, %v5486_v52  ;;  %v5393_v51 = vor.u32 %v7043_v42, %v5390_v43  ;;  %v5585_v52 = vor.u32 %v7091_v47, %v5582_v48  ;;  %v7879_v47 = vld [vmem:[#allocation6] sm:$0x3f] }
 0x19f   :  { %2590 = vmatpush.bf16.msrb.mxu2 %v5797_v31  ;;  %2603 = vmatpush.bf16.msrb.mxu3 %v5989_v62  ;;  %v7217_v31 = vld [vmem:[#allocation4 + $0x8ac] sm:$0xf]  ;;  %v6086_v62 = vld [vmem:[#allocation4 + $0x8c0] sm:$0xf0] }
 0x1a0   :  { %v6089_v5 = vor.u32 %v7217_v31, %v6086_v62  ;;  %v5156_v31 = vld [vmem:[#allocation4 + $0x160] sm:$0xf]  ;;  %v6987_v62 = vld [vmem:[#allocation4 + $0x174] sm:$0xf0] }
 0x1a1   :  { %2615 = vmatpush.bf16.msra.mxu0 %v5057_v0  ;;  %2628 = vmatpush.bf16.msra.mxu1 %v5249_v3  ;;  %v7061_v0 = vld [vmem:[#allocation4 + $0x3cc] sm:$0xf]  ;;  %v5462_v3 = vld [vmem:[#allocation4 + $0x3e0] sm:$0xf0] }
 0x1a2   :  { %v5465_v12 = vor.u32 %v7061_v0, %v5462_v3  ;;  %v7139_v0 = vld [vmem:[#allocation4 + $0x63c] sm:$0xf]  ;;  %v5774_v3 = vld [vmem:[#allocation4 + $0x650] sm:$0xf0] }
 0x1a3   :  { %2591 = vmatpush.bf16.msrb.mxu2 %v5773_v10  ;;  %2604 = vmatpush.bf16.msrb.mxu3 %v5965_v11  ;;  %v7211_v10 = vld [vmem:[#allocation4 + $0x87c] sm:$0xf]  ;;  %v6062_v11 = vld [vmem:[#allocation4 + $0x890] sm:$0xf0] }
 0x1a4   :  { %v6065_v18 = vor.u32 %v7211_v10, %v6062_v11  ;;  %v5132_v10 = vld [vmem:[#allocation4 + $0x130] sm:$0xf]  ;;  %v6981_v11 = vld [vmem:[#allocation4 + $0x144] sm:$0xf0] }
 0x1a5   :  { %2616 = vmatpush.bf16.msra.mxu0 %v5033_v16  ;;  %2629 = vmatpush.bf16.msra.mxu1 %v5225_v17  ;;  %v5438_v16 = vld [vmem:[#allocation4 + $0x3b0] sm:$0xf0]  ;;  %v5873_v17 = vor.u32 %v7163_v8, %v5870_v9  ;;  %v5157_v8 = vor.u32 %v6987_v62, %v5156_v31 }
 0x1a6   :  { %v5441_v28 = vor.u32 %v7055_v15, %v5438_v16  ;;  %v7029_v16 = vld [vmem:[#allocation4 + $0x2c4] sm:$0xf0] }
 0x1a7   :  { %2592 = vmatpush.bf16.msrb.mxu2 %v5749_v32  ;;  %2605 = vmatpush.bf16.msrb.mxu3 %v5941_v33  ;;  %v7049_v32 = vld [vmem:[#allocation4 + $0x36c] sm:$0xf]  ;;  %v5414_v33 = vld [vmem:[#allocation4 + $0x380] sm:$0xf0] }
 0x1a8   :  { %v5417_v40 = vor.u32 %v7049_v32, %v5414_v33  ;;  %v5945_v33 = vor.u32 %v7181_v20, %v5942_v21  ;;  %v5228_v20 = vld [vmem:[#allocation4 + $0x1f0] sm:$0xf]  ;;  %v7005_v21 = vld [vmem:[#allocation4 + $0x204] sm:$0xf0] }
 0x1a9   :  { %2617 = vmatpush.bf16.msra.mxu0 %v5009_v38  ;;  %2630 = vmatpush.bf16.msra.mxu1 %v5201_v2  ;;  %v5822_v38 = vld [vmem:[#allocation4 + $0x6b0] sm:$0xf0]  ;;  %v7199_v2 = vld [vmem:[#allocation4 + $0x81c] sm:$0xf] }
 0x1aa   :  { %2593 = vmatmul.bf16.vlgmr.msrb.gmra.mxu2 %v7857_v26  ;;  %2606 = vmatmul.bf16.vlgmr.msrb.gmra.mxu3 %v7859_v27  ;;  %v5825_v44 = vor.u32 %v7151_v37, %v5822_v38  ;;  %v6017_v45 = vor.u32 %v7199_v2, %v6014_v39  ;;  %v5300_v37 = vld [vmem:[#allocation4 + $0x280] sm:$0xf]  ;;  %v7023_v38 = vld [vmem:[#allocation4 + $0x294] sm:$0xf0]  ;;  %v5516_v2 = vld [vmem:[#allocation4 + $0x430] sm:$0xf] }
 0x1ab   :  { %2637 = vmatpush.bf16.msra.mxu2 %v5537_v34  ;;  %2650 = vmatpush.bf16.msra.mxu3 %v5729_v35  ;;  %v5849_v34 = vor.u32 %v7157_v22, %v5846_v23  ;;  %v6041_v35 = vor.u32 %v7205_v24, %v6038_v25  ;;  %v5540_v22 = vld [vmem:[#allocation4 + $0x460] sm:$0xf]  ;;  %v7083_v23 = vld [vmem:[#allocation4 + $0x474] sm:$0xf0]  ;;  %v7077_v39 = vld [vmem:[#allocation4 + $0x444] sm:$0xf0]  ;;  %v5301_v43 = vor.u32 %v7023_v38, %v5300_v37 }
 0x1ac   :  { %v5732_v24 = vld [vmem:[#allocation4 + $0x5e0] sm:$0xf]  ;;  %v7131_v25 = vld [vmem:[#allocation4 + $0x5f4] sm:$0xf0]  ;;  %v5541_v19 = vor.u32 %v7083_v23, %v5540_v22  ;;  %v5517_v48 = vor.u32 %v7077_v39, %v5516_v2  ;;  %v5420_v2 = vld [vmem:[#allocation4 + $0x370] sm:$0xf] }
 0x1ad   :  { %2618 = vmatpush.bf16.msra.mxu0 %v4985_v50  ;;  %2631 = vmatpush.bf16.msra.mxu1 %v5177_v14  ;;  %v7193_v50 = vld [vmem:[#allocation4 + $0x7ec] sm:$0xf]  ;;  %v5990_v14 = vld [vmem:[#allocation4 + $0x800] sm:$0xf0]  ;;  %v5733_v36 = vor.u32 %v7131_v25, %v5732_v24  ;;  %v5444_v22 = vld [vmem:[#allocation4 + $0x3a0] sm:$0xf] }
 0x1ae   :  { %v5993_v58 = vor.u32 %v7193_v50, %v5990_v14  ;;  %v7017_v50 = vld [vmem:[#allocation4 + $0x264] sm:$0xf0]  ;;  %v5492_v14 = vld [vmem:[#allocation4 + $0x400] sm:$0xf]  ;;  %v7059_v23 = vld [vmem:[#allocation4 + $0x3b4] sm:$0xf0] }
 0x1af   :  { %2638 = vmatpush.bf16.msra.mxu2 %v5513_v49  ;;  %2651 = vmatpush.bf16.msra.mxu3 %v5705_v46  ;;  %v7145_v49 = vld [vmem:[#allocation4 + $0x66c] sm:$0xf]  ;;  %v5798_v46 = vld [vmem:[#allocation4 + $0x680] sm:$0xf0]  ;;  %v5636_v24 = vld [vmem:[#allocation4 + $0x520] sm:$0xf] }
 0x1b0   :  { %2619 = vmatmul.bf16.vlgmr.msra.gmra.mxu0 %v7841_v1  ;;  %2632 = vmatmul.bf16.vlgmr.msra.gmra.mxu1 %v7843_v30  ;;  %v5801_v57 = vor.u32 %v7145_v49, %v5798_v46  ;;  %v5276_v46 = vld [vmem:[#allocation4 + $0x250] sm:$0xf]  ;;  %v7107_v25 = vld [vmem:[#allocation4 + $0x534] sm:$0xf0]  ;;  %v5204_v37 = vld [vmem:[#allocation4 + $0x1c0] sm:$0xf] }
 0x1b1   :  { %2663 = vmatpush.bf16.msrb.mxu0 %v5921_v53  ;;  %2676 = vmatpush.bf16.msrb.mxu1 %v6113_v55  ;;  %v7037_v53 = vld [vmem:[#allocation4 + $0x30c] sm:$0xf]  ;;  %v5366_v55 = vld [vmem:[#allocation4 + $0x320] sm:$0xf0]  ;;  %v6999_v38 = vld [vmem:[#allocation4 + $0x1d4] sm:$0xf0] }
 0x1b2   :  { %v5369_v6 = vor.u32 %v7037_v53, %v5366_v55  ;;  %v7119_v53 = vld [vmem:[#allocation4 + $0x594] sm:$0xf0]  ;;  %v925_v55 = vperm.slane %v7879_v47, 0 }
 0x1b3   :  { %2639 = vmatpush.bf16.msra.mxu2 %v5489_v61  ;;  %2652 = vmatpush.bf16.msra.mxu3 %v5681_v63  ;;  %v5348_v61 = vld [vmem:[#allocation4 + $0x2e0] sm:$0xf]  ;;  %v7035_v63 = vld [vmem:[#allocation4 + $0x2f4] sm:$0xf0] }
 0x1b4   :  { %v5349_v9 = vor.u32 %v7035_v63, %v5348_v61  ;;  %v5252_v61 = vld [vmem:[#allocation4 + $0x220] sm:$0xf]  ;;  %v7011_v63 = vld [vmem:[#allocation4 + $0x234] sm:$0xf0] }
 0x1b5   :  { %2664 = vmatpush.bf16.msrb.mxu0 %v5897_v4  ;;  %2677 = vmatpush.bf16.msrb.mxu1 %v6089_v5  ;;  %v7187_v4 = vld [vmem:[#allocation4 + $0x7bc] sm:$0xf]  ;;  %v5966_v5 = vld [vmem:[#allocation4 + $0x7d0] sm:$0xf0] }
 0x1b6   :  { %v5969_v15 = vor.u32 %v7187_v4, %v5966_v5  ;;  %v7065_v5 = vld [vmem:[#allocation4 + $0x3e4] sm:$0xf0] }
 0x1b7   :  { %2640 = vmatpush.bf16.msra.mxu2 %v5465_v12  ;;  %2653 = vmatpush.bf16.msra.mxu3 %v5657_v13  ;;  %v5324_v12 = vld [vmem:[#allocation4 + $0x2b0] sm:$0xf]  ;;  %v5777_v13 = vor.u32 %v7139_v0, %v5774_v3 }
 0x1b8   :  { %v5468_v0 = vld [vmem:[#allocation4 + $0x3d0] sm:$0xf] }
 0x1b9   :  { %2665 = vmatpush.bf16.msrb.mxu0 %v5873_v17  ;;  %2678 = vmatpush.bf16.msrb.mxu1 %v6065_v18  ;;  %v7133_v17 = vld [vmem:[#allocation4 + $0x60c] sm:$0xf]  ;;  %v5750_v18 = vld [vmem:[#allocation4 + $0x620] sm:$0xf0] }
 0x1ba   :  { %v5753_v32 = vor.u32 %v7133_v17, %v5750_v18  ;;  %v5469_v17 = vor.u32 %v7065_v5, %v5468_v0 }
 0x1bb   :  { %2641 = vmatpush.bf16.msra.mxu2 %v5441_v28  ;;  %2654 = vmatpush.bf16.msra.mxu3 %v5633_v29  ;;  %v5133_v28 = vor.u32 %v6981_v11, %v5132_v10  ;;  %v5325_v29 = vor.u32 %v7029_v16, %v5324_v12  ;;  %v5253_v12 = vor.u32 %v7011_v63, %v5252_v61  ;;  %v7095_v61 = vld [vmem:[#allocation4 + $0x4d4] sm:$0xf0] }
 0x1bd   :  { %2666 = vmatpush.bf16.msrb.mxu0 %v5849_v34  ;;  %2679 = vmatpush.bf16.msrb.mxu1 %v6041_v35  ;;  %v5108_v34 = vld [vmem:[#allocation4 + $0x100] sm:$0xf]  ;;  %v6975_v35 = vld [vmem:[#allocation4 + $0x114] sm:$0xf0] }
 0x1be   :  { %v5109_v42 = vor.u32 %v6975_v35, %v5108_v34  ;;  %v6951_v34 = vld [vmem:[#allocation4 + $0x54] sm:$0xf0] }
 0x1bf   :  { %2642 = vmatpush.bf16.msra.mxu2 %v5417_v40  ;;  %2655 = vmatpush.bf16.msra.mxu3 %v5609_v41  ;;  %v5708_v40 = vld [vmem:[#allocation4 + $0x5b0] sm:$0xf]  ;;  %v7125_v41 = vld [vmem:[#allocation4 + $0x5c4] sm:$0xf0] }
 0x1c0   :  { %v5709_v49 = vor.u32 %v7125_v41, %v5708_v40  ;;  %v7053_v41 = vld [vmem:[#allocation4 + $0x384] sm:$0xf0] }
 0x1c1   :  { %2667 = vmatpush.bf16.msrb.mxu0 %v5825_v44  ;;  %2680 = vmatpush.bf16.msrb.mxu1 %v6017_v45  ;;  %v5084_v44 = vld [vmem:[#allocation4 + $0xd0] sm:$0xf]  ;;  %v6969_v45 = vld [vmem:[#allocation4 + $0xe4] sm:$0xf0] }
 0x1c2   :  { %v5085_v56 = vor.u32 %v6969_v45, %v5084_v44 }
 0x1c3   :  { %2643 = vmatpush.bf16.msra.mxu2 %v5393_v51  ;;  %2656 = vmatpush.bf16.msra.mxu3 %v5585_v52  ;;  %v7071_v51 = vld [vmem:[#allocation4 + $0x414] sm:$0xf0]  ;;  %v5684_v52 = vld [vmem:[#allocation4 + $0x580] sm:$0xf] }
 0x1c4   :  { %v5493_v31 = vor.u32 %v7071_v51, %v5492_v14  ;;  %v5685_v62 = vor.u32 %v7119_v53, %v5684_v52  ;;  %v5180_v14 = vld [vmem:[#allocation4 + $0x190] sm:$0xf]  ;;  %v5421_v51 = vor.u32 %v7053_v41, %v5420_v2  ;;  %v6993_v53 = vld [vmem:[#allocation4 + $0x1a4] sm:$0xf0]  ;;  %v7215_v41 = vld [vmem:[#allocation4 + $0x894] sm:$0xf0] }
 0x1c5   :  { %2668 = vmatpush.bf16.msrb.mxu0 %v5801_v57  ;;  %2681 = vmatpush.bf16.msrb.mxu1 %v5993_v58  ;;  %v5277_v57 = vor.u32 %v7017_v50, %v5276_v46  ;;  %v5060_v58 = vld [vmem:[#allocation4 + $0xa0] sm:$0xf]  ;;  %v4988_v46 = vld [vmem:[#allocation4 + $0x10] sm:$0xf]  ;;  %v6945_v50 = vld [vmem:[#allocation4 + $0x24] sm:$0xf0]  ;;  %v5181_v0 = vor.u32 %v6993_v53, %v5180_v14 }
 0x1c6   :  { %v5061_v11 = vor.u32 %v6963_v60, %v5060_v58  ;;  %v7227_v58 = vld [vmem:[#allocation4 + $0x8f4] sm:$0xf0]  ;;  %v5396_v60 = vld [vmem:[#allocation4 + $0x340] sm:$0xf]  ;;  %v4989_v63 = vor.u32 %v6945_v50, %v4988_v46  ;;  %v5852_v46 = vld [vmem:[#allocation4 + $0x6d0] sm:$0xf] }
 0x1c7   :  { %2644 = vmatpush.bf16.msra.mxu2 %v5369_v6  ;;  %2657 = vmatpush.bf16.msra.mxu3 %v5561_v7  ;;  %v5660_v6 = vld [vmem:[#allocation4 + $0x550] sm:$0xf]  ;;  %v7113_v7 = vld [vmem:[#allocation4 + $0x564] sm:$0xf0] }
 0x1c8   :  { %v5661_v18 = vor.u32 %v7113_v7, %v5660_v6  ;;  %v5900_v6 = vld [vmem:[#allocation4 + $0x730] sm:$0xf]  ;;  %v7173_v7 = vld [vmem:[#allocation4 + $0x744] sm:$0xf0] }
 0x1c9   :  { %2669 = vmatpush.bf16.msrb.mxu0 %v5777_v13  ;;  %2682 = vmatpush.bf16.msrb.mxu1 %v5969_v15  ;;  %v5036_v13 = vld [vmem:[#allocation4 + $0x70] sm:$0xf]  ;;  %v6957_v15 = vld [vmem:[#allocation4 + $0x84] sm:$0xf0] }
 0x1ca   :  { %2645 = vmatmul.bf16.vlgmr.msra.gmra.mxu2 %v7849_v54  ;;  %2658 = vmatmul.bf16.vlgmr.msra.gmra.mxu3 %v7851_v59  ;;  %v7161_v50 = vld [vmem:[#allocation4 + $0x6e4] sm:$0xf0] }
 0x1cb   :  { %2689 = vmatpush.bf16.msrb.mxu2 %v5157_v8  ;;  %2702 = vmatpush.bf16.msrb.mxu3 %v5349_v9 }
 0x1cc   :  { %v2386_v3 = vpop.f32.mrf.mxu2  ;;  %v2399_v4 = vpop.f32.mrf.mxu3 }
 0x1cd   :  { %2670 = vmatpush.bf16.msrb.mxu0 %v5753_v32  ;;  %2683 = vmatpush.bf16.msrb.mxu1 %v5945_v33  ;;  %v2387_v8 = vadd.f32 %v2386_v3, %v925_v55  ;;  %v2412_v9 = vpop.f32.mrf.mxu0  ;;  %v2425_v10 = vpop.f32.mrf.mxu1  ;;  %v5229_v32 = vor.u32 %v7005_v21, %v5228_v20  ;;  %v5012_v33 = vld [vmem:[#allocation4 + $0x40] sm:$0xf]  ;;  %v926_v3 = vperm.slane %v7879_v47, 1  ;;  %v6984_v20 = vld [vmem:[#allocation4 + $0x164] sm:$0xf] }
 0x1ce   :  { %v5924_v55 = vld [vmem:[#allocation4 + $0x760] sm:$0xf] }
 0x1cf   :  { %2690 = vmatpush.bf16.msrb.mxu2 %v5133_v28  ;;  %2703 = vmatpush.bf16.msrb.mxu3 %v5325_v29  ;;  %v2400_v16 = vadd.f32 %v2399_v4, %v2387_v8  ;;  %v5037_v29 = vor.u32 %v6957_v15, %v5036_v13  ;;  %v6092_v8 = vld [vmem:[#allocation4 + $0x8b0] sm:$0xf]  ;;  %v7041_v13 = vld [vmem:[#allocation4 + $0x324] sm:$0xf0] }
 0x1d0   :  { %2671 = vmatmul.bf16.vlgmr.msrb.gmra.mxu0 %v7857_v26  ;;  %2684 = vmatmul.bf16.vlgmr.msrb.gmra.mxu1 %v7859_v27 }
 0x1d1   :  { %2715 = vmatpush.bf16.msra.mxu0 %v5541_v19  ;;  %2728 = vmatpush.bf16.msra.mxu1 %v5733_v36  ;;  %v2413_v28 = vadd.f32 %v2412_v9, %v2400_v16  ;;  %v5445_v19 = vor.u32 %v7059_v23, %v5444_v22  ;;  %v5637_v36 = vor.u32 %v7107_v25, %v5636_v24  ;;  %v5158_v24 = vld [vmem:[#allocation4 + $0x178] sm:$0xf0]  ;;  %v7032_v25 = vld [vmem:[#allocation4 + $0x2e4] sm:$0xf] }
 0x1d3   :  { %2691 = vmatpush.bf16.msrb.mxu2 %v5109_v42  ;;  %2704 = vmatpush.bf16.msrb.mxu3 %v5301_v43  ;;  %v2426_v35 = vadd.f32 %v2425_v10, %v2413_v28  ;;  %v5612_v42 = vld [vmem:[#allocation4 + $0x4f0] sm:$0xf]  ;;  %v7101_v43 = vld [vmem:[#allocation4 + $0x504] sm:$0xf0]  ;;  %v5350_v28 = vld [vmem:[#allocation4 + $0x2f8] sm:$0xf0] }
 0x1d4   :  { %v2388_v39 = vpop.f32.mrf.mxu2  ;;  %v2401_v40 = vpop.f32.mrf.mxu3  ;;  %v5613_v52 = vor.u32 %v7101_v43, %v5612_v42  ;;  %v6978_v42 = vld [vmem:[#allocation4 + $0x134] sm:$0xf]  ;;  %v5134_v43 = vld [vmem:[#allocation4 + $0x148] sm:$0xf0] }
 0x1d5   :  { %2716 = vmatpush.bf16.msra.mxu0 %v5517_v48  ;;  %2729 = vmatpush.bf16.msra.mxu1 %v5709_v49  ;;  %v2414_v44 = vpop.f32.mrf.mxu0  ;;  %v2427_v45 = vpop.f32.mrf.mxu1  ;;  %v5013_v48 = vor.u32 %v6951_v34, %v5012_v33  ;;  %v5205_v49 = vor.u32 %v6999_v38, %v5204_v37  ;;  %v5876_v37 = vld [vmem:[#allocation4 + $0x700] sm:$0xf]  ;;  %v7167_v38 = vld [vmem:[#allocation4 + $0x714] sm:$0xf0]  ;;  %v5353_v39 = vor.u32 %v7032_v25, %v5350_v28  ;;  %v6960_v25 = vld [vmem:[#allocation4 + $0xa4] sm:$0xf] }
 0x1d6   :  { %v6068_v40 = vld [vmem:[#allocation4 + $0x880] sm:$0xf]  ;;  %v7026_v44 = vld [vmem:[#allocation4 + $0x2b4] sm:$0xf]  ;;  %v5326_v45 = vld [vmem:[#allocation4 + $0x2c8] sm:$0xf0] }
 0x1d7   :  { %2692 = vmatpush.bf16.msrb.mxu2 %v5085_v56  ;;  %2705 = vmatpush.bf16.msrb.mxu3 %v5277_v57  ;;  %v7179_v56 = vld [vmem:[#allocation4 + $0x774] sm:$0xf0]  ;;  %v6116_v57 = vld [vmem:[#allocation4 + $0x8e0] sm:$0xf]  ;;  %v5329_v53 = vor.u32 %v7026_v44, %v5326_v45  ;;  %v6954_v45 = vld [vmem:[#allocation4 + $0x74] sm:$0xf] }
 0x1d8   :  { %v5925_v4 = vor.u32 %v7179_v56, %v5924_v55  ;;  %v6117_v5 = vor.u32 %v7227_v58, %v6116_v57  ;;  %v6044_v55 = vld [vmem:[#allocation4 + $0x850] sm:$0xf]  ;;  %v7209_v56 = vld [vmem:[#allocation4 + $0x864] sm:$0xf0]  ;;  %v6972_v57 = vld [vmem:[#allocation4 + $0x104] sm:$0xf] }
 0x1d9   :  { %2717 = vmatpush.bf16.msra.mxu0 %v5493_v31  ;;  %2730 = vmatpush.bf16.msra.mxu1 %v5685_v62  ;;  %v7047_v31 = vld [vmem:[#allocation4 + $0x354] sm:$0xf0]  ;;  %v5588_v62 = vld [vmem:[#allocation4 + $0x4c0] sm:$0xf] }
 0x1da   :  { %v5397_v9 = vor.u32 %v7047_v31, %v5396_v60  ;;  %v5589_v10 = vor.u32 %v7095_v61, %v5588_v62  ;;  %v5110_v31 = vld [vmem:[#allocation4 + $0x118] sm:$0xf0]  ;;  %v7020_v62 = vld [vmem:[#allocation4 + $0x284] sm:$0xf]  ;;  %v7191_v44 = vld [vmem:[#allocation4 + $0x7d4] sm:$0xf0] }
 0x1db   :  { %2693 = vmatpush.bf16.msrb.mxu2 %v5061_v11  ;;  %2706 = vmatpush.bf16.msrb.mxu3 %v5253_v12  ;;  %v7221_v11 = vld [vmem:[#allocation4 + $0x8c4] sm:$0xf0]  ;;  %v5372_v12 = vld [vmem:[#allocation4 + $0x310] sm:$0xf]  ;;  %v5302_v61 = vld [vmem:[#allocation4 + $0x298] sm:$0xf0] }
 0x1dc   :  { %v6093_v33 = vor.u32 %v7221_v11, %v6092_v8  ;;  %v7203_v8 = vld [vmem:[#allocation4 + $0x834] sm:$0xf0]  ;;  %v7014_v11 = vld [vmem:[#allocation4 + $0x254] sm:$0xf] }
 0x1dd   :  { %2718 = vmatpush.bf16.msra.mxu0 %v5469_v17  ;;  %2731 = vmatpush.bf16.msra.mxu1 %v5661_v18  ;;  %v2438_v15 = vpop.f32.mrf.mxu2  ;;  %v2451_v16 = vpop.f32.mrf.mxu3  ;;  %v5564_v17 = vld [vmem:[#allocation4 + $0x490] sm:$0xf]  ;;  %v7089_v18 = vld [vmem:[#allocation4 + $0x4a4] sm:$0xf0] }
 0x1de   :  { %v2439_v21 = vadd.f32 %v2438_v15, %v2426_v35  ;;  %v2464_v22 = vpop.f32.mrf.mxu0  ;;  %v2477_v23 = vpop.f32.mrf.mxu1  ;;  %v5161_v35 = vor.u32 %v6984_v20, %v5158_v24  ;;  %v7197_v24 = vld [vmem:[#allocation4 + $0x804] sm:$0xf0] }
 0x1df   :  { %2694 = vmatpush.bf16.msrb.mxu2 %v5037_v29  ;;  %2707 = vmatpush.bf16.msrb.mxu3 %v5229_v32  ;;  %v2465_v29 = vadd.f32 %v2464_v22, %v926_v3  ;;  %v5901_v32 = vor.u32 %v7173_v7, %v5900_v6  ;;  %v5828_v3 = vld [vmem:[#allocation4 + $0x6a0] sm:$0xf]  ;;  %v5305_v6 = vor.u32 %v7020_v62, %v5302_v61  ;;  %v7080_v62 = vld [vmem:[#allocation4 + $0x464] sm:$0xf]  ;;  %v5542_v61 = vld [vmem:[#allocation4 + $0x478] sm:$0xf0] }
 0x1e0   :  { %v7885_v34 = vadd.f32 %v2451_v16, %v2439_v21  ;;  %v6020_v7 = vld [vmem:[#allocation4 + $0x820] sm:$0xf]  ;;  %v5804_v16 = vld [vmem:[#allocation4 + $0x670] sm:$0xf] }
 0x1e1   :  { %2719 = vmatpush.bf16.msra.mxu0 %v5445_v19  ;;  %2732 = vmatpush.bf16.msra.mxu1 %v5637_v36  ;;  %v5373_v19 = vor.u32 %v7041_v13, %v5372_v12  ;;  %v5565_v36 = vor.u32 %v7089_v18, %v5564_v17  ;;  %v7887_v2 = vadd.f32 %v2477_v23, %v2465_v29  ;;  %v5278_v12 = vld [vmem:[#allocation4 + $0x268] sm:$0xf0]  ;;  %v7149_v17 = vld [vmem:[#allocation4 + $0x684] sm:$0xf0]  ;;  %v5996_v23 = vld [vmem:[#allocation4 + $0x7f0] sm:$0xf] }
 0x1e2   :  { %v6021_v15 = vor.u32 %v7203_v8, %v6020_v7  ;;  %v5281_v22 = vor.u32 %v7014_v11, %v5278_v12  ;;  %v6996_v7 = vld [vmem:[#allocation4 + $0x1c4] sm:$0xf]  ;;  %v5206_v8 = vld [vmem:[#allocation4 + $0x1d8] sm:$0xf0]  ;;  %v5545_v11 = vor.u32 %v7080_v62, %v5542_v61 }
 0x1e3   :  { %2695 = vmatpush.bf16.msrb.mxu2 %v5013_v48  ;;  %2708 = vmatpush.bf16.msrb.mxu3 %v5205_v49  ;;  %v5877_v48 = vor.u32 %v7167_v38, %v5876_v37  ;;  %v6069_v49 = vor.u32 %v7215_v41, %v6068_v40  ;;  %v5805_v38 = vor.u32 %v7149_v17, %v5804_v16  ;;  %v7143_v40 = vld [vmem:[#allocation4 + $0x654] sm:$0xf0]  ;;  %v7122_v16 = vld [vmem:[#allocation4 + $0x5b4] sm:$0xf]  ;;  %v7056_v61 = vld [vmem:[#allocation4 + $0x3a4] sm:$0xf] }
 0x1e5   :  { %2720 = vmatpush.bf16.msra.mxu0 %v5421_v51  ;;  %2733 = vmatpush.bf16.msra.mxu1 %v5613_v52  ;;  %v2440_v14 = vpop.f32.mrf.mxu2  ;;  %v2453_v51 = vpop.f32.mrf.mxu3  ;;  %v5137_v52 = vor.u32 %v6978_v42, %v5134_v43  ;;  %v5972_v43 = vld [vmem:[#allocation4 + $0x7c0] sm:$0xf] }
 0x1e6   :  { %v2466_v58 = vpop.f32.mrf.mxu0  ;;  %v2479_v60 = vpop.f32.mrf.mxu1  ;;  %v5973_v51 = vor.u32 %v7191_v44, %v5972_v43  ;;  %v7170_v43 = vld [vmem:[#allocation4 + $0x734] sm:$0xf]  ;;  %v5902_v44 = vld [vmem:[#allocation4 + $0x748] sm:$0xf0] }
 0x1e7   :  { %2696 = vmatpush.bf16.msrb.mxu2 %v4989_v63  ;;  %2709 = vmatpush.bf16.msrb.mxu3 %v5181_v0  ;;  %v5853_v63 = vor.u32 %v7161_v50, %v5852_v46  ;;  %v6045_v0 = vor.u32 %v7209_v56, %v6044_v55  ;;  %v5230_v46 = vld [vmem:[#allocation4 + $0x208] sm:$0xf0]  ;;  %v5948_v55 = vld [vmem:[#allocation4 + $0x790] sm:$0xf] }
 0x1e9   :  { %2721 = vmatpush.bf16.msra.mxu0 %v5397_v9  ;;  %2734 = vmatpush.bf16.msra.mxu1 %v5589_v10  ;;  %v6966_v9 = vld [vmem:[#allocation4 + $0xd4] sm:$0xf]  ;;  %v5086_v10 = vld [vmem:[#allocation4 + $0xe8] sm:$0xf0] }
 0x1ea   :  { %2697 = vmatmul.bf16.vlgmr.msrb.gmra.mxu2 %v7841_v1  ;;  %2710 = vmatmul.bf16.vlgmr.msrb.gmra.mxu3 %v7843_v30  ;;  %v5089_v21 = vor.u32 %v6966_v9, %v5086_v10 }
 0x1eb   :  { %2741 = vmatpush.bf16.msra.mxu2 %v5925_v4  ;;  %2754 = vmatpush.bf16.msra.mxu3 %v6117_v5  ;;  %v7155_v4 = vld [vmem:[#allocation4 + $0x6b4] sm:$0xf0]  ;;  %v5113_v5 = vor.u32 %v6972_v57, %v5110_v31  ;;  %v7185_v31 = vld [vmem:[#allocation4 + $0x7a4] sm:$0xf0] }
 0x1ec   :  { %v5829_v13 = vor.u32 %v7155_v4, %v5828_v3  ;;  %v7128_v3 = vld [vmem:[#allocation4 + $0x5e4] sm:$0xf]  ;;  %v5734_v4 = vld [vmem:[#allocation4 + $0x5f8] sm:$0xf0]  ;;  %v5949_v10 = vor.u32 %v7185_v31, %v5948_v55  ;;  %v5662_v55 = vld [vmem:[#allocation4 + $0x568] sm:$0xf0] }
 0x1ed   :  { %2722 = vmatpush.bf16.msra.mxu0 %v5373_v19  ;;  %2735 = vmatpush.bf16.msra.mxu1 %v5565_v36  ;;  %v2490_v18 = vpop.f32.mrf.mxu2  ;;  %v2503_v20 = vpop.f32.mrf.mxu3  ;;  %v7008_v19 = vld [vmem:[#allocation4 + $0x224] sm:$0xf]  ;;  %v5254_v36 = vld [vmem:[#allocation4 + $0x238] sm:$0xf0]  ;;  %v5737_v12 = vor.u32 %v7128_v3, %v5734_v4 }
 0x1ee   :  { %v2491_v28 = vadd.f32 %v2490_v18, %v7887_v2  ;;  %v2516_v29 = vpop.f32.mrf.mxu0  ;;  %v5257_v42 = vor.u32 %v7008_v19, %v5254_v36  ;;  %v5209_v18 = vor.u32 %v6996_v7, %v5206_v8  ;;  %v7158_v7 = vld [vmem:[#allocation4 + $0x6d4] sm:$0xf]  ;;  %v5854_v8 = vld [vmem:[#allocation4 + $0x6e8] sm:$0xf0] }
 0x1ef   :  { %2742 = vmatpush.bf16.msra.mxu2 %v5901_v32  ;;  %2755 = vmatpush.bf16.msra.mxu3 %v6093_v33  ;;  %v2529_v32 = vpop.f32.mrf.mxu1  ;;  %v5062_v33 = vld [vmem:[#allocation4 + $0xb8] sm:$0xf0] }
 0x1f0   :  { %2723 = vmatmul.bf16.vlgmr.msra.gmra.mxu0 %v7849_v54  ;;  %2736 = vmatmul.bf16.vlgmr.msra.gmra.mxu1 %v7851_v59  ;;  %v2504_v37 = vadd.f32 %v2503_v20, %v2491_v28  ;;  %v5065_v41 = vor.u32 %v6960_v25, %v5062_v33  ;;  %v5710_v20 = vld [vmem:[#allocation4 + $0x5c8] sm:$0xf0]  ;;  %v7176_v25 = vld [vmem:[#allocation4 + $0x764] sm:$0xf]  ;;  %v5926_v28 = vld [vmem:[#allocation4 + $0x778] sm:$0xf0] }
 0x1f1   :  { %2767 = vmatpush.bf16.msrb.mxu0 %v5161_v35  ;;  %2780 = vmatpush.bf16.msrb.mxu1 %v5353_v39  ;;  %v5997_v35 = vor.u32 %v7197_v24, %v5996_v23  ;;  %v5780_v39 = vld [vmem:[#allocation4 + $0x640] sm:$0xf]  ;;  %v6990_v23 = vld [vmem:[#allocation4 + $0x194] sm:$0xf]  ;;  %v5182_v24 = vld [vmem:[#allocation4 + $0x1a8] sm:$0xf0]  ;;  %v5713_v19 = vor.u32 %v7122_v16, %v5710_v20  ;;  %v5857_v20 = vor.u32 %v7158_v7, %v5854_v8 }
 0x1f2   :  { %v2517_v2 = vadd.f32 %v2516_v29, %v2504_v37  ;;  %v5781_v14 = vor.u32 %v7143_v40, %v5780_v39  ;;  %v7224_v29 = vld [vmem:[#allocation4 + $0x8e4] sm:$0xf]  ;;  %v5185_v37 = vor.u32 %v6990_v23, %v5182_v24  ;;  %v5929_v39 = vor.u32 %v7176_v25, %v5926_v28  ;;  %v5614_v23 = vld [vmem:[#allocation4 + $0x508] sm:$0xf0]  ;;  %v5830_v25 = vld [vmem:[#allocation4 + $0x6b8] sm:$0xf0] }
 0x1f3   :  { %2743 = vmatpush.bf16.msra.mxu2 %v5877_v48  ;;  %2756 = vmatpush.bf16.msra.mxu3 %v6069_v49  ;;  %v5038_v48 = vld [vmem:[#allocation4 + $0x88] sm:$0xf0]  ;;  %v7002_v49 = vld [vmem:[#allocation4 + $0x1f4] sm:$0xf]  ;;  %v7152_v24 = vld [vmem:[#allocation4 + $0x6a4] sm:$0xf] }
 0x1f4   :  { %v7894_v50 = vadd.f32 %v2529_v32, %v2517_v2  ;;  %v5041_v58 = vor.u32 %v6954_v45, %v5038_v48  ;;  %v5233_v60 = vor.u32 %v7002_v49, %v5230_v46  ;;  %v6118_v32 = vld [vmem:[#allocation4 + $0x8f8] sm:$0xf0]  ;;  %v7218_v45 = vld [vmem:[#allocation4 + $0x8b4] sm:$0xf]  ;;  %v6094_v2 = vld [vmem:[#allocation4 + $0x8c8] sm:$0xf0] }
 0x1f5   :  { %2768 = vmatpush.bf16.msrb.mxu0 %v5137_v52  ;;  %2781 = vmatpush.bf16.msrb.mxu1 %v5329_v53  ;;  %v5756_v52 = vld [vmem:[#allocation4 + $0x610] sm:$0xf]  ;;  %v7137_v53 = vld [vmem:[#allocation4 + $0x624] sm:$0xf0]  ;;  %v2492_v56 = vpop.f32.mrf.mxu2  ;;  %v2505_v57 = vpop.f32.mrf.mxu3  ;;  %v6121_v40 = vor.u32 %v7224_v29, %v6118_v32  ;;  %v7062_v46 = vld [vmem:[#allocation4 + $0x3d4] sm:$0xf] }
 0x1f6   :  { %v5757_v9 = vor.u32 %v7137_v53, %v5756_v52  ;;  %v6097_v52 = vor.u32 %v7218_v45, %v6094_v2  ;;  %v7110_v53 = vld [vmem:[#allocation4 + $0x554] sm:$0xf]  ;;  %v7164_v56 = vld [vmem:[#allocation4 + $0x704] sm:$0xf]  ;;  %v5878_v57 = vld [vmem:[#allocation4 + $0x718] sm:$0xf0]  ;;  %7467 = vtanh.f32 %v7894_v50 }
 0x1f7   :  { %2744 = vmatpush.bf16.msra.mxu2 %v5853_v63  ;;  %2757 = vmatpush.bf16.msra.mxu3 %v6045_v0  ;;  %v2518_v63 = vpop.f32.mrf.mxu0  ;;  %v2531_v0 = vpop.f32.mrf.mxu1  ;;  %v5665_v62 = vor.u32 %v7110_v53, %v5662_v55  ;;  %v5881_v3 = vor.u32 %v7164_v56, %v5878_v57  ;;  %v7200_v28 = vld [vmem:[#allocation4 + $0x824] sm:$0xf]  ;;  %v6022_v29 = vld [vmem:[#allocation4 + $0x838] sm:$0xf0]  ;;  %v5998_v45 = vld [vmem:[#allocation4 + $0x808] sm:$0xf0]  ;;  %7469 = vtanh.f32 %v7885_v34 }
 0x1f8   :  { %v5446_v63 = vld [vmem:[#allocation4 + $0x3b8] sm:$0xf0]  ;;  %v7104_v0 = vld [vmem:[#allocation4 + $0x524] sm:$0xf]  ;;  %v5758_v7 = vld [vmem:[#allocation4 + $0x628] sm:$0xf0] }
 0x1f9   :  { %2769 = vmatpush.bf16.msrb.mxu0 %v5113_v5  ;;  %2782 = vmatpush.bf16.msrb.mxu1 %v5305_v6  ;;  %v6948_v5 = vld [vmem:[#allocation4 + $0x44] sm:$0xf]  ;;  %v5014_v6 = vld [vmem:[#allocation4 + $0x58] sm:$0xf0]  ;;  %v7182_v8 = vld [vmem:[#allocation4 + $0x794] sm:$0xf] }
 0x1fa   :  { %v5017_v17 = vor.u32 %v6948_v5, %v5014_v6  ;;  %v5638_v5 = vld [vmem:[#allocation4 + $0x538] sm:$0xf0]  ;;  %v927_v6 = vperm.slane %v7879_v47, 2 }
 0x1fb   :  { %2745 = vmatpush.bf16.msra.mxu2 %v5829_v13  ;;  %2758 = vmatpush.bf16.msra.mxu3 %v6021_v15  ;;  %v7074_v13 = vld [vmem:[#allocation4 + $0x434] sm:$0xf]  ;;  %v5518_v15 = vld [vmem:[#allocation4 + $0x448] sm:$0xf0] }
 0x1fc   :  { %v5521_v33 = vor.u32 %v7074_v13, %v5518_v15  ;;  %v7050_v13 = vld [vmem:[#allocation4 + $0x374] sm:$0xf]  ;;  %v5422_v15 = vld [vmem:[#allocation4 + $0x388] sm:$0xf0] }
 0x1fd   :  { %2770 = vmatpush.bf16.msrb.mxu0 %v5089_v21  ;;  %2783 = vmatpush.bf16.msrb.mxu1 %v5281_v22  ;;  %v6942_v21 = vld [vmem:[#allocation4 + $0x14] sm:$0xf]  ;;  %v4990_v22 = vld [vmem:[#allocation4 + $0x28] sm:$0xf0] }
 0x1fe   :  { %v4993_v36 = vor.u32 %v6942_v21, %v4990_v22  ;;  %v7098_v22 = vld [vmem:[#allocation4 + $0x4f4] sm:$0xf] }
 0x1ff   :  { %2746 = vmatpush.bf16.msra.mxu2 %v5805_v38  ;;  %2759 = vmatpush.bf16.msra.mxu3 %v5997_v35  ;;  %v7068_v38 = vld [vmem:[#allocation4 + $0x404] sm:$0xf]  ;;  %v5494_v35 = vld [vmem:[#allocation4 + $0x418] sm:$0xf0] }
 0x200   :  { %v5497_v48 = vor.u32 %v7068_v38, %v5494_v35  ;;  %v5833_v35 = vor.u32 %v7152_v24, %v5830_v25 }
 0x201   :  { %2771 = vmatpush.bf16.msrb.mxu0 %v5065_v41  ;;  %2784 = vmatpush.bf16.msrb.mxu1 %v5257_v42  ;;  %v7116_v41 = vld [vmem:[#allocation4 + $0x584] sm:$0xf]  ;;  %v5686_v42 = vld [vmem:[#allocation4 + $0x598] sm:$0xf0] }
 0x202   :  { %v5689_v49 = vor.u32 %v7116_v41, %v5686_v42  ;;  %v5590_v41 = vld [vmem:[#allocation4 + $0x4d8] sm:$0xf0]  ;;  %v7146_v42 = vld [vmem:[#allocation4 + $0x674] sm:$0xf] }
 0x203   :  { %2747 = vmatpush.bf16.msra.mxu2 %v5781_v14  ;;  %2760 = vmatpush.bf16.msra.mxu3 %v5973_v51  ;;  %v5470_v14 = vld [vmem:[#allocation4 + $0x3e8] sm:$0xf0]  ;;  %v5905_v51 = vor.u32 %v7170_v43, %v5902_v44  ;;  %v7194_v44 = vld [vmem:[#allocation4 + $0x7f4] sm:$0xf] }
 0x204   :  { %v5473_v31 = vor.u32 %v7062_v46, %v5470_v14  ;;  %v5806_v43 = vld [vmem:[#allocation4 + $0x688] sm:$0xf0]  ;;  %v6001_v57 = vor.u32 %v7194_v44, %v5998_v45 }
 0x205   :  { %2772 = vmatpush.bf16.msrb.mxu0 %v5041_v58  ;;  %2785 = vmatpush.bf16.msrb.mxu1 %v5233_v60  ;;  %v7212_v58 = vld [vmem:[#allocation4 + $0x884] sm:$0xf]  ;;  %v6070_v60 = vld [vmem:[#allocation4 + $0x898] sm:$0xf0]  ;;  %v5809_v56 = vor.u32 %v7146_v42, %v5806_v43 }
 0x206   :  { %v6073_v4 = vor.u32 %v7212_v58, %v6070_v60  ;;  %v7086_v58 = vld [vmem:[#allocation4 + $0x494] sm:$0xf]  ;;  %v5566_v60 = vld [vmem:[#allocation4 + $0x4a8] sm:$0xf0] }
 0x207   :  { %2748 = vmatpush.bf16.msra.mxu2 %v5757_v9  ;;  %2761 = vmatpush.bf16.msra.mxu3 %v5949_v10  ;;  %v7206_v9 = vld [vmem:[#allocation4 + $0x854] sm:$0xf]  ;;  %v5641_v10 = vor.u32 %v7104_v0, %v5638_v5 }
 0x209   :  { %2773 = vmatpush.bf16.msrb.mxu0 %v5017_v17  ;;  %2786 = vmatpush.bf16.msrb.mxu1 %v5209_v18 }
 0x20a   :  { %2749 = vmatmul.bf16.vlgmr.msra.gmra.mxu2 %v7857_v26  ;;  %2762 = vmatmul.bf16.vlgmr.msra.gmra.mxu3 %v7859_v27 }
 0x20b   :  { %2793 = vmatpush.bf16.msrb.mxu2 %v5545_v11  ;;  %2806 = vmatpush.bf16.msrb.mxu3 %v5737_v12 }
 0x20d   :  { %2774 = vmatpush.bf16.msrb.mxu0 %v4993_v36  ;;  %2787 = vmatpush.bf16.msrb.mxu1 %v5185_v37  ;;  %v2542_v11 = vpop.f32.mrf.mxu2  ;;  %v2555_v12 = vpop.f32.mrf.mxu3  ;;  %v7044_v36 = vld [vmem:[#allocation4 + $0x344] sm:$0xf]  ;;  %v5398_v37 = vld [vmem:[#allocation4 + $0x358] sm:$0xf0] }
 0x20e   :  { %v2543_v16 = vadd.f32 %v2542_v11, %v927_v6  ;;  %v2568_v17 = vpop.f32.mrf.mxu0  ;;  %v2581_v18 = vpop.f32.mrf.mxu1  ;;  %v7134_v6 = vld [vmem:[#allocation4 + $0x614] sm:$0xf] }
 0x20f   :  { %2794 = vmatpush.bf16.msrb.mxu2 %v5521_v33  ;;  %2807 = vmatpush.bf16.msrb.mxu3 %v5713_v19  ;;  %v5425_v33 = vor.u32 %v7050_v13, %v5422_v15  ;;  %v5617_v19 = vor.u32 %v7098_v22, %v5614_v23 }
 0x210   :  { %2775 = vmatmul.bf16.vlgmr.msrb.gmra.mxu0 %v7841_v1  ;;  %2788 = vmatmul.bf16.vlgmr.msrb.gmra.mxu1 %v7843_v30  ;;  %v6046_v1 = vld [vmem:[#allocation4 + $0x868] sm:$0xf0]  ;;  %v5449_v30 = vor.u32 %v7056_v61, %v5446_v63  ;;  %v2556_v32 = vadd.f32 %v2555_v12, %v2543_v16  ;;  %v7188_v61 = vld [vmem:[#allocation4 + $0x7c4] sm:$0xf]  ;;  %v5974_v63 = vld [vmem:[#allocation4 + $0x7d8] sm:$0xf0] }
 0x211   :  { %2819 = vmatpush.bf16.msra.mxu0 %v5929_v39  ;;  %2832 = vmatpush.bf16.msra.mxu1 %v6121_v40  ;;  %v6049_v21 = vor.u32 %v7206_v9, %v6046_v1  ;;  %v6025_v39 = vor.u32 %v7200_v28, %v6022_v29  ;;  %v7092_v40 = vld [vmem:[#allocation4 + $0x4c4] sm:$0xf]  ;;  %v5977_v5 = vor.u32 %v7188_v61, %v5974_v63  ;;  %v5950_v9 = vld [vmem:[#allocation4 + $0x7a8] sm:$0xf0]  ;;  %v7274_v63 = vld [vmem:[#allocation7 + $0x170] sm:$0xf0] }
 0x212   :  { %v2569_v38 = vadd.f32 %v2568_v17, %v2556_v32  ;;  %v5761_v1 = vor.u32 %v7134_v6, %v5758_v7  ;;  %v6496_v6 = vld [vmem:[#allocation7 + $0x2e8] sm:$0xf]  ;;  %v7322_v7 = vld [vmem:[#allocation7 + $0x2f0] sm:$0xf0] }
 0x213   :  { %2795 = vmatpush.bf16.msrb.mxu2 %v5497_v48  ;;  %2808 = vmatpush.bf16.msrb.mxu3 %v5689_v49  ;;  %v5401_v48 = vor.u32 %v7044_v36, %v5398_v37  ;;  %v5593_v49 = vor.u32 %v7092_v40, %v5590_v41 }
 0x214   :  { %v2582_v2 = vadd.f32 %v2581_v18, %v2569_v38 }
 0x215   :  { %2820 = vmatpush.bf16.msra.mxu0 %v5905_v51  ;;  %2833 = vmatpush.bf16.msra.mxu1 %v6097_v52  ;;  %v2544_v46 = vpop.f32.mrf.mxu2  ;;  %v2557_v14 = vpop.f32.mrf.mxu3  ;;  %v7038_v51 = vld [vmem:[#allocation4 + $0x314] sm:$0xf]  ;;  %v5374_v52 = vld [vmem:[#allocation4 + $0x328] sm:$0xf0] }
 0x216   :  { %v2570_v53 = vpop.f32.mrf.mxu0  ;;  %v2583_v55 = vpop.f32.mrf.mxu1  ;;  %v5377_v0 = vor.u32 %v7038_v51, %v5374_v52  ;;  %v929_v46 = vperm.slane %v7879_v47, 4 }
 0x217   :  { %2796 = vmatpush.bf16.msrb.mxu2 %v5473_v31  ;;  %2809 = vmatpush.bf16.msrb.mxu3 %v5665_v62  ;;  %v7140_v31 = vld [vmem:[#allocation4 + $0x644] sm:$0xf]  ;;  %v5782_v62 = vld [vmem:[#allocation4 + $0x658] sm:$0xf0] }
 0x219   :  { %2821 = vmatpush.bf16.msra.mxu0 %v5881_v3  ;;  %2834 = vmatpush.bf16.msra.mxu1 %v6073_v4  ;;  %v5569_v3 = vor.u32 %v7086_v58, %v5566_v60  ;;  %v5785_v4 = vor.u32 %v7140_v31, %v5782_v62  ;;  %v6208_v58 = vld [vmem:[#allocation7 + $0xa8] sm:$0xf]  ;;  %v7250_v60 = vld [vmem:[#allocation7 + $0xb0] sm:$0xf0] }
 0x21a   :  { %v6304_v31 = vld [vmem:[#allocation7 + $0x168] sm:$0xf]  ;;  %v6209_v61 = vor.u32 %v7250_v60, %v6208_v58  ;;  %v7262_v58 = vld [vmem:[#allocation7 + $0x110] sm:$0xf0] }
 0x21b   :  { %2797 = vmatpush.bf16.msrb.mxu2 %v5449_v30  ;;  %2810 = vmatpush.bf16.msrb.mxu3 %v5641_v10  ;;  %v5953_v30 = vor.u32 %v7182_v8, %v5950_v9  ;;  %v928_v10 = vperm.slane %v7879_v47, 3  ;;  %v6196_v8 = vld [vmem:[#allocation7 + $0x90] sm:$0xf]  ;;  %v6497_v9 = vor.u32 %v7322_v7, %v6496_v6  ;;  %v7286_v60 = vld [vmem:[#allocation7 + $0x1d0] sm:$0xf0] }
 0x21c   :  { %v6148_v6 = vld [vmem:[#allocation7 + $0x30] sm:$0xf]  ;;  %v7235_v7 = vld [vmem:[#allocation7 + $0x38] sm:$0xf0] }
 0x21d   :  { %2822 = vmatpush.bf16.msra.mxu0 %v5857_v20  ;;  %2835 = vmatpush.bf16.msra.mxu1 %v6049_v21 }
 0x21f   :  { %2798 = vmatpush.bf16.msrb.mxu2 %v5425_v33  ;;  %2811 = vmatpush.bf16.msrb.mxu3 %v5617_v19 }
 0x221   :  { %2823 = vmatpush.bf16.msra.mxu0 %v5833_v35  ;;  %2836 = vmatpush.bf16.msra.mxu1 %v6025_v39 }
 0x223   :  { %2799 = vmatpush.bf16.msrb.mxu2 %v5401_v48  ;;  %2812 = vmatpush.bf16.msrb.mxu3 %v5593_v49 }
 0x225   :  { %2824 = vmatpush.bf16.msra.mxu0 %v5809_v56  ;;  %2837 = vmatpush.bf16.msra.mxu1 %v6001_v57  ;;  %v930_v57 = vperm.slane %v7879_v47, 5 }
 0x227   :  { %2800 = vmatpush.bf16.msrb.mxu2 %v5377_v0  ;;  %2813 = vmatpush.bf16.msrb.mxu3 %v5569_v3  ;;  %v6400_v0 = vld [vmem:[#allocation7 + $0x228] sm:$0xf]  ;;  %v7298_v3 = vld [vmem:[#allocation7 + $0x230] sm:$0xf0] }
 0x229   :  { %2825 = vmatpush.bf16.msra.mxu0 %v5785_v4  ;;  %2838 = vmatpush.bf16.msra.mxu1 %v5977_v5  ;;  %v6305_v4 = vor.u32 %v7274_v63, %v6304_v31  ;;  %v6401_v5 = vor.u32 %v7298_v3, %v6400_v0  ;;  %v7922_v31 = vpop.eup %7467 }
 0x22a   :  { %2801 = vmatmul.bf16.vlgmr.msrb.gmra.mxu2 %v7849_v54  ;;  %2814 = vmatmul.bf16.vlgmr.msrb.gmra.mxu3 %v7851_v59  ;;  %v7924_v63 = vpop.eup %7469 }
 0x22b   :  { %3900 = vmatpush.bf16.msra.mxu2 %v6209_v61  ;;  %3913 = vmatpush.bf16.msra.mxu3 %v6305_v4  ;;  %v7310_v61 = vld [vmem:[#allocation7 + $0x290] sm:$0xf0] }
 0x22d   :  { %2826 = vmatpush.bf16.msra.mxu0 %v5761_v1  ;;  %2839 = vmatpush.bf16.msra.mxu1 %v5953_v30  ;;  %v2594_v11 = vpop.f32.mrf.mxu2  ;;  %v2607_v12 = vpop.f32.mrf.mxu3  ;;  %v7247_v1 = vld [vmem:[#allocation7 + $0x98] sm:$0xf0]  ;;  %v6292_v30 = vld [vmem:[#allocation7 + $0x150] sm:$0xf] }
 0x22e   :  { %v2595_v13 = vadd.f32 %v2594_v11, %v2582_v2  ;;  %v2620_v15 = vpop.f32.mrf.mxu0  ;;  %v2633_v16 = vpop.f32.mrf.mxu1  ;;  %v6197_v47 = vor.u32 %v7247_v1, %v6196_v8  ;;  %v6244_v8 = vld [vmem:[#allocation7 + $0xf0] sm:$0xf] }
 0x22f   :  { %v2621_v17 = vadd.f32 %v2620_v15, %v928_v10  ;;  %v7271_v10 = vld [vmem:[#allocation7 + $0x158] sm:$0xf0]  ;;  %v6484_v15 = vld [vmem:[#allocation7 + $0x2d0] sm:$0xf] }
 0x230   :  { %2827 = vmatmul.bf16.vlgmr.msra.gmra.mxu0 %v7857_v26  ;;  %2840 = vmatmul.bf16.vlgmr.msra.gmra.mxu1 %v7859_v27  ;;  %v7906_v18 = vadd.f32 %v2607_v12, %v2595_v13  ;;  %v6293_v11 = vor.u32 %v7271_v10, %v6292_v30  ;;  %v6388_v12 = vld [vmem:[#allocation7 + $0x210] sm:$0xf]  ;;  %v7295_v13 = vld [vmem:[#allocation7 + $0x218] sm:$0xf0] }
 0x231   :  { %v2634_v20 = vadd.f32 %v2633_v16, %v2621_v17  ;;  %3926 = vmatpush.bf16.msrb.mxu0 %v6401_v5  ;;  %3939 = vmatpush.bf16.msrb.mxu1 %v6497_v9  ;;  %v6389_v17 = vor.u32 %v7295_v13, %v6388_v12  ;;  %v2852_v9 = vmul.f32 %v7922_v31, %v7922_v31  ;;  %v7259_v10 = vld [vmem:[#allocation7 + $0xf8] sm:$0xf0]  ;;  %v6436_v12 = vld [vmem:[#allocation7 + $0x270] sm:$0xf] }
 0x232   :  { %3901 = vmatpush.bf16.msra.mxu2 %v6197_v47  ;;  %3914 = vmatpush.bf16.msra.mxu3 %v6293_v11  ;;  %7471 = vtanh.f32 %v7906_v18  ;;  %v6340_v47 = vld [vmem:[#allocation7 + $0x1b0] sm:$0xf]  ;;  %v7283_v11 = vld [vmem:[#allocation7 + $0x1b8] sm:$0xf0] }
 0x233   :  { %v7307_v13 = vld [vmem:[#allocation7 + $0x278] sm:$0xf0] }
 0x235   :  { %v2596_v54 = vpop.f32.mrf.mxu2  ;;  %v2609_v21 = vpop.f32.mrf.mxu3  ;;  %3927 = vmatpush.bf16.msrb.mxu0 %v6389_v17 }
 0x236   :  { %v2622_v59 = vpop.f32.mrf.mxu0  ;;  %v2635_v22 = vpop.f32.mrf.mxu1  ;;  %v6184_v54 = vld [vmem:[#allocation7 + $0x78] sm:$0xf]  ;;  %v7244_v21 = vld [vmem:[#allocation7 + $0x80] sm:$0xf0] }
 0x237   :  { %v6280_v22 = vld [vmem:[#allocation7 + $0x138] sm:$0xf] }
 0x238   :  { %v7926_v4 = vpop.eup %7471 }
 0x239   :  { %v2853_v17 = vmul.f32 %v7926_v4, %v7926_v4 }
 0x24d   :  { %v2646_v23 = vpop.f32.mrf.mxu2  ;;  %v2659_v24 = vpop.f32.mrf.mxu3 }
 0x24e   :  { %v2647_v26 = vadd.f32 %v2646_v23, %v2634_v20  ;;  %v2672_v25 = vpop.f32.mrf.mxu0  ;;  %v2685_v27 = vpop.f32.mrf.mxu1  ;;  %v7319_v20 = vld [vmem:[#allocation7 + $0x2d8] sm:$0xf0]  ;;  %v7268_v23 = vld [vmem:[#allocation7 + $0x140] sm:$0xf0] }
 0x24f   :  { %v6485_v59 = vor.u32 %v7319_v20, %v6484_v15 }
 0x250   :  { %v2660_v28 = vadd.f32 %v2659_v24, %v2647_v26  ;;  %v6376_v24 = vld [vmem:[#allocation7 + $0x1f8] sm:$0xf] }
 0x251   :  { %3940 = vmatpush.bf16.msrb.mxu1 %v6485_v59  ;;  %v6149_v59 = vor.u32 %v7235_v7, %v6148_v6 }
 0x252   :  { %v2673_v29 = vadd.f32 %v2672_v25, %v2660_v28  ;;  %v7292_v28 = vld [vmem:[#allocation7 + $0x200] sm:$0xf0] }
 0x254   :  { %v7908_v32 = vadd.f32 %v2685_v27, %v2673_v29  ;;  %v6185_v27 = vor.u32 %v7244_v21, %v6184_v54  ;;  %v6472_v29 = vld [vmem:[#allocation7 + $0x2b8] sm:$0xf] }
 0x255   :  { %v2648_v33 = vpop.f32.mrf.mxu2  ;;  %v2661_v19 = vpop.f32.mrf.mxu3 }
 0x256   :  { %v2674_v36 = vpop.f32.mrf.mxu0  ;;  %v2687_v37 = vpop.f32.mrf.mxu1  ;;  %v7316_v33 = vld [vmem:[#allocation7 + $0x2c0] sm:$0xf0]  ;;  %v6281_v19 = vor.u32 %v7268_v23, %v6280_v22  ;;  %3902 = vmatpush.bf16.msra.mxu2 %v6185_v27  ;;  %7473 = vtanh.f32 %v7908_v32 }
 0x257   :  { %v6377_v36 = vor.u32 %v7292_v28, %v6376_v24  ;;  %v6172_v37 = vld [vmem:[#allocation7 + $0x60] sm:$0xf]  ;;  %v6245_v24 = vor.u32 %v7259_v10, %v6244_v8  ;;  %v7232_v27 = vld [vmem:[#allocation7 + $0x20] sm:$0xf0]  ;;  %v6232_v28 = vld [vmem:[#allocation7 + $0xd8] sm:$0xf] }
 0x258   :  { %3915 = vmatpush.bf16.msra.mxu3 %v6281_v19  ;;  %v6437_v19 = vor.u32 %v7307_v13, %v6436_v12  ;;  %v7249_v8 = vld [vmem:[#allocation7 + $0xac] sm:$0xf]  ;;  %v6306_v10 = vld [vmem:[#allocation7 + $0x174] sm:$0xf0] }
 0x259   :  { %3928 = vmatpush.bf16.msrb.mxu0 %v6377_v36  ;;  %v7256_v36 = vld [vmem:[#allocation7 + $0xe0] sm:$0xf0] }
 0x25c   :  { %v7930_v15 = vpop.eup %7473 }
 0x26d   :  { %v2698_v38 = vpop.f32.mrf.mxu2  ;;  %v2711_v35 = vpop.f32.mrf.mxu3 }
 0x26e   :  { %v2724_v39 = vpop.f32.mrf.mxu0  ;;  %v2737_v40 = vpop.f32.mrf.mxu1  ;;  %v2699_v55 = vadd.f32 %v2698_v38, %v929_v46  ;;  %v7241_v38 = vld [vmem:[#allocation7 + $0x68] sm:$0xf0] }
 0x270   :  { %v2712_v56 = vadd.f32 %v2711_v35, %v2699_v55  ;;  %v6268_v35 = vld [vmem:[#allocation7 + $0x120] sm:$0xf]  ;;  %v6160_v55 = vld [vmem:[#allocation7 + $0x48] sm:$0xf] }
 0x272   :  { %v2725_v62 = vadd.f32 %v2724_v39, %v2712_v56  ;;  %v6473_v39 = vor.u32 %v7316_v33, %v6472_v29  ;;  %v7238_v56 = vld [vmem:[#allocation7 + $0x50] sm:$0xf0] }
 0x273   :  { %v6161_v3 = vor.u32 %v7238_v56, %v6160_v55  ;;  %v6220_v55 = vld [vmem:[#allocation7 + $0xc0] sm:$0xf] }
 0x274   :  { %v2738_v16 = vadd.f32 %v2737_v40, %v2725_v62  ;;  %v7265_v40 = vld [vmem:[#allocation7 + $0x128] sm:$0xf0]  ;;  %3941 = vmatpush.bf16.msrb.mxu1 %v6473_v39  ;;  %v6448_v62 = vld [vmem:[#allocation7 + $0x288] sm:$0xf]  ;;  %v6424_v39 = vld [vmem:[#allocation7 + $0x258] sm:$0xf] }
 0x275   :  { %v2700_v41 = vpop.f32.mrf.mxu2  ;;  %v2713_v42 = vpop.f32.mrf.mxu3  ;;  %v6269_v34 = vor.u32 %v7265_v40, %v6268_v35  ;;  %v6449_v30 = vor.u32 %v7310_v61, %v6448_v62  ;;  %v2854_v35 = vmul.f32 %v7930_v15, %v7930_v15  ;;  %v7304_v40 = vld [vmem:[#allocation7 + $0x260] sm:$0xf0]  ;;  %v7301_v62 = vld [vmem:[#allocation7 + $0x248] sm:$0xf0]  ;;  %v6592_v61 = vld [vmem:[#allocation7 + $0x3a8] sm:$0xf] }
 0x276   :  { %v2726_v43 = vpop.f32.mrf.mxu0  ;;  %v2739_v44 = vpop.f32.mrf.mxu1  ;;  %v6364_v41 = vld [vmem:[#allocation7 + $0x1e0] sm:$0xf]  ;;  %v7289_v42 = vld [vmem:[#allocation7 + $0x1e8] sm:$0xf0] }
 0x277   :  { %v6460_v43 = vld [vmem:[#allocation7 + $0x2a0] sm:$0xf]  ;;  %v7313_v44 = vld [vmem:[#allocation7 + $0x2a8] sm:$0xf0]  ;;  %3916 = vmatpush.bf16.msra.mxu3 %v6269_v34 }
 0x278   :  { %v6124_v34 = vld [vmem:[#allocation7] sm:$0xf] }
 0x28d   :  { %v2750_v45 = vpop.f32.mrf.mxu2  ;;  %v7910_v2 = vpop.f32.mrf.mxu3 }
 0x28e   :  { %v2776_v48 = vpop.f32.mrf.mxu0  ;;  %v7912_v49 = vpop.f32.mrf.mxu1  ;;  %v2751_v26 = vadd.f32 %v2750_v45, %v2738_v16  ;;  %v2851_v16 = vmul.f32 %v7924_v63, %v7924_v63 }
 0x28f   :  { %v2777_v25 = vadd.f32 %v2776_v48, %v930_v57  ;;  %v6256_v57 = vld [vmem:[#allocation7 + $0x108] sm:$0xf] }
 0x290   :  { %v2764_v50 = vadd.f32 %v7910_v2, %v2751_v26  ;;  %v6461_v2 = vor.u32 %v7313_v44, %v6460_v43  ;;  %v6257_v32 = vor.u32 %v7262_v58, %v6256_v57  ;;  %v6341_v26 = vor.u32 %v7283_v11, %v6340_v47  ;;  %v7253_v57 = vld [vmem:[#allocation7 + $0xc8] sm:$0xf0]  ;;  %v6580_v47 = vld [vmem:[#allocation7 + $0x390] sm:$0xf]  ;;  %v7343_v11 = vld [vmem:[#allocation7 + $0x398] sm:$0xf0] }
 0x291   :  { %v2790_v45 = vadd.f32 %v7912_v49, %v2777_v25  ;;  %v6352_v49 = vld [vmem:[#allocation7 + $0x1c8] sm:$0xf]  ;;  %v6136_v25 = vld [vmem:[#allocation7 + $0x18] sm:$0xf]  ;;  %v2857_v33 = vadd.f32 %v2852_v9, %v2851_v16  ;;  %v6233_v44 = vor.u32 %v7256_v36, %v6232_v28  ;;  %v6221_v58 = vor.u32 %v7253_v57, %v6220_v55  ;;  %v6676_v16 = vld [vmem:[#allocation7 + $0x450] sm:$0xf] }
 0x292   :  { %7475 = vtanh.f32 %v2764_v50  ;;  %v6353_v5 = vor.u32 %v7286_v60, %v6352_v49  ;;  %3942 = vmatpush.bf16.msrb.mxu1 %v6461_v2  ;;  %3917 = vmatpush.bf16.msra.mxu3 %v6257_v32  ;;  %v7277_v2 = vld [vmem:[#allocation7 + $0x188] sm:$0xf0]  ;;  %v6412_v60 = vld [vmem:[#allocation7 + $0x240] sm:$0xf]  ;;  %v6688_v32 = vld [vmem:[#allocation7 + $0x468] sm:$0xf]  ;;  %v6581_v13 = vor.u32 %v7343_v11, %v6580_v47 }
 0x293   :  { %v6210_v9 = vld [vmem:[#allocation7 + $0xb4] sm:$0xf0]  ;;  %v6186_v36 = vld [vmem:[#allocation7 + $0x84] sm:$0xf0]  ;;  %v7258_v47 = vld [vmem:[#allocation7 + $0xf4] sm:$0xf] }
 0x294   :  { %v6544_v55 = vld [vmem:[#allocation7 + $0x348] sm:$0xf]  ;;  %v6246_v11 = vld [vmem:[#allocation7 + $0xfc] sm:$0xf0] }
 0x295   :  { %v2752_v14 = vpop.f32.mrf.mxu2  ;;  %v2765_v51 = vpop.f32.mrf.mxu3  ;;  %v6640_v57 = vld [vmem:[#allocation7 + $0x408] sm:$0xf] }
 0x296   :  { %v2778_v52 = vpop.f32.mrf.mxu0  ;;  %v2791_v53 = vpop.f32.mrf.mxu1  ;;  %v6173_v14 = vor.u32 %v7241_v38, %v6172_v37  ;;  %3943 = vmatpush.bf16.msrb.mxu1 %v6449_v30  ;;  %v6328_v37 = vld [vmem:[#allocation7 + $0x198] sm:$0xf]  ;;  %v7280_v38 = vld [vmem:[#allocation7 + $0x1a0] sm:$0xf0]  ;;  %3918 = vmatpush.bf16.msra.mxu3 %v6245_v24  ;;  %v6213_v30 = vor.u32 %v7249_v8, %v6210_v9  ;;  %v7355_v8 = vld [vmem:[#allocation7 + $0x3f8] sm:$0xf0] }
 0x297   :  { %v6365_v53 = vor.u32 %v7289_v42, %v6364_v41  ;;  %v2858_v41 = vadd.f32 %v2857_v33, %v2853_v17  ;;  %v6137_v42 = vor.u32 %v7232_v27, %v6136_v25  ;;  %v6329_v50 = vor.u32 %v7280_v38, %v6328_v37  ;;  %v7367_v17 = vld [vmem:[#allocation7 + $0x458] sm:$0xf0]  ;;  %v7340_v25 = vld [vmem:[#allocation7 + $0x380] sm:$0xf0]  ;;  %v6664_v27 = vld [vmem:[#allocation7 + $0x438] sm:$0xf] }
 0x298   :  { %3903 = vmatpush.bf16.msra.mxu2 %v6173_v14  ;;  %v7936_v29 = vpop.eup %7475  ;;  %v7364_v33 = vld [vmem:[#allocation7 + $0x440] sm:$0xf0]  ;;  %v7234_v9 = vld [vmem:[#allocation7 + $0x34] sm:$0xf] }
 0x299   :  { %3929 = vmatpush.bf16.msrb.mxu0 %v6365_v53  ;;  %v2855_v43 = vmul.f32 %v7936_v29, %v7936_v29  ;;  %v7229_v53 = vld [vmem:[#allocation7 + $0x8] sm:$0xf0]  ;;  %v6665_v37 = vor.u32 %v7364_v33, %v6664_v27  ;;  %v6508_v27 = vld [vmem:[#allocation7 + $0x300] sm:$0xf] }
 0x29a   :  { %3944 = vmatpush.bf16.msrb.mxu1 %v6437_v19  ;;  %3919 = vmatpush.bf16.msra.mxu3 %v6233_v44  ;;  %v6125_v56 = vor.u32 %v7229_v53, %v6124_v34  ;;  %v7243_v19 = vld [vmem:[#allocation7 + $0x7c] sm:$0xf]  ;;  %v6270_v34 = vld [vmem:[#allocation7 + $0x12c] sm:$0xf0]  ;;  %v6604_v33 = vld [vmem:[#allocation7 + $0x3c0] sm:$0xf] }
 0x29b   :  { %v6189_v38 = vor.u32 %v7243_v19, %v6186_v36 }
 0x29c   :  { %3904 = vmatpush.bf16.msra.mxu2 %v6161_v3  ;;  %v7346_v3 = vld [vmem:[#allocation7 + $0x3b0] sm:$0xf0] }
 0x29d   :  { %3930 = vmatpush.bf16.msrb.mxu0 %v6353_v5  ;;  %v7370_v5 = vld [vmem:[#allocation7 + $0x470] sm:$0xf0]  ;;  %v6593_v6 = vor.u32 %v7346_v3, %v6592_v61  ;;  %v7261_v61 = vld [vmem:[#allocation7 + $0x10c] sm:$0xf] }
 0x29e   :  { %3920 = vmatpush.bf16.msra.mxu3 %v6221_v58  ;;  %v6689_v7 = vor.u32 %v7370_v5, %v6688_v32  ;;  %v7237_v58 = vld [vmem:[#allocation7 + $0x4c] sm:$0xf]  ;;  %v6532_v32 = vld [vmem:[#allocation7 + $0x330] sm:$0xf]  ;;  %v7331_v5 = vld [vmem:[#allocation7 + $0x338] sm:$0xf0] }
 0x2a0   :  { %3905 = vmatpush.bf16.msra.mxu2 %v6149_v59  ;;  %v7270_v59 = vld [vmem:[#allocation7 + $0x154] sm:$0xf] }
 0x2a1   :  { %3931 = vmatpush.bf16.msrb.mxu0 %v6341_v26  ;;  %v6568_v26 = vld [vmem:[#allocation7 + $0x378] sm:$0xf] }
 0x2a2   :  { %3965 = vmatpush.bf16.msrb.mxu3 %v6689_v7  ;;  %v6569_v28 = vor.u32 %v7340_v25, %v6568_v26  ;;  %v6533_v7 = vor.u32 %v7331_v5, %v6532_v32  ;;  %v6234_v26 = vld [vmem:[#allocation7 + $0xe4] sm:$0xf0]  ;;  %v6594_v5 = vld [vmem:[#allocation7 + $0x3b4] sm:$0xf0] }
 0x2a4   :  { %3906 = vmatpush.bf16.msra.mxu2 %v6137_v42  ;;  %v7337_v42 = vld [vmem:[#allocation7 + $0x368] sm:$0xf0] }
 0x2a5   :  { %3932 = vmatpush.bf16.msrb.mxu0 %v6329_v50  ;;  %v7361_v50 = vld [vmem:[#allocation7 + $0x428] sm:$0xf0] }
 0x2a8   :  { %3907 = vmatpush.bf16.msra.mxu2 %v6125_v56  ;;  %v7334_v56 = vld [vmem:[#allocation7 + $0x350] sm:$0xf0] }
 0x2ac   :  { %3952 = vmatpush.bf16.msrb.mxu2 %v6593_v6  ;;  %v6628_v6 = vld [vmem:[#allocation7 + $0x3f0] sm:$0xf] }
 0x2ad   :  { %v2828_v48 = vpop.f32.mrf.mxu0  ;;  %v2841_v46 = vpop.f32.mrf.mxu1 }
 0x2ae   :  { %v2802_v51 = vpop.f32.mrf.mxu2  ;;  %v2815_v52 = vpop.f32.mrf.mxu3 }
 0x2af   :  { %v2803_v18 = vadd.f32 %v2802_v51, %v2790_v45  ;;  %v6425_v45 = vor.u32 %v7304_v40, %v6424_v39  ;;  %v6282_v39 = vld [vmem:[#allocation7 + $0x144] sm:$0xf0] }
 0x2b0   :  { %3953 = vmatpush.bf16.msrb.mxu2 %v6581_v13  ;;  %v6520_v13 = vld [vmem:[#allocation7 + $0x318] sm:$0xf] }
 0x2b1   :  { %v2816_v0 = vadd.f32 %v2815_v52, %v2803_v18  ;;  %3945 = vmatpush.bf16.msrb.mxu1 %v6425_v45  ;;  %v6316_v18 = vld [vmem:[#allocation7 + $0x180] sm:$0xf]  ;;  %v7240_v45 = vld [vmem:[#allocation7 + $0x64] sm:$0xf] }
 0x2b2   :  { %v6317_v49 = vor.u32 %v7277_v2, %v6316_v18  ;;  %v6545_v18 = vor.u32 %v7334_v56, %v6544_v55  ;;  %v7358_v2 = vld [vmem:[#allocation7 + $0x410] sm:$0xf0]  ;;  %v7297_v56 = vld [vmem:[#allocation7 + $0x22c] sm:$0xf] }
 0x2b3   :  { %v2829_v1 = vadd.f32 %v2828_v48, %v2816_v0  ;;  %v2859_v48 = vadd.f32 %v2858_v41, %v2854_v35  ;;  %v6413_v0 = vor.u32 %v7301_v62, %v6412_v60  ;;  %v7267_v35 = vld [vmem:[#allocation7 + $0x13c] sm:$0xf]  ;;  %v6556_v41 = vld [vmem:[#allocation7 + $0x360] sm:$0xf]  ;;  %v6641_v60 = vor.u32 %v7358_v2, %v6640_v57 }
 0x2b4   :  { %3933 = vmatpush.bf16.msrb.mxu0 %v6317_v49  ;;  %v6285_v40 = vor.u32 %v7267_v35, %v6282_v39  ;;  %3954 = vmatpush.bf16.msrb.mxu2 %v6569_v28  ;;  %v6557_v44 = vor.u32 %v7337_v42, %v6556_v41  ;;  %v6162_v49 = vld [vmem:[#allocation7 + $0x54] sm:$0xf0]  ;;  %v7325_v28 = vld [vmem:[#allocation7 + $0x308] sm:$0xf0]  ;;  %v6126_v35 = vld [vmem:[#allocation7 + $0xc] sm:$0xf0] }
 0x2b5   :  { %v2842_v20 = vadd.f32 %v2841_v46, %v2829_v1  ;;  %v2830_v54 = vpop.f32.mrf.mxu0  ;;  %v2843_v21 = vpop.f32.mrf.mxu1  ;;  %v2860_v51 = vadd.f32 %v2859_v48, %v2855_v43  ;;  %v7273_v1 = vld [vmem:[#allocation7 + $0x16c] sm:$0xf]  ;;  %3946 = vmatpush.bf16.msrb.mxu1 %v6413_v0  ;;  %v6652_v43 = vld [vmem:[#allocation7 + $0x420] sm:$0xf]  ;;  %v6174_v48 = vld [vmem:[#allocation7 + $0x6c] sm:$0xf0]  ;;  %v6165_v62 = vor.u32 %v7237_v58, %v6162_v49  ;;  %v6509_v36 = vor.u32 %v7325_v28, %v6508_v27 }
 0x2b6   :  { %v2804_v22 = vpop.f32.mrf.mxu2  ;;  %v2817_v23 = vpop.f32.mrf.mxu3  ;;  %v6309_v12 = vor.u32 %v7273_v1, %v6306_v10  ;;  %v6677_v54 = vor.u32 %v7367_v17, %v6676_v16  ;;  %v6198_v21 = vld [vmem:[#allocation7 + $0x9c] sm:$0xf0]  ;;  %v6258_v0 = vld [vmem:[#allocation7 + $0x114] sm:$0xf0]  ;;  %v7328_v16 = vld [vmem:[#allocation7 + $0x320] sm:$0xf0] }
 0x2b7   :  { %7477 = vtanh.f32 %v2842_v20  ;;  %v7246_v20 = vld [vmem:[#allocation7 + $0x94] sm:$0xf]  ;;  %v6294_v22 = vld [vmem:[#allocation7 + $0x15c] sm:$0xf0]  ;;  %v6261_v3 = vor.u32 %v7261_v61, %v6258_v0  ;;  %v6616_v17 = vld [vmem:[#allocation7 + $0x3d8] sm:$0xf] }
 0x2b8   :  { %3978 = vmatpush.bf16.msra.mxu0 %v6213_v30  ;;  %v6201_v23 = vor.u32 %v7246_v20, %v6198_v21  ;;  %v6297_v24 = vor.u32 %v7270_v59, %v6294_v22  ;;  %3966 = vmatpush.bf16.msrb.mxu3 %v6677_v54  ;;  %v6150_v1 = vld [vmem:[#allocation7 + $0x3c] sm:$0xf0]  ;;  %v6629_v30 = vor.u32 %v7355_v8, %v6628_v6  ;;  %v7352_v54 = vld [vmem:[#allocation7 + $0x3e0] sm:$0xf0]  ;;  %v7231_v21 = vld [vmem:[#allocation7 + $0x1c] sm:$0xf] }
 0x2b9   :  { %3991 = vmatpush.bf16.msra.mxu1 %v6309_v12  ;;  %3955 = vmatpush.bf16.msrb.mxu2 %v6557_v44  ;;  %v6153_v10 = vor.u32 %v7234_v9, %v6150_v1  ;;  %v6249_v12 = vor.u32 %v7258_v47, %v6246_v11  ;;  %v6521_v20 = vor.u32 %v7328_v16, %v6520_v13  ;;  %v6138_v59 = vld [vmem:[#allocation7 + $0x24] sm:$0xf0]  ;;  %v7252_v42 = vld [vmem:[#allocation7 + $0xc4] sm:$0xf]  ;;  %v6402_v58 = vld [vmem:[#allocation7 + $0x234] sm:$0xf0] }
 0x2ba   :  { %v6617_v22 = vor.u32 %v7352_v54, %v6616_v17  ;;  %v7321_v49 = vld [vmem:[#allocation7 + $0x2ec] sm:$0xf]  ;;  %v6405_v9 = vor.u32 %v7297_v56, %v6402_v58  ;;  %v7294_v11 = vld [vmem:[#allocation7 + $0x214] sm:$0xf]  ;;  %v6486_v54 = vld [vmem:[#allocation7 + $0x2dc] sm:$0xf0] }
 0x2bb   :  { %v7369_v6 = vld [vmem:[#allocation7 + $0x46c] sm:$0xf]  ;;  %v6378_v27 = vld [vmem:[#allocation7 + $0x204] sm:$0xf0] }
 0x2bc   :  { %3979 = vmatpush.bf16.msra.mxu0 %v6201_v23  ;;  %3967 = vmatpush.bf16.msrb.mxu3 %v6665_v37  ;;  %v6141_v23 = vor.u32 %v7231_v21, %v6138_v59  ;;  %v7349_v37 = vld [vmem:[#allocation7 + $0x3c8] sm:$0xf0]  ;;  %v7342_v21 = vld [vmem:[#allocation7 + $0x394] sm:$0xf]  ;;  %v6582_v59 = vld [vmem:[#allocation7 + $0x39c] sm:$0xf0] }
 0x2bd   :  { %v7942_v46 = vpop.eup %7477  ;;  %3992 = vmatpush.bf16.msra.mxu1 %v6297_v24  ;;  %3956 = vmatpush.bf16.msrb.mxu2 %v6545_v18  ;;  %v7255_v24 = vld [vmem:[#allocation7 + $0xdc] sm:$0xf]  ;;  %v6585_v28 = vor.u32 %v7342_v21, %v6582_v59 }
 0x2be   :  { %v2856_v14 = vmul.f32 %v7942_v46, %v7942_v46  ;;  %v6237_v25 = vor.u32 %v7255_v24, %v6234_v26  ;;  %v7279_v59 = vld [vmem:[#allocation7 + $0x19c] sm:$0xf] }
 0x2c0   :  { %v2861_v52 = vadd.f32 %v2860_v51, %v2856_v14  ;;  %3980 = vmatpush.bf16.msra.mxu0 %v6189_v38  ;;  %v6653_v14 = vor.u32 %v7361_v50, %v6652_v43  ;;  %v6177_v51 = vor.u32 %v7240_v45, %v6174_v48  ;;  %v7228_v38 = vld [vmem:[#allocation7 + $0x4] sm:$0xf]  ;;  %v6222_v43 = vld [vmem:[#allocation7 + $0xcc] sm:$0xf0] }
 0x2c1   :  { %3993 = vmatpush.bf16.msra.mxu1 %v6285_v40  ;;  %3957 = vmatpush.bf16.msrb.mxu2 %v6533_v7  ;;  %v6605_v40 = vor.u32 %v7349_v37, %v6604_v33  ;;  %v6129_v41 = vor.u32 %v7228_v38, %v6126_v35  ;;  %v6225_v44 = vor.u32 %v7252_v42, %v6222_v43  ;;  %v6690_v7 = vld [vmem:[#allocation7 + $0x474] sm:$0xf0]  ;;  %v7339_v37 = vld [vmem:[#allocation7 + $0x37c] sm:$0xf]  ;;  %v6570_v38 = vld [vmem:[#allocation7 + $0x384] sm:$0xf0] }
 0x2c2   :  { %2862 = vadd.xlane.f32.xlu0 %v2861_v52  ;;  %v7264_v52 = vld [vmem:[#allocation7 + $0x124] sm:$0xf]  ;;  %3968 = vmatpush.bf16.msrb.mxu3 %v6653_v14  ;;  %v6693_v17 = vor.u32 %v7369_v6, %v6690_v7  ;;  %v7363_v35 = vld [vmem:[#allocation7 + $0x43c] sm:$0xf]  ;;  %v6366_v43 = vld [vmem:[#allocation7 + $0x1ec] sm:$0xf0] }
 0x2c3   :  { %v6273_v53 = vor.u32 %v7264_v52, %v6270_v34  ;;  %v7288_v42 = vld [vmem:[#allocation7 + $0x1e4] sm:$0xf]  ;;  %v7282_v6 = vld [vmem:[#allocation7 + $0x1b4] sm:$0xf]  ;;  %v6342_v7 = vld [vmem:[#allocation7 + $0x1bc] sm:$0xf0] }
 0x2c4   :  { %3981 = vmatpush.bf16.msra.mxu0 %v6177_v51 }
 0x2c5   :  { %3994 = vmatpush.bf16.msra.mxu1 %v6273_v53  ;;  %3958 = vmatpush.bf16.msrb.mxu2 %v6521_v20  ;;  %v7318_v20 = vld [vmem:[#allocation7 + $0x2d4] sm:$0xf] }
 0x2c6   :  { %3969 = vmatpush.bf16.msrb.mxu3 %v6641_v60  ;;  %v6498_v60 = vld [vmem:[#allocation7 + $0x2f4] sm:$0xf0]  ;;  %v6489_v26 = vor.u32 %v7318_v20, %v6486_v54  ;;  %v6630_v20 = vld [vmem:[#allocation7 + $0x3fc] sm:$0xf0]  ;;  %v6345_v54 = vor.u32 %v7282_v6, %v6342_v7  ;;  %v7320_v6 = vld [vmem:[#allocation7 + $0x2e0] sm:$0xf0] }
 0x2c7   :  { %v6501_v1 = vor.u32 %v7321_v49, %v6498_v60  ;;  %v7285_v49 = vld [vmem:[#allocation7 + $0x1cc] sm:$0xf]  ;;  %v6354_v60 = vld [vmem:[#allocation7 + $0x1d4] sm:$0xf0] }
 0x2c8   :  { %3982 = vmatpush.bf16.msra.mxu0 %v6165_v62 }
 0x2c9   :  { %3995 = vmatpush.bf16.msra.mxu1 %v6261_v3  ;;  %3959 = vmatpush.bf16.msrb.mxu2 %v6509_v36  ;;  %v7345_v3 = vld [vmem:[#allocation7 + $0x3ac] sm:$0xf]  ;;  %v6474_v36 = vld [vmem:[#allocation7 + $0x2c4] sm:$0xf0] }
 0x2ca   :  { %3970 = vmatpush.bf16.msrb.mxu3 %v6629_v30  ;;  %v6597_v16 = vor.u32 %v7345_v3, %v6594_v5  ;;  %v7309_v3 = vld [vmem:[#allocation7 + $0x28c] sm:$0xf] }
 0x2cc   :  { %3983 = vmatpush.bf16.msra.mxu0 %v6153_v10 }
 0x2cd   :  { %3996 = vmatpush.bf16.msra.mxu1 %v6249_v12  ;;  %v6390_v12 = vld [vmem:[#allocation7 + $0x21c] sm:$0xf0] }
 0x2ce   :  { %3971 = vmatpush.bf16.msrb.mxu3 %v6617_v22  ;;  %v7366_v22 = vld [vmem:[#allocation7 + $0x454] sm:$0xf]  ;;  %v6393_v24 = vor.u32 %v7294_v11, %v6390_v12  ;;  %v6438_v11 = vld [vmem:[#allocation7 + $0x27c] sm:$0xf0] }
 0x2cf   :  { %v7330_v12 = vld [vmem:[#allocation7 + $0x334] sm:$0xf] }
 0x2d0   :  { %3984 = vmatpush.bf16.msra.mxu0 %v6141_v23  ;;  %v6678_v23 = vld [vmem:[#allocation7 + $0x45c] sm:$0xf0] }
 0x2d1   :  { %3997 = vmatpush.bf16.msra.mxu1 %v6237_v25  ;;  %v7291_v25 = vld [vmem:[#allocation7 + $0x1fc] sm:$0xf]  ;;  %v6681_v33 = vor.u32 %v7366_v22, %v6678_v23  ;;  %v6330_v22 = vld [vmem:[#allocation7 + $0x1a4] sm:$0xf0] }
 0x2d2   :  { %3972 = vmatpush.bf16.msrb.mxu3 %v6605_v40  ;;  %v6381_v40 = vor.u32 %v7291_v25, %v6378_v27  ;;  %v6426_v25 = vld [vmem:[#allocation7 + $0x264] sm:$0xf0]  ;;  %v7327_v27 = vld [vmem:[#allocation7 + $0x31c] sm:$0xf] }
 0x2d4   :  { %3985 = vmatpush.bf16.msra.mxu0 %v6129_v41 }
 0x2d5   :  { %3998 = vmatpush.bf16.msra.mxu1 %v6225_v44  ;;  %v6573_v44 = vor.u32 %v7339_v37, %v6570_v38  ;;  %v6333_v37 = vor.u32 %v7279_v59, %v6330_v22  ;;  %v7317_v59 = vld [vmem:[#allocation7 + $0x2c8] sm:$0xf0] }
 0x335   :  { %v2863_v19 = vpop.xlane.xlu0 %2862 }
 0x336   :  { %v2864_v39 = vmax.f32 %v2863_v19, 1e-30 }
 0x338   :  { %7479 = vrsqrt.f32 %v2864_v39  ;;  %vm2871_vm9 = vweird.f32 %v2864_v39 }
 0x33e   :  { %v7480_v50 = vpop.eup %7479 }
 0x33f   :  { %v2866_v45 = vmul.f32 %v7480_v50, %v2864_v39  ;;  %vm2872_vm8 = vweird.f32 %v7480_v50 }
 0x340   :  { %vm2873_vm10 = vmor %vm2871_vm9, %vm2872_vm8 }
 0x341   :  { %v2867_v48 = vmul.f32 %v7480_v50, %v2866_v45  ;;  %v7312_v45 = vld [vmem:[#allocation7 + $0x2a4] sm:$0xf] }
 0x343   :  { %v2868_v14 = vmul.f32 0.5, %v2867_v48  ;;  %v6462_v48 = vld [vmem:[#allocation7 + $0x2ac] sm:$0xf0] }
 0x345   :  { %v2869_v51 = vsub.f32 1.5, %v2868_v14  ;;  %v7336_v14 = vld [vmem:[#allocation7 + $0x364] sm:$0xf] }
 0x347   :  { %v2870_v52 = vmul.f32 %v7480_v50, %v2869_v51  ;;  %v6558_v51 = vld [vmem:[#allocation7 + $0x36c] sm:$0xf0] }
 0x349   :  { %v7946_v34 = vsel %vm2873_vm10, %v7480_v50, %v2870_v52  ;;  %v7360_v52 = vld [vmem:[#allocation7 + $0x424] sm:$0xf] }
 0x34a   :  { %v2875_v53 = vmul.f32 %v7946_v34, %v2864_v39  ;;  %v2890_v55 = vmul.f32 %v7946_v34, %v2863_v19  ;;  %v2877_v57 = vmul.f32 %v7924_v63, %v7946_v34  ;;  %v2878_v18 = vmul.f32 %v7922_v31, %v7946_v34  ;;  %v7315_v19 = vld [vmem:[#allocation7 + $0x2bc] sm:$0xf]  ;;  %v6666_v39 = vld [vmem:[#allocation7 + $0x444] sm:$0xf0] }
 0x34b   :  { %v2879_v2 = vmul.f32 %v7926_v4, %v7946_v34  ;;  %v2880_v0 = vmul.f32 %v7930_v15, %v7946_v34  ;;  %v6477_v41 = vor.u32 %v7315_v19, %v6474_v36  ;;  %v6669_v50 = vor.u32 %v7363_v35, %v6666_v39  ;;  %v6618_v19 = vld [vmem:[#allocation7 + $0x3e4] sm:$0xf0]  ;;  %v7276_v36 = vld [vmem:[#allocation7 + $0x184] sm:$0xf]  ;;  %v6318_v35 = vld [vmem:[#allocation7 + $0x18c] sm:$0xf0] }
 0x34c   :  { %7481 = vtanh.f32 %v2875_v53  ;;  %v2891_v61 = vmul.f32 %v2890_v55, %v7946_v34  ;;  %v6654_v53 = vld [vmem:[#allocation7 + $0x42c] sm:$0xf0]  ;;  %v2881_v55 = vmul.f32 %v7936_v29, %v7946_v34  ;;  %v2882_v56 = vmul.f32 %v7942_v46, %v7946_v34  ;;  %v7333_v29 = vld [vmem:[#allocation7 + $0x34c] sm:$0xf]  ;;  %v6642_v46 = vld [vmem:[#allocation7 + $0x414] sm:$0xf0] }
 0x34d   :  { %v6357_v34 = vor.u32 %v7285_v49, %v6354_v60  ;;  %v7300_v39 = vld [vmem:[#allocation7 + $0x244] sm:$0xf] }
 0x352   :  { %v7956_v62 = vpop.eup %7481 }
 0x353   :  { %v2889_v63 = vmul.f32 %v7956_v62, %v7956_v62  ;;  %v2883_v32 = vmul.f32 %v7956_v62, %v2877_v57  ;;  %v2884_v31 = vmul.f32 %v7956_v62, %v2878_v18  ;;  %v2885_v4 = vmul.f32 %v7956_v62, %v2879_v2 }
 0x354   :  { %v2886_v8 = vmul.f32 %v7956_v62, %v2880_v0  ;;  %v6369_v57 = vor.u32 %v7288_v42, %v6366_v43  ;;  %v6465_v18 = vor.u32 %v7312_v45, %v6462_v48  ;;  %v2887_v2 = vmul.f32 %v7956_v62, %v2881_v55  ;;  %v7324_v43 = vld [vmem:[#allocation7 + $0x304] sm:$0xf]  ;;  %v6606_v45 = vld [vmem:[#allocation7 + $0x3cc] sm:$0xf0] }
 0x355   :  { %v7967_v30 = vmul.f32 %v2891_v61, %v2889_v63  ;;  %v7969_v15 = vpack.c.bf16 %v2883_v32, %v2883_v32  ;;  %v7971_v10 = vpack.c.bf16 %v2884_v31, %v2884_v31  ;;  %v7973_v47 = vpack.c.bf16 %v2885_v4, %v2885_v4  ;;  %v6450_v63 = vld [vmem:[#allocation7 + $0x294] sm:$0xf0]  ;;  %v7357_v31 = vld [vmem:[#allocation7 + $0x40c] sm:$0xf]  ;;  %v6216_v48 = vld [vmem:[#allocation7 + $0xb0] sm:$0xf] }
 0x356   :  { %v7975_v13 = vpack.c.bf16 %v2886_v8, %v2886_v8  ;;  %v2888_v58 = vmul.f32 %v7956_v62, %v2882_v56  ;;  %v6561_v61 = vor.u32 %v7336_v14, %v6558_v51  ;;  %v6657_v0 = vor.u32 %v7360_v52, %v6654_v53  ;;  %v6546_v32 = vld [vmem:[#allocation7 + $0x354] sm:$0xf0]  ;;  %v7251_v14 = vld [vmem:[#allocation7 + $0xb8] sm:$0xf0]  ;;  %v6312_v51 = vld [vmem:[#allocation7 + $0x170] sm:$0xf] }
 0x357   :  { %3908 = vmatmul.bf16.vlgmr.msra.gmra.mxu2 %v7969_v15  ;;  %3921 = vmatmul.bf16.vlgmr.msra.gmra.mxu3 %v7971_v10  ;;  %v7987_v4 = vpack.c.bf16 %v2887_v2, %v2887_v2  ;;  %v6453_v62 = vor.u32 %v7309_v3, %v6450_v63  ;;  %v6549_v8 = vor.u32 %v7333_v29, %v6546_v32  ;;  %v7275_v52 = vld [vmem:[#allocation7 + $0x178] sm:$0xf0]  ;;  %v6408_v53 = vld [vmem:[#allocation7 + $0x230] sm:$0xf]  ;;  %v7248_v3 = vld [vmem:[#allocation7 + $0xa0] sm:$0xf0] }
 0x358   :  { %3934 = vmatmul.bf16.vlgmr.msrb.gmra.mxu0 %v7973_v47  ;;  %3947 = vmatmul.bf16.vlgmr.msrb.gmra.mxu1 %v7975_v13  ;;  %v7989_v5 = vpack.c.bf16 %v2888_v58, %v2888_v58  ;;  %v6321_v55 = vor.u32 %v7276_v36, %v6318_v35  ;;  %v7323_v2 = vld [vmem:[#allocation7 + $0x2f8] sm:$0xf0]  ;;  %v6217_v60 = vor.u32 %v7251_v14, %v6216_v48  ;;  %v6300_v32 = vld [vmem:[#allocation7 + $0x158] sm:$0xf]  ;;  %v7290_v36 = vld [vmem:[#allocation7 + $0x1f0] sm:$0xf0] }
 0x359   :  { %4004 = vmatpush.bf16.msra.mxu2 %v6405_v9  ;;  %4017 = vmatpush.bf16.msra.mxu3 %v6501_v1  ;;  %v6645_v9 = vor.u32 %v7357_v31, %v6642_v46  ;;  %v7306_v1 = vld [vmem:[#allocation7 + $0x274] sm:$0xf]  ;;  %v7272_v31 = vld [vmem:[#allocation7 + $0x160] sm:$0xf0]  ;;  %v6396_v46 = vld [vmem:[#allocation7 + $0x218] sm:$0xf] }
 0x35a   :  { %4030 = vmatpush.bf16.msrb.mxu0 %v6597_v16  ;;  %4043 = vmatpush.bf16.msrb.mxu1 %v6693_v17  ;;  %v6534_v16 = vld [vmem:[#allocation7 + $0x33c] sm:$0xf0]  ;;  %v7354_v17 = vld [vmem:[#allocation7 + $0x3f4] sm:$0xf]  ;;  %v6441_v21 = vor.u32 %v7306_v1, %v6438_v11  ;;  %v7245_v1 = vld [vmem:[#allocation7 + $0x88] sm:$0xf0] }
 0x35b   :  { %v6537_v23 = vor.u32 %v7330_v12, %v6534_v16  ;;  %v6288_v16 = vld [vmem:[#allocation7 + $0x140] sm:$0xf]  ;;  %v7287_v48 = vld [vmem:[#allocation7 + $0x1d8] sm:$0xf0]  ;;  %v6456_v14 = vld [vmem:[#allocation7 + $0x290] sm:$0xf] }
 0x35d   :  { %4005 = vmatpush.bf16.msra.mxu2 %v6393_v24  ;;  %4018 = vmatpush.bf16.msra.mxu3 %v6489_v26  ;;  %v6633_v24 = vor.u32 %v7354_v17, %v6630_v20  ;;  %v7303_v26 = vld [vmem:[#allocation7 + $0x25c] sm:$0xf]  ;;  %v7269_v17 = vld [vmem:[#allocation7 + $0x148] sm:$0xf0]  ;;  %v6384_v20 = vld [vmem:[#allocation7 + $0x200] sm:$0xf] }
 0x35e   :  { %4031 = vmatpush.bf16.msrb.mxu0 %v6585_v28  ;;  %4044 = vmatpush.bf16.msrb.mxu1 %v6681_v33  ;;  %v6522_v28 = vld [vmem:[#allocation7 + $0x324] sm:$0xf0]  ;;  %v7351_v33 = vld [vmem:[#allocation7 + $0x3dc] sm:$0xf]  ;;  %v6429_v38 = vor.u32 %v7303_v26, %v6426_v25  ;;  %v7242_v26 = vld [vmem:[#allocation7 + $0x70] sm:$0xf0] }
 0x35f   :  { %v6621_v42 = vor.u32 %v7351_v33, %v6618_v19  ;;  %v7266_v33 = vld [vmem:[#allocation7 + $0x130] sm:$0xf0]  ;;  %v6372_v19 = vld [vmem:[#allocation7 + $0x1e8] sm:$0xf] }
 0x361   :  { %4006 = vmatpush.bf16.msra.mxu2 %v6381_v40  ;;  %4019 = vmatpush.bf16.msra.mxu3 %v6477_v41  ;;  %v6414_v40 = vld [vmem:[#allocation7 + $0x24c] sm:$0xf0]  ;;  %v6525_v41 = vor.u32 %v7327_v27, %v6522_v28  ;;  %v6276_v28 = vld [vmem:[#allocation7 + $0x128] sm:$0xf] }
 0x362   :  { %4032 = vmatpush.bf16.msrb.mxu0 %v6573_v44  ;;  %4045 = vmatpush.bf16.msrb.mxu1 %v6669_v50  ;;  %v6510_v44 = vld [vmem:[#allocation7 + $0x30c] sm:$0xf0]  ;;  %v7348_v50 = vld [vmem:[#allocation7 + $0x3c4] sm:$0xf]  ;;  %v6417_v56 = vor.u32 %v7300_v39, %v6414_v40  ;;  %v6277_v39 = vor.u32 %v7266_v33, %v6276_v28  ;;  %v7371_v28 = vld [vmem:[#allocation7 + $0x478] sm:$0xf0] }
 0x363   :  { %v6513_v58 = vor.u32 %v7324_v43, %v6510_v44  ;;  %v6609_v49 = vor.u32 %v7348_v50, %v6606_v45  ;;  %v6168_v40 = vld [vmem:[#allocation7 + $0x50] sm:$0xf]  ;;  %v7263_v50 = vld [vmem:[#allocation7 + $0x118] sm:$0xf0] }
 0x364   :  { %v6264_v44 = vld [vmem:[#allocation7 + $0x110] sm:$0xf] }
 0x365   :  { %4007 = vmatpush.bf16.msra.mxu2 %v6369_v57  ;;  %4020 = vmatpush.bf16.msra.mxu3 %v6465_v18  ;;  %v7299_v57 = vld [vmem:[#allocation7 + $0x238] sm:$0xf0]  ;;  %v6504_v18 = vld [vmem:[#allocation7 + $0x2f0] sm:$0xf] }
 0x366   :  { %4033 = vmatpush.bf16.msrb.mxu0 %v6561_v61  ;;  %4046 = vmatpush.bf16.msrb.mxu1 %v6657_v0  ;;  %v6313_v61 = vor.u32 %v7275_v52, %v6312_v51  ;;  %v6204_v0 = vld [vmem:[#allocation7 + $0x98] sm:$0xf]  ;;  %v6409_v63 = vor.u32 %v7299_v57, %v6408_v53  ;;  %v6505_v29 = vor.u32 %v7323_v2, %v6504_v18  ;;  %v6360_v45 = vld [vmem:[#allocation7 + $0x1d0] sm:$0xf]  ;;  %v7311_v51 = vld [vmem:[#allocation7 + $0x298] sm:$0xf0] }
 0x367   :  { %3960 = vmatmul.bf16.vlgmr.msrb.gmra.mxu2 %v7987_v4  ;;  %3973 = vmatmul.bf16.vlgmr.msrb.gmra.mxu3 %v7989_v5  ;;  %v6205_v7 = vor.u32 %v7248_v3, %v6204_v0  ;;  %v6265_v53 = vor.u32 %v7263_v50, %v6264_v44  ;;  %v6361_v57 = vor.u32 %v7287_v48, %v6360_v45  ;;  %v6252_v2 = vld [vmem:[#allocation7 + $0xf8] sm:$0xf]  ;;  %v7308_v0 = vld [vmem:[#allocation7 + $0x280] sm:$0xf0]  ;;  %v6576_v50 = vld [vmem:[#allocation7 + $0x380] sm:$0xf] }
 0x368   :  { %3986 = vmatmul.bf16.vlgmr.msra.gmra.mxu0 %v7969_v15  ;;  %3999 = vmatmul.bf16.vlgmr.msra.gmra.mxu1 %v7971_v10  ;;  %v6457_v18 = vor.u32 %v7311_v51, %v6456_v14  ;;  %v7341_v45 = vld [vmem:[#allocation7 + $0x388] sm:$0xf0]  ;;  %v6672_v48 = vld [vmem:[#allocation7 + $0x440] sm:$0xf] }
 0x369   :  { %4008 = vmatpush.bf16.msra.mxu2 %v6357_v34  ;;  %4021 = vmatpush.bf16.msra.mxu3 %v6453_v62  ;;  %v7296_v34 = vld [vmem:[#allocation7 + $0x220] sm:$0xf0]  ;;  %v6492_v62 = vld [vmem:[#allocation7 + $0x2d8] sm:$0xf]  ;;  %v7365_v14 = vld [vmem:[#allocation7 + $0x448] sm:$0xf0]  ;;  %v6577_v51 = vor.u32 %v7341_v45, %v6576_v50 }
 0x36a   :  { %4034 = vmatpush.bf16.msrb.mxu0 %v6549_v8  ;;  %4047 = vmatpush.bf16.msrb.mxu1 %v6645_v9  ;;  %v6301_v8 = vor.u32 %v7272_v31, %v6300_v32  ;;  %v6192_v9 = vld [vmem:[#allocation7 + $0x80] sm:$0xf]  ;;  %v6397_v11 = vor.u32 %v7296_v34, %v6396_v46  ;;  %v6493_v12 = vor.u32 %v7320_v6, %v6492_v62  ;;  %v7233_v32 = vld [vmem:[#allocation7 + $0x28] sm:$0xf0] }
 0x36b   :  { %v6193_v22 = vor.u32 %v7245_v1, %v6192_v9  ;;  %v6240_v34 = vld [vmem:[#allocation7 + $0xe0] sm:$0xf]  ;;  %v7257_v62 = vld [vmem:[#allocation7 + $0xe8] sm:$0xf0] }
 0x36c   :  { %v6336_v6 = vld [vmem:[#allocation7 + $0x1a0] sm:$0xf]  ;;  %v7305_v9 = vld [vmem:[#allocation7 + $0x268] sm:$0xf0] }
 0x36d   :  { %4009 = vmatpush.bf16.msra.mxu2 %v6345_v54  ;;  %4022 = vmatpush.bf16.msra.mxu3 %v6441_v21  ;;  %v7293_v54 = vld [vmem:[#allocation7 + $0x208] sm:$0xf0]  ;;  %v6480_v21 = vld [vmem:[#allocation7 + $0x2c0] sm:$0xf] }
 0x36e   :  { %4035 = vmatpush.bf16.msrb.mxu0 %v6537_v23  ;;  %4048 = vmatpush.bf16.msrb.mxu1 %v6633_v24  ;;  %v6289_v23 = vor.u32 %v7269_v17, %v6288_v16  ;;  %v6180_v24 = vld [vmem:[#allocation7 + $0x68] sm:$0xf]  ;;  %v6385_v25 = vor.u32 %v7293_v54, %v6384_v20  ;;  %v6481_v27 = vor.u32 %v7317_v59, %v6480_v21  ;;  %v7230_v16 = vld [vmem:[#allocation7 + $0x10] sm:$0xf0] }
 0x36f   :  { %v6181_v35 = vor.u32 %v7242_v26, %v6180_v24  ;;  %v6228_v17 = vld [vmem:[#allocation7 + $0xc8] sm:$0xf]  ;;  %v7254_v21 = vld [vmem:[#allocation7 + $0xd0] sm:$0xf0]  ;;  %v6600_v26 = vld [vmem:[#allocation7 + $0x3b0] sm:$0xf] }
 0x370   :  { %v6324_v59 = vld [vmem:[#allocation7 + $0x188] sm:$0xf]  ;;  %v7302_v24 = vld [vmem:[#allocation7 + $0x250] sm:$0xf0] }
 0x371   :  { %4010 = vmatpush.bf16.msra.mxu2 %v6333_v37  ;;  %4023 = vmatpush.bf16.msra.mxu3 %v6429_v38  ;;  %v6468_v37 = vld [vmem:[#allocation7 + $0x2a8] sm:$0xf]  ;;  %v7314_v38 = vld [vmem:[#allocation7 + $0x2b0] sm:$0xf0] }
 0x372   :  { %4036 = vmatpush.bf16.msrb.mxu0 %v6525_v41  ;;  %4049 = vmatpush.bf16.msrb.mxu1 %v6621_v42  ;;  %v7239_v41 = vld [vmem:[#allocation7 + $0x58] sm:$0xf0]  ;;  %v6373_v42 = vor.u32 %v7290_v36, %v6372_v19  ;;  %v6469_v43 = vor.u32 %v7314_v38, %v6468_v37  ;;  %v6229_v19 = vor.u32 %v7254_v21, %v6228_v17 }
 0x373   :  { %v6169_v52 = vor.u32 %v7239_v41, %v6168_v40  ;;  %v7344_v40 = vld [vmem:[#allocation7 + $0x3a0] sm:$0xf0]  ;;  %v6684_v41 = vld [vmem:[#allocation7 + $0x458] sm:$0xf] }
 0x375   :  { %4011 = vmatpush.bf16.msra.mxu2 %v6321_v55  ;;  %4024 = vmatpush.bf16.msra.mxu3 %v6417_v56  ;;  %v6156_v55 = vld [vmem:[#allocation7 + $0x38] sm:$0xf]  ;;  %v7236_v56 = vld [vmem:[#allocation7 + $0x40] sm:$0xf0] }
 0x376   :  { %4037 = vmatpush.bf16.msrb.mxu0 %v6513_v58  ;;  %4050 = vmatpush.bf16.msrb.mxu1 %v6609_v49  ;;  %v7260_v58 = vld [vmem:[#allocation7 + $0x100] sm:$0xf0]  ;;  %v6348_v49 = vld [vmem:[#allocation7 + $0x1b8] sm:$0xf]  ;;  %v6157_v3 = vor.u32 %v7236_v56, %v6156_v55  ;;  %v7338_v55 = vld [vmem:[#allocation7 + $0x370] sm:$0xf0] }
 0x377   :  { %v6660_v56 = vld [vmem:[#allocation7 + $0x428] sm:$0xf] }
 0x378   :  { %4012 = vmatmul.bf16.vlgmr.msra.gmra.mxu2 %v7973_v47  ;;  %4025 = vmatmul.bf16.vlgmr.msra.gmra.mxu3 %v7975_v13 }
 0x379   :  { %4056 = vmatpush.bf16.msrb.mxu2 %v6217_v60  ;;  %4069 = vmatpush.bf16.msrb.mxu3 %v6313_v61  ;;  %v7284_v60 = vld [vmem:[#allocation7 + $0x1c0] sm:$0xf0]  ;;  %v6444_v61 = vld [vmem:[#allocation7 + $0x278] sm:$0xf] }
 0x37a   :  { %4082 = vmatpush.bf16.msra.mxu0 %v6409_v63  ;;  %4095 = vmatpush.bf16.msra.mxu1 %v6505_v29  ;;  %v6253_v63 = vor.u32 %v7260_v58, %v6252_v2  ;;  %v6144_v29 = vld [vmem:[#allocation7 + $0x20] sm:$0xf]  ;;  %v6349_v31 = vor.u32 %v7284_v60, %v6348_v49  ;;  %v6445_v46 = vor.u32 %v7308_v0, %v6444_v61  ;;  %v7335_v2 = vld [vmem:[#allocation7 + $0x358] sm:$0xf0]  ;;  %v6648_v58 = vld [vmem:[#allocation7 + $0x410] sm:$0xf] }
 0x37b   :  { %4038 = vmatmul.bf16.vlgmr.msrb.gmra.mxu0 %v7987_v4  ;;  %4051 = vmatmul.bf16.vlgmr.msrb.gmra.mxu1 %v7989_v5  ;;  %v6145_v1 = vor.u32 %v7233_v32, %v6144_v29  ;;  %v7359_v49 = vld [vmem:[#allocation7 + $0x418] sm:$0xf0]  ;;  %v6540_v60 = vld [vmem:[#allocation7 + $0x338] sm:$0xf]  ;;  %v7332_v61 = vld [vmem:[#allocation7 + $0x340] sm:$0xf0] }
 0x37c   :  { %v6636_v0 = vld [vmem:[#allocation7 + $0x3f8] sm:$0xf]  ;;  %v6528_v32 = vld [vmem:[#allocation7 + $0x320] sm:$0xf] }
 0x37d   :  { %4057 = vmatpush.bf16.msrb.mxu2 %v6205_v7  ;;  %4070 = vmatpush.bf16.msrb.mxu3 %v6301_v8  ;;  %v7281_v7 = vld [vmem:[#allocation7 + $0x1a8] sm:$0xf0]  ;;  %v6432_v8 = vld [vmem:[#allocation7 + $0x260] sm:$0xf] }
 0x37e   :  { %4083 = vmatpush.bf16.msra.mxu0 %v6397_v11  ;;  %4096 = vmatpush.bf16.msra.mxu1 %v6493_v12  ;;  %v6241_v11 = vor.u32 %v7257_v62, %v6240_v34  ;;  %v6132_v12 = vld [vmem:[#allocation7 + $0x8] sm:$0xf]  ;;  %v6337_v20 = vor.u32 %v7281_v7, %v6336_v6  ;;  %v6433_v54 = vor.u32 %v7305_v9, %v6432_v8  ;;  %v7353_v34 = vld [vmem:[#allocation7 + $0x3e8] sm:$0xf0]  ;;  %v7326_v8 = vld [vmem:[#allocation7 + $0x310] sm:$0xf0] }
 0x37f   :  { %v6133_v33 = vor.u32 %v7230_v16, %v6132_v12  ;;  %v6516_v7 = vld [vmem:[#allocation7 + $0x308] sm:$0xf] }
 0x380   :  { %v6612_v9 = vld [vmem:[#allocation7 + $0x3c8] sm:$0xf] }
 0x381   :  { %4058 = vmatpush.bf16.msrb.mxu2 %v6193_v22  ;;  %4071 = vmatpush.bf16.msrb.mxu3 %v6289_v23  ;;  %v7278_v22 = vld [vmem:[#allocation7 + $0x190] sm:$0xf0]  ;;  %v6420_v23 = vld [vmem:[#allocation7 + $0x248] sm:$0xf] }
 0x382   :  { %4084 = vmatpush.bf16.msra.mxu0 %v6385_v25  ;;  %4097 = vmatpush.bf16.msra.mxu1 %v6481_v27  ;;  %v7347_v25 = vld [vmem:[#allocation7 + $0x3b8] sm:$0xf0]  ;;  %v6696_v27 = vld [vmem:[#allocation7 + $0x470] sm:$0xf]  ;;  %v6325_v36 = vor.u32 %v7278_v22, %v6324_v59  ;;  %v6421_v37 = vor.u32 %v7302_v24, %v6420_v23 }
 0x383   :  { %v6601_v38 = vor.u32 %v7347_v25, %v6600_v26 }
 0x385   :  { %4059 = vmatpush.bf16.msrb.mxu2 %v6181_v35  ;;  %4072 = vmatpush.bf16.msrb.mxu3 %v6277_v39  ;;  %v6697_v35 = vor.u32 %v7371_v28, %v6696_v27  ;;  %v6588_v39 = vld [vmem:[#allocation7 + $0x398] sm:$0xf] }
 0x386   :  { %4085 = vmatpush.bf16.msra.mxu0 %v6373_v42  ;;  %4098 = vmatpush.bf16.msra.mxu1 %v6469_v43  ;;  %v7368_v42 = vld [vmem:[#allocation7 + $0x460] sm:$0xf0]  ;;  %v6589_v43 = vor.u32 %v7344_v40, %v6588_v39 }
 0x387   :  { %v6685_v44 = vor.u32 %v7368_v42, %v6684_v41 }
 0x389   :  { %4060 = vmatpush.bf16.msrb.mxu2 %v6169_v52  ;;  %4073 = vmatpush.bf16.msrb.mxu3 %v6265_v53  ;;  %v6673_v52 = vor.u32 %v7365_v14, %v6672_v48  ;;  %v6564_v53 = vld [vmem:[#allocation7 + $0x368] sm:$0xf] }
 0x38a   :  { %4086 = vmatpush.bf16.msra.mxu0 %v6361_v57  ;;  %4099 = vmatpush.bf16.msra.mxu1 %v6457_v18  ;;  %v7362_v57 = vld [vmem:[#allocation7 + $0x430] sm:$0xf0] }
 0x38b   :  { %v6661_v18 = vor.u32 %v7362_v57, %v6660_v56 }
 0x38d   :  { %4061 = vmatpush.bf16.msrb.mxu2 %v6157_v3  ;;  %4074 = vmatpush.bf16.msrb.mxu3 %v6253_v63  ;;  %v7356_v3 = vld [vmem:[#allocation7 + $0x400] sm:$0xf0]  ;;  %v6541_v63 = vor.u32 %v7332_v61, %v6540_v60 }
 0x38e   :  { %4087 = vmatpush.bf16.msra.mxu0 %v6349_v31  ;;  %4100 = vmatpush.bf16.msra.mxu1 %v6445_v46  ;;  %v6637_v29 = vor.u32 %v7356_v3, %v6636_v0  ;;  %v7329_v31 = vld [vmem:[#allocation7 + $0x328] sm:$0xf0]  ;;  %v6624_v46 = vld [vmem:[#allocation7 + $0x3e0] sm:$0xf] }
 0x38f   :  { %v6529_v62 = vor.u32 %v7329_v31, %v6528_v32  ;;  %v6625_v6 = vor.u32 %v7353_v34, %v6624_v46 }
 0x391   :  { %4062 = vmatpush.bf16.msrb.mxu2 %v6145_v1  ;;  %4075 = vmatpush.bf16.msrb.mxu3 %v6241_v11  ;;  %v7350_v1 = vld [vmem:[#allocation7 + $0x3d0] sm:$0xf0]  ;;  %v6517_v11 = vor.u32 %v7326_v8, %v6516_v7 }
 0x392   :  { %4088 = vmatpush.bf16.msra.mxu0 %v6337_v20  ;;  %4101 = vmatpush.bf16.msra.mxu1 %v6433_v54  ;;  %v6613_v12 = vor.u32 %v7350_v1, %v6612_v9 }
 0x395   :  { %4063 = vmatpush.bf16.msrb.mxu2 %v6133_v33  ;;  %4076 = vmatpush.bf16.msrb.mxu3 %v6229_v19 }
 0x396   :  { %4089 = vmatpush.bf16.msra.mxu0 %v6325_v36  ;;  %4102 = vmatpush.bf16.msra.mxu1 %v6421_v37 }
 0x398   :  { %4064 = vmatmul.bf16.vlgmr.msrb.gmra.mxu2 %v7969_v15  ;;  %4077 = vmatmul.bf16.vlgmr.msrb.gmra.mxu3 %v7971_v10  ;;  %v6565_v15 = vor.u32 %v7338_v55, %v6564_v53  ;;  %v6552_v10 = vld [vmem:[#allocation7 + $0x350] sm:$0xf] }
 0x399   :  { %4108 = vmatpush.bf16.msra.mxu2 %v6601_v38  ;;  %4121 = vmatpush.bf16.msra.mxu3 %v6697_v35 }
 0x39a   :  { %4090 = vmatmul.bf16.vlgmr.msra.gmra.mxu0 %v7973_v47  ;;  %4103 = vmatmul.bf16.vlgmr.msra.gmra.mxu1 %v7975_v13  ;;  %v6553_v47 = vor.u32 %v7335_v2, %v6552_v10  ;;  %v6649_v13 = vor.u32 %v7359_v49, %v6648_v58  ;;  %v8009_v2 = vld [vmem:[#allocation9] sm:$0x7] }
 0x39d   :  { %4109 = vmatpush.bf16.msra.mxu2 %v6589_v43  ;;  %4122 = vmatpush.bf16.msra.mxu3 %v6685_v44 }
 0x3a1   :  { %4110 = vmatpush.bf16.msra.mxu2 %v6577_v51  ;;  %4123 = vmatpush.bf16.msra.mxu3 %v6673_v52 }
 0x3a5   :  { %4111 = vmatpush.bf16.msra.mxu2 %v6565_v15  ;;  %4124 = vmatpush.bf16.msra.mxu3 %v6661_v18 }
 0x3a9   :  { %4112 = vmatpush.bf16.msra.mxu2 %v6553_v47  ;;  %4125 = vmatpush.bf16.msra.mxu3 %v6649_v13  ;;  %v2894_v47 = vmul.f32 %v8009_v2, %v8009_v2 }
 0x3ab   :  { %v2896_v13 = vperm.slane %v2894_v47, 0  ;;  %v2897_v60 = vperm.slane %v2894_v47, 1  ;;  %v2898_v61 = vperm.slane %v2894_v47, 2 }
 0x3ad   :  { %4113 = vmatpush.bf16.msra.mxu2 %v6541_v63  ;;  %4126 = vmatpush.bf16.msra.mxu3 %v6637_v29  ;;  %v2903_v0 = vsel %vm2902_vm11, %v2896_v13, 0.0  ;;  %v2904_v3 = vsel %vm2902_vm11, %v2897_v60, 0.0  ;;  %v2906_v63 = vsel %vm2902_vm11, %v2898_v61, 0.0 }
 0x3ae   :  { %v2905_v29 = vadd.f32 %v2904_v3, %v2903_v0 }
 0x3b0   :  { %v2907_v32 = vadd.f32 %v2906_v63, %v2905_v29 }
 0x3b1   :  { %4114 = vmatpush.bf16.msra.mxu2 %v6529_v62  ;;  %4127 = vmatpush.bf16.msra.mxu3 %v6625_v6 }
 0x3b2   :  { %2908 = vadd.xlane.f32.xlu2 %v2907_v32 }
 0x3b5   :  { %4115 = vmatpush.bf16.msra.mxu2 %v6517_v11  ;;  %4128 = vmatpush.bf16.msra.mxu3 %v6613_v12 }
 0x3b8   :  { %4116 = vmatmul.bf16.vlgmr.msra.gmra.mxu2 %v7987_v4  ;;  %4129 = vmatmul.bf16.vlgmr.msra.gmra.mxu3 %v7989_v5 }
 0x3d5   :  { %v3935_v16 = vpop.f32.mrf.mxu0  ;;  %v3948_v17 = vpop.f32.mrf.mxu1 }
 0x3da   :  { %v3909_v20 = vpop.f32.mrf.mxu2  ;;  %v3922_v54 = vpop.f32.mrf.mxu3 }
 0x3db   :  { %v3923_v21 = vadd.f32 %v3922_v54, %v3909_v20  ;;  %v3114_v54 = vmax.f32 %v7967_v30, 1e-30 }
 0x3dd   :  { %v3936_v59 = vadd.f32 %v3935_v16, %v3923_v21  ;;  %v3937_v22 = vpop.f32.mrf.mxu0  ;;  %v3950_v23 = vpop.f32.mrf.mxu1  ;;  %7483 = vrsqrt.f32 %v3114_v54  ;;  %vm3121_vm13 = vweird.f32 %v3114_v54 }
 0x3df   :  { %v3949_v24 = vadd.f32 %v3948_v17, %v3936_v59 }
 0x3e2   :  { %v3911_v26 = vpop.f32.mrf.mxu2  ;;  %v3924_v25 = vpop.f32.mrf.mxu3 }
 0x3e3   :  { %v7484_v21 = vpop.eup %7483 }
 0x3e4   :  { %v3116_v59 = vmul.f32 %v7484_v21, %v3114_v54  ;;  %vm3122_vm12 = vweird.f32 %v7484_v21 }
 0x3e5   :  { %v3987_v27 = vpop.f32.mrf.mxu0  ;;  %v4000_v28 = vpop.f32.mrf.mxu1  ;;  %vm3123_vm14 = vmor %vm3121_vm13, %vm3122_vm12 }
 0x3e6   :  { %v4001_v33 = vadd.f32 %v4000_v28, %v3987_v27  ;;  %v3117_v22 = vmul.f32 %v7484_v21, %v3116_v59 }
 0x3e8   :  { %v3118_v23 = vmul.f32 0.5, %v3117_v22 }
 0x3ea   :  { %v3961_v19 = vpop.f32.mrf.mxu2  ;;  %v3974_v36 = vpop.f32.mrf.mxu3 }
 0x3eb   :  { %v3962_v37 = vadd.f32 %v3961_v19, %v3949_v24  ;;  %v3119_v24 = vsub.f32 1.5, %v3118_v23 }
 0x3ed   :  { %v8005_v4 = vadd.f32 %v3974_v36, %v3962_v37  ;;  %v3989_v5 = vpop.f32.mrf.mxu0  ;;  %v4002_v38 = vpop.f32.mrf.mxu1  ;;  %v3120_v26 = vmul.f32 %v7484_v21, %v3119_v24 }
 0x3ef   :  { %v4134_v9 = vmul.f32 %v8005_v4, %v8005_v4  ;;  %v3124_v25 = vsel %vm3123_vm14, %v7484_v21, %v3120_v26 }
 0x3f0   :  { %v3125_v27 = vmul.f32 %v3124_v25, %v3114_v54 }
 0x3f2   :  { %v3963_v35 = vpop.f32.mrf.mxu2  ;;  %v3976_v39 = vpop.f32.mrf.mxu3  ;;  %v6698_v28 = vclamps-f32 %v3125_v27, 0.9999999  ;;  %v6757_v27 = vld [vmem:[#allocation10 + $0x70] sm:$0xf] }
 0x3f4   :  { %v4156_v19 = vadd.f32 1.0, %v6698_v28  ;;  %v4159_v37 = vsub.f32 1.0, %v6698_v28  ;;  %v7387_v28 = vld [vmem:[#allocation10 + $0x74] sm:$0xf0] }
 0x3f8   :  { %v4039_v40 = vpop.f32.mrf.mxu0  ;;  %v4052_v41 = vpop.f32.mrf.mxu1 }
 0x3fb   :  { %v4013_v42 = vpop.f32.mrf.mxu2  ;;  %v4026_v43 = vpop.f32.mrf.mxu3 }
 0x3fc   :  { %v4014_v44 = vadd.f32 %v4013_v42, %v4001_v33 }
 0x3fe   :  { %v4027_v50 = vadd.f32 %v4026_v43, %v4014_v44 }
 0x400   :  { %v4041_v45 = vpop.f32.mrf.mxu0  ;;  %v4054_v48 = vpop.f32.mrf.mxu1  ;;  %v4040_v14 = vadd.f32 %v4039_v40, %v4027_v50 }
 0x402   :  { %v8007_v51 = vadd.f32 %v4052_v41, %v4040_v14 }
 0x403   :  { %v4015_v52 = vpop.f32.mrf.mxu2  ;;  %v4028_v53 = vpop.f32.mrf.mxu3 }
 0x404   :  { %v4135_v8 = vmul.f32 %v8007_v51, %v8007_v51 }
 0x406   :  { %v4137_v12 = vadd.f32 %v4135_v8, %v4134_v9 }
 0x417   :  { %v4091_v55 = vpop.f32.mrf.mxu0  ;;  %v4104_v56 = vpop.f32.mrf.mxu1 }
 0x41b   :  { %v4065_v57 = vpop.f32.mrf.mxu2  ;;  %v4078_v15 = vpop.f32.mrf.mxu3 }
 0x41c   :  { %v4079_v31 = vadd.f32 %v4078_v15, %v4065_v57 }
 0x41e   :  { %v4092_v46 = vadd.f32 %v4091_v55, %v4079_v31 }
 0x41f   :  { %v4093_v18 = vpop.f32.mrf.mxu0  ;;  %v4106_v10 = vpop.f32.mrf.mxu1 }
 0x420   :  { %v4105_v34 = vadd.f32 %v4104_v56, %v4092_v46  ;;  %v4203_v46 = vperm.slane %v8009_v2, 0 }
 0x423   :  { %v4067_v58 = vpop.f32.mrf.mxu2  ;;  %v4080_v49 = vpop.f32.mrf.mxu3 }
 0x425   :  { %v2909_v26 = vpop.xlane.xlu2 %2908 }
 0x43b   :  { %v4117_v62 = vpop.f32.mrf.mxu2  ;;  %v4130_v6 = vpop.f32.mrf.mxu3 }
 0x43c   :  { %v4118_v7 = vadd.f32 %v4117_v62, %v4105_v34  ;;  %v4204_v34 = vperm.slane %v8009_v2, 1 }
 0x43e   :  { %v8020_v1 = vadd.f32 %v4130_v6, %v4118_v7 }
 0x440   :  { %v4136_v11 = vmul.f32 %v8020_v1, %v8020_v1 }
 0x442   :  { %v4138_v16 = vadd.f32 %v4137_v12, %v4136_v11 }
 0x443   :  { %v4119_v17 = vpop.f32.mrf.mxu2  ;;  %v4132_v20 = vpop.f32.mrf.mxu3 }
 0x444   :  { %4139 = vadd.xlane.f32.xlu1 %v4138_v16 }
 0x4b7   :  { %v4140_v33 = vpop.xlane.xlu1 %4139 }
 0x4b8   :  { %v4141_v36 = vmax.f32 %v4140_v33, 1e-30  ;;  %vm4172_vm2 = vcmp.eq.f32.partialorder %v4140_v33, 0.0 }
 0x4ba   :  { %7485 = vrsqrt.f32 %v4141_v36  ;;  %vm4148_vm0 = vweird.f32 %v4141_v36 }
 0x4bb   :  { %7487 = vlog2.f32 %v4156_v19  ;;  %v6758_v19 = vor.u32 %v7387_v28, %v6757_v27  ;;  %v6751_v28 = vld [vmem:[#allocation10 + $0x68] sm:$0xf0] }
 0x4bc   :  { %7489 = vlog2.f32 %v4159_v37  ;;  %v6749_v37 = vld [vmem:[#allocation10 + $0x60] sm:$0xf] }
 0x4bd   :  { %4573 = vmatpush.bf16.msrb.mxu0 %v6758_v19  ;;  %v6717_v19 = vld [vmem:[#allocation10 + $0x20] sm:$0xf] }
 0x4c0   :  { %v7486_v30 = vpop.eup %7485 }
 0x4c1   :  { %v4143_v5 = vmul.f32 %v7486_v30, %v4141_v36  ;;  %v7488_v38 = vpop.eup %7487  ;;  %vm4149_vm15 = vweird.f32 %v7486_v30 }
 0x4c2   :  { %v7490_v35 = vpop.eup %7489  ;;  %v4158_v41 = vmul.f32 0.6931472, %v7488_v38  ;;  %vm4150_vm1 = vmor %vm4148_vm0, %vm4149_vm15 }
 0x4c3   :  { %v4144_v39 = vmul.f32 %v7486_v30, %v4143_v5  ;;  %v4161_v42 = vmul.f32 0.6931472, %v7490_v35  ;;  %v6813_v35 = vld [vmem:[#allocation10 + $0xe0] sm:$0xf] }
 0x4c5   :  { %v4145_v40 = vmul.f32 0.5, %v4144_v39  ;;  %v4162_v50 = vsub.f32 %v4158_v41, %v4161_v42  ;;  %v7401_v39 = vld [vmem:[#allocation10 + $0xe4] sm:$0xf0] }
 0x4c6   :  { %v6814_v42 = vor.u32 %v7401_v39, %v6813_v35  ;;  %v7415_v35 = vld [vmem:[#allocation10 + $0x154] sm:$0xf0] }
 0x4c7   :  { %v4146_v43 = vsub.f32 1.5, %v4145_v40  ;;  %v4163_v14 = vmul.f32 0.5, %v4162_v50 }
 0x4c9   :  { %v4147_v44 = vmul.f32 %v7486_v30, %v4146_v43  ;;  %v6741_v43 = vld [vmem:[#allocation10 + $0x50] sm:$0xf] }
 0x4cb   :  { %v4151_v45 = vsel %vm4150_vm1, %v7486_v30, %v4147_v44  ;;  %v7385_v30 = vld [vmem:[#allocation10 + $0x64] sm:$0xf0]  ;;  %v7383_v44 = vld [vmem:[#allocation10 + $0x54] sm:$0xf0] }
 0x4cc   :  { %v4152_v48 = vmul.f32 %v4151_v45, %v4141_v36  ;;  %v7403_v36 = vld [vmem:[#allocation10 + $0xf4] sm:$0xf0]  ;;  %v6750_v41 = vor.u32 %v7385_v30, %v6749_v37  ;;  %v6781_v37 = vld [vmem:[#allocation10 + $0xa0] sm:$0xf] }
 0x4ce   :  { %v4153_v52 = vmul.f32 %v4152_v48, %v3124_v25  ;;  %v4218_v25 = vperm.slane %v2909_v26, 0  ;;  %v6805_v48 = vld [vmem:[#allocation10 + $0xd0] sm:$0xf]  ;;  %4574 = vmatpush.bf16.msrb.mxu0 %v6750_v41  ;;  %v7417_v26 = vld [vmem:[#allocation10 + $0x164] sm:$0xf0] }
 0x4cf   :  { %v7382_v41 = vld [vmem:[#allocation10 + $0x54] sm:$0xf] }
 0x4d0   :  { %v4164_v53 = vmul.f32 %v4163_v14, %v4153_v52  ;;  %v7399_v14 = vld [vmem:[#allocation10 + $0xd4] sm:$0xf0]  ;;  %v6885_v52 = vld [vmem:[#allocation10 + $0x170] sm:$0xf] }
 0x4d2   :  { %7491 = vtanh.f32 %v4164_v53  ;;  %v7419_v53 = vld [vmem:[#allocation10 + $0x174] sm:$0xf0] }
 0x4d8   :  { %v7492_v55 = vpop.eup %7491 }
 0x4d9   :  { %v4166_v56 = vmul.f32 %v7492_v55, %v4151_v45  ;;  %v7386_v55 = vld [vmem:[#allocation10 + $0x74] sm:$0xf] }
 0x4db   :  { %v4170_v57 = vmul.f32 %v4166_v56, %v4166_v56  ;;  %v4167_v61 = vmul.f32 %v4166_v56, %v8005_v4  ;;  %v4168_v0 = vmul.f32 %v4166_v56, %v8007_v51  ;;  %v4169_v63 = vmul.f32 %v4166_v56, %v8020_v1 }
 0x4dc   :  { %v4205_v51 = vperm.slane %v8009_v2, 2 }
 0x4dd   :  { %v4171_v15 = vmul.f32 %v4170_v57, %v4140_v33  ;;  %v4175_v62 = vsel %vm4172_vm2, 0.0, %v4167_v61  ;;  %v4176_v6 = vsel %vm4172_vm2, 0.0, %v4168_v0  ;;  %v4177_v4 = vsel %vm4172_vm2, 0.0, %v4169_v63  ;;  %v6821_v33 = vld [vmem:[#allocation10 + $0xf0] sm:$0xf] }
 0x4de   :  { %v6822_v38 = vor.u32 %v7403_v36, %v6821_v33  ;;  %v6742_v57 = vor.u32 %v7383_v44, %v6741_v43  ;;  %v7397_v61 = vld [vmem:[#allocation10 + $0xc4] sm:$0xf0]  ;;  %v6725_v63 = vld [vmem:[#allocation10 + $0x30] sm:$0xf] }
 0x4df   :  { %v4178_v18 = vsel %vm4172_vm2, 0.0, %v4171_v15  ;;  %v6886_v15 = vor.u32 %v7419_v53, %v6885_v52  ;;  %v7377_v36 = vld [vmem:[#allocation10 + $0x24] sm:$0xf0]  ;;  %v6709_v44 = vld [vmem:[#allocation10 + $0x10] sm:$0xf] }
 0x4e0   :  { %v4179_v10 = vmax.f32 %v4178_v18, 1e-30  ;;  %4586 = vmatpush.bf16.msrb.mxu1 %v6822_v38  ;;  %4575 = vmatpush.bf16.msrb.mxu0 %v6742_v57  ;;  %v6718_v30 = vor.u32 %v7377_v36, %v6717_v19  ;;  %v6869_v38 = vld [vmem:[#allocation10 + $0x150] sm:$0xf]  ;;  %v6861_v52 = vld [vmem:[#allocation10 + $0x140] sm:$0xf] }
 0x4e1   :  { %4599 = vmatpush.bf16.msrb.mxu2 %v6886_v15  ;;  %v7413_v53 = vld [vmem:[#allocation10 + $0x144] sm:$0xf0]  ;;  %v7380_v57 = vld [vmem:[#allocation10 + $0x44] sm:$0xf]  ;;  %v6735_v15 = vld [vmem:[#allocation10 + $0x48] sm:$0xf0] }
 0x4e2   :  { %7493 = vrsqrt.f32 %v4179_v10  ;;  %vm4186_vm4 = vweird.f32 %v4179_v10 }
 0x4e4   :  { %4587 = vmatpush.bf16.msrb.mxu1 %v6814_v42  ;;  %v6743_v42 = vld [vmem:[#allocation10 + $0x58] sm:$0xf0] }
 0x4e5   :  { %v6746_v43 = vor.u32 %v7382_v41, %v6743_v42  ;;  %v6703_v41 = vld [vmem:[#allocation10 + $0x8] sm:$0xf0]  ;;  %v7396_v42 = vld [vmem:[#allocation10 + $0xc4] sm:$0xf] }
 0x4e8   :  { %v7494_v58 = vpop.eup %7493 }
 0x4e9   :  { %v4181_v49 = vmul.f32 %v7494_v58, %v4179_v10  ;;  %vm4187_vm3 = vweird.f32 %v7494_v58 }
 0x4ea   :  { %vm4188_vm5 = vmor %vm4186_vm4, %vm4187_vm3 }
 0x4eb   :  { %v4182_v47 = vmul.f32 %v7494_v58, %v4181_v49  ;;  %v7381_v49 = vld [vmem:[#allocation10 + $0x44] sm:$0xf0] }
 0x4ed   :  { %v4183_v13 = vmul.f32 0.5, %v4182_v47 }
 0x4ef   :  { %v4184_v60 = vsub.f32 1.5, %v4183_v13 }
 0x4f1   :  { %v4185_v3 = vmul.f32 %v7494_v58, %v4184_v60  ;;  %v6797_v60 = vld [vmem:[#allocation10 + $0xc0] sm:$0xf] }
 0x4f3   :  { %v4189_v29 = vsel %vm4188_vm5, %v7494_v58, %v4185_v3  ;;  %v6733_v58 = vld [vmem:[#allocation10 + $0x40] sm:$0xf]  ;;  %v6798_v3 = vor.u32 %v7397_v61, %v6797_v60  ;;  %v6853_v60 = vld [vmem:[#allocation10 + $0x130] sm:$0xf]  ;;  %v7411_v61 = vld [vmem:[#allocation10 + $0x134] sm:$0xf0] }
 0x4f4   :  { %v4190_v32 = vmul.f32 %v4189_v29, %v4179_v10  ;;  %v4192_v31 = vmul.f32 0.996, %v4189_v29  ;;  %v6806_v10 = vor.u32 %v7399_v14, %v6805_v48  ;;  %v6734_v0 = vor.u32 %v7381_v49, %v6733_v58  ;;  %v7379_v29 = vld [vmem:[#allocation10 + $0x34] sm:$0xf0]  ;;  %v7373_v58 = vld [vmem:[#allocation10 + $0x4] sm:$0xf0] }
 0x4f5   :  { %v7391_v14 = vld [vmem:[#allocation10 + $0x94] sm:$0xf0]  ;;  %v6765_v49 = vld [vmem:[#allocation10 + $0x80] sm:$0xf] }
 0x4f6   :  { %vm4191_vm6 = vcmp.gt.f32.partialorder %v4190_v32, 0.996  ;;  %v4193_v7 = vmul.f32 %v4192_v31, %v4175_v62  ;;  %v4194_v8 = vmul.f32 %v4192_v31, %v4176_v6  ;;  %v4195_v9 = vmul.f32 %v4192_v31, %v4177_v4  ;;  %4588 = vmatpush.bf16.msrb.mxu1 %v6806_v10  ;;  %v6789_v32 = vld [vmem:[#allocation10 + $0xb0] sm:$0xf]  ;;  %v7395_v31 = vld [vmem:[#allocation10 + $0xb4] sm:$0xf0]  ;;  %4576 = vmatpush.bf16.msrb.mxu0 %v6734_v0 }
 0x4f7   :  { %v4201_v1 = vsel %vm4191_vm6, 0.992016, %v4178_v18  ;;  %v6759_v18 = vld [vmem:[#allocation10 + $0x78] sm:$0xf0]  ;;  %v6701_v10 = vld [vmem:[#allocation10] sm:$0xf] }
 0x4f8   :  { %v4223_v11 = vsub.f32 1.0, %v4201_v1  ;;  %v8035_v12 = vsel %vm4191_vm6, %v4193_v7, %v4175_v62  ;;  %v8037_v16 = vsel %vm4191_vm6, %v4194_v8, %v4176_v6  ;;  %v8039_v17 = vsel %vm4191_vm6, %v4195_v9, %v4177_v4 }
 0x4f9   :  { %v4209_v20 = vmul.f32 %v4203_v46, %v8035_v12  ;;  %v4210_v54 = vmul.f32 %v4204_v34, %v8037_v16  ;;  %v4211_v22 = vmul.f32 %v4205_v51, %v8039_v17  ;;  %v4230_v50 = vmul.f32 %v4218_v25, %v4201_v1 }
 0x4fa   :  { %v8043_v21 = vmul.f32 %v4223_v11, %v4203_v46  ;;  %v8045_v59 = vmul.f32 %v4223_v11, %v4204_v34  ;;  %v8047_v2 = vmul.f32 %v4223_v11, %v4205_v51  ;;  %v6762_v47 = vor.u32 %v7386_v55, %v6759_v18  ;;  %4589 = vmatpush.bf16.msrb.mxu1 %v6798_v3 }
 0x4fb   :  { %v4212_v23 = vadd.f32 %v4210_v54, %v4209_v20  ;;  %v6726_v34 = vor.u32 %v7379_v29, %v6725_v63  ;;  %v6790_v62 = vor.u32 %v7395_v31, %v6789_v32  ;;  %v6738_v18 = vor.u32 %v7380_v57, %v6735_v15  ;;  %v7378_v63 = vld [vmem:[#allocation10 + $0x34] sm:$0xf]  ;;  %v6727_v29 = vld [vmem:[#allocation10 + $0x38] sm:$0xf0] }
 0x4fc   :  { %4612 = vmatpush.bf16.msrb.mxu3 %v6762_v47  ;;  %v6702_v47 = vor.u32 %v7373_v58, %v6701_v10  ;;  %v6854_v3 = vor.u32 %v7411_v61, %v6853_v60  ;;  %v7402_v32 = vld [vmem:[#allocation10 + $0xf4] sm:$0xf]  ;;  %v6730_v31 = vor.u32 %v7378_v63, %v6727_v29  ;;  %v6855_v57 = vld [vmem:[#allocation10 + $0x138] sm:$0xf0]  ;;  %v6783_v10 = vld [vmem:[#allocation10 + $0xa8] sm:$0xf0] }
 0x4fd   :  { %v4213_v24 = vadd.f32 %v4212_v23, %v4211_v22  ;;  %4577 = vmatpush.bf16.msrb.mxu0 %v6726_v34  ;;  %v7418_v34 = vld [vmem:[#allocation10 + $0x174] sm:$0xf]  ;;  %v7408_v58 = vld [vmem:[#allocation10 + $0x124] sm:$0xf] }
 0x4fe   :  { %4590 = vmatpush.bf16.msrb.mxu1 %v6790_v62  ;;  %v6887_v62 = vld [vmem:[#allocation10 + $0x178] sm:$0xf0]  ;;  %v7406_v63 = vld [vmem:[#allocation10 + $0x114] sm:$0xf] }
 0x4ff   :  { %4214 = vadd.xlane.f32.xlu2 %v4213_v24 }
 0x501   :  { %4578 = vmatpush.bf16.msrb.mxu0 %v6718_v30  ;;  %v6871_v30 = vld [vmem:[#allocation10 + $0x158] sm:$0xf0] }
 0x572   :  { %v4215_v5 = vpop.xlane.xlu2 %4214 }
 0x573   :  { %v4216_v40 = vmul.f32 2.0, %v4215_v5  ;;  %v7393_v5 = vld [vmem:[#allocation10 + $0xa4] sm:$0xf0] }
 0x574   :  { %v6782_v39 = vor.u32 %v7393_v5, %v6781_v37  ;;  %v7414_v37 = vld [vmem:[#allocation10 + $0x154] sm:$0xf] }
 0x575   :  { %v4217_v45 = vadd.f32 1.0, %v4216_v40  ;;  %v6870_v40 = vor.u32 %v7415_v35, %v6869_v38  ;;  %v6874_v5 = vor.u32 %v7414_v37, %v6871_v30  ;;  %v6829_v38 = vld [vmem:[#allocation10 + $0x100] sm:$0xf]  ;;  %v7405_v35 = vld [vmem:[#allocation10 + $0x104] sm:$0xf0] }
 0x576   :  { %4591 = vmatpush.bf16.msrb.mxu1 %v6782_v39  ;;  %v7372_v39 = vld [vmem:[#allocation10 + $0x4] sm:$0xf] }
 0x577   :  { %v4231_v56 = vadd.f32 %v4230_v50, %v4217_v45  ;;  %v4219_v46 = vadd.f32 %v4218_v25, %v4217_v45  ;;  %v7384_v25 = vld [vmem:[#allocation10 + $0x64] sm:$0xf]  ;;  %v7375_v50 = vld [vmem:[#allocation10 + $0x14] sm:$0xf0]  ;;  %v6773_v45 = vld [vmem:[#allocation10 + $0x90] sm:$0xf] }
 0x578   :  { %v6754_v33 = vor.u32 %v7384_v25, %v6751_v28  ;;  %v6710_v48 = vor.u32 %v7375_v50, %v6709_v44  ;;  %v6774_v55 = vor.u32 %v7391_v14, %v6773_v45  ;;  %v7398_v28 = vld [vmem:[#allocation10 + $0xd4] sm:$0xf]  ;;  %v6706_v44 = vor.u32 %v7372_v39, %v6703_v41  ;;  %v7412_v45 = vld [vmem:[#allocation10 + $0x144] sm:$0xf] }
 0x579   :  { %v4232_v13 = vmax.f32 %v4231_v56, 1e-15  ;;  %v4220_v4 = vmul.f32 %v4219_v46, %v8035_v12  ;;  %v4221_v51 = vmul.f32 %v4219_v46, %v8037_v16  ;;  %v4222_v7 = vmul.f32 %v4219_v46, %v8039_v17  ;;  %v6823_v46 = vld [vmem:[#allocation10 + $0xf8] sm:$0xf0] }
 0x57a   :  { %4613 = vmatpush.bf16.msrb.mxu3 %v6754_v33  ;;  %v6862_v56 = vor.u32 %v7413_v53, %v6861_v52  ;;  %4579 = vmatpush.bf16.msrb.mxu0 %v6710_v48  ;;  %v6807_v33 = vld [vmem:[#allocation10 + $0xd8] sm:$0xf0]  ;;  %v6863_v48 = vld [vmem:[#allocation10 + $0x148] sm:$0xf0]  ;;  %v7394_v52 = vld [vmem:[#allocation10 + $0xb4] sm:$0xf] }
 0x57b   :  { %7495 = vrcp.f32 %v4232_v13  ;;  %v4227_v1 = vadd.f32 %v8043_v21, %v4220_v4  ;;  %v4228_v11 = vadd.f32 %v8045_v59, %v4221_v51  ;;  %v4229_v20 = vadd.f32 %v8047_v2, %v4222_v7  ;;  %v6877_v2 = vld [vmem:[#allocation10 + $0x160] sm:$0xf]  ;;  %4592 = vmatpush.bf16.msrb.mxu1 %v6774_v55  ;;  %v7409_v7 = vld [vmem:[#allocation10 + $0x124] sm:$0xf0]  ;;  %v6791_v53 = vld [vmem:[#allocation10 + $0xb8] sm:$0xf0] }
 0x57c   :  { %v6878_v27 = vor.u32 %v7417_v26, %v6877_v2  ;;  %v6890_v4 = vor.u32 %v7418_v34, %v6887_v62  ;;  %v6845_v51 = vld [vmem:[#allocation10 + $0x120] sm:$0xf]  ;;  %v7407_v2 = vld [vmem:[#allocation10 + $0x114] sm:$0xf0]  ;;  %v7374_v26 = vld [vmem:[#allocation10 + $0x14] sm:$0xf]  ;;  %v6810_v36 = vor.u32 %v7398_v28, %v6807_v33  ;;  %v6866_v14 = vor.u32 %v7412_v45, %v6863_v48 }
 0x57d   :  { %v7410_v55 = vld [vmem:[#allocation10 + $0x134] sm:$0xf]  ;;  %v6767_v34 = vld [vmem:[#allocation10 + $0x88] sm:$0xf0]  ;;  %v7404_v62 = vld [vmem:[#allocation10 + $0x104] sm:$0xf] }
 0x57e   :  { %4600 = vmatpush.bf16.msrb.mxu2 %v6878_v27  ;;  %4614 = vmatpush.bf16.msrb.mxu3 %v6746_v43  ;;  %v6711_v27 = vld [vmem:[#allocation10 + $0x18] sm:$0xf0]  ;;  %v6799_v43 = vld [vmem:[#allocation10 + $0xc8] sm:$0xf0]  ;;  %v6858_v15 = vor.u32 %v7410_v55, %v6855_v57 }
 0x57f   :  { %4580 = vmatpush.bf16.msrb.mxu0 %v6702_v47  ;;  %v6714_v19 = vor.u32 %v7374_v26, %v6711_v27  ;;  %v6802_v50 = vor.u32 %v7396_v42, %v6799_v43 }
 0x581   :  { %v7496_v6 = vpop.eup %7495 }
 0x582   :  { %v4234_v8 = vmul.f32 %v7496_v6, %v4232_v13  ;;  %4601 = vmatpush.bf16.msrb.mxu2 %v6870_v40  ;;  %4615 = vmatpush.bf16.msrb.mxu3 %v6738_v18  ;;  %v7389_v13 = vld [vmem:[#allocation10 + $0x84] sm:$0xf0]  ;;  %v6830_v40 = vor.u32 %v7405_v35, %v6829_v38  ;;  %v7392_v18 = vld [vmem:[#allocation10 + $0xa4] sm:$0xf] }
 0x583   :  { %v6766_v0 = vor.u32 %v7389_v13, %v6765_v49  ;;  %v6786_v47 = vor.u32 %v7392_v18, %v6783_v10  ;;  %v6847_v13 = vld [vmem:[#allocation10 + $0x128] sm:$0xf0] }
 0x584   :  { %v4235_v9 = vsub.f32 2.0, %v4234_v8  ;;  %v7376_v8 = vld [vmem:[#allocation10 + $0x24] sm:$0xf]  ;;  %v6850_v61 = vor.u32 %v7408_v58, %v6847_v13 }
 0x585   :  { %4593 = vmatpush.bf16.msrb.mxu1 %v6766_v0  ;;  %v7390_v0 = vld [vmem:[#allocation10 + $0x94] sm:$0xf] }
 0x586   :  { %v4236_v54 = vmul.f32 %v7496_v6, %v4235_v9  ;;  %4602 = vmatpush.bf16.msrb.mxu2 %v6862_v56  ;;  %v6826_v6 = vor.u32 %v7402_v32, %v6823_v46  ;;  %4616 = vmatpush.bf16.msrb.mxu3 %v6730_v31  ;;  %v6846_v9 = vor.u32 %v7409_v7, %v6845_v51  ;;  %v6839_v32 = vld [vmem:[#allocation10 + $0x118] sm:$0xf0]  ;;  %v7388_v46 = vld [vmem:[#allocation10 + $0x84] sm:$0xf] }
 0x587   :  { %v6794_v56 = vor.u32 %v7394_v52, %v6791_v53  ;;  %v6842_v31 = vor.u32 %v7406_v63, %v6839_v32 }
 0x588   :  { %v8056_v22 = vmul.f32 %v4236_v54, %v4227_v1  ;;  %v8058_v23 = vmul.f32 %v4236_v54, %v4228_v11  ;;  %v8060_v12 = vmul.f32 %v4236_v54, %v4229_v20  ;;  %4625 = vmatpush.bf16.msra.mxu0 %v6826_v6  ;;  %v6719_v1 = vld [vmem:[#allocation10 + $0x28] sm:$0xf0]  ;;  %v7400_v11 = vld [vmem:[#allocation10 + $0xe4] sm:$0xf]  ;;  %v6770_v6 = vor.u32 %v7388_v46, %v6767_v34 }
 0x589   :  { %4638 = vmatpush.bf16.msra.mxu1 %v6890_v4  ;;  %v6815_v20 = vld [vmem:[#allocation10 + $0xe8] sm:$0xf0]  ;;  %v6722_v54 = vor.u32 %v7376_v8, %v6719_v1 }
 0x58a   :  { %v4240_v16 = vmul.f32 %v8056_v22, %v8056_v22  ;;  %v4241_v17 = vmul.f32 %v8058_v23, %v8058_v23  ;;  %v4242_v21 = vmul.f32 %v8060_v12, %v8060_v12  ;;  %4603 = vmatpush.bf16.msrb.mxu2 %v6854_v3  ;;  %v6775_v3 = vld [vmem:[#allocation10 + $0x98] sm:$0xf0]  ;;  %v6831_v4 = vld [vmem:[#allocation10 + $0x108] sm:$0xf0] }
 0x58b   :  { %4617 = vmatpush.bf16.msrb.mxu3 %v6722_v54  ;;  %v6778_v29 = vor.u32 %v7390_v0, %v6775_v3  ;;  %v6834_v7 = vor.u32 %v7404_v62, %v6831_v4 }
 0x58c   :  { %v4243_v24 = vadd.f32 %v4241_v17, %v4240_v16  ;;  %v6818_v16 = vor.u32 %v7400_v11, %v6815_v20  ;;  %v7416_v17 = vld [vmem:[#allocation10 + $0x164] sm:$0xf] }
 0x58e   :  { %v4244_v59 = vadd.f32 %v4243_v24, %v4242_v21  ;;  %v6879_v21 = vld [vmem:[#allocation10 + $0x168] sm:$0xf0]  ;;  %4604 = vmatpush.bf16.msrb.mxu2 %v6846_v9  ;;  %4626 = vmatpush.bf16.msra.mxu0 %v6818_v16 }
 0x58f   :  { %v6882_v24 = vor.u32 %v7416_v17, %v6879_v21  ;;  %4618 = vmatpush.bf16.msrb.mxu3 %v6714_v19  ;;  %v8080_v19 = vld [vmem:[#allocation12] sm:$0x3] }
 0x590   :  { %4245 = vadd.xlane.f32.xlu0 %v4244_v59  ;;  %v6837_v59 = vld [vmem:[#allocation10 + $0x110] sm:$0xf] }
 0x591   :  { %4639 = vmatpush.bf16.msra.mxu1 %v6882_v24  ;;  %v6838_v25 = vor.u32 %v7407_v2, %v6837_v59 }
 0x592   :  { %4627 = vmatpush.bf16.msra.mxu0 %v6810_v36 }
 0x593   :  { %4605 = vmatpush.bf16.msrb.mxu2 %v6838_v25  ;;  %4619 = vmatpush.bf16.msrb.mxu3 %v6706_v44 }
 0x595   :  { %4640 = vmatpush.bf16.msra.mxu1 %v6874_v5 }
 0x596   :  { %4628 = vmatpush.bf16.msra.mxu0 %v6802_v50 }
 0x597   :  { %4606 = vmatpush.bf16.msrb.mxu2 %v6830_v40 }
 0x599   :  { %4641 = vmatpush.bf16.msra.mxu1 %v6866_v14 }
 0x59a   :  { %4629 = vmatpush.bf16.msra.mxu0 %v6794_v56 }
 0x59d   :  { %4642 = vmatpush.bf16.msra.mxu1 %v6858_v15 }
 0x59e   :  { %4630 = vmatpush.bf16.msra.mxu0 %v6786_v47 }
 0x5a1   :  { %4643 = vmatpush.bf16.msra.mxu1 %v6850_v61 }
 0x5a2   :  { %4631 = vmatpush.bf16.msra.mxu0 %v6778_v29 }
 0x5a5   :  { %4644 = vmatpush.bf16.msra.mxu1 %v6842_v31 }
 0x5a6   :  { %4632 = vmatpush.bf16.msra.mxu0 %v6770_v6 }
 0x5a9   :  { %4645 = vmatpush.bf16.msra.mxu1 %v6834_v7 }
 0x603   :  { %v8068_v49 = vpop.xlane.xlu0 %4245 }
 0x604   :  { %v4247_v60 = vmax.f32 %v8068_v49, 1e-30 }
 0x606   :  { %7497 = vrsqrt.f32 %v4247_v60  ;;  %vm4254_vm8 = vweird.f32 %v4247_v60 }
 0x60c   :  { %v7498_v51 = vpop.eup %7497 }
 0x60d   :  { %v4249_v8 = vmul.f32 %v7498_v51, %v4247_v60  ;;  %vm4255_vm7 = vweird.f32 %v7498_v51 }
 0x60e   :  { %vm4256_vm9 = vmor %vm4254_vm8, %vm4255_vm7 }
 0x60f   :  { %v4250_v9 = vmul.f32 %v7498_v51, %v4249_v8 }
 0x611   :  { %v4251_v1 = vmul.f32 0.5, %v4250_v9 }
 0x613   :  { %v4252_v11 = vsub.f32 1.5, %v4251_v1 }
 0x615   :  { %v4253_v20 = vmul.f32 %v7498_v51, %v4252_v11 }
 0x617   :  { %v4257_v54 = vsel %vm4256_vm9, %v7498_v51, %v4253_v20 }
 0x618   :  { %v4258_v16 = vmul.f32 %v4257_v54, %v4247_v60  ;;  %v4260_v17 = vmul.f32 0.996, %v4257_v54 }
 0x61a   :  { %vm4259_vm10 = vcmp.gt.f32.partialorder %v4258_v16, 0.996  ;;  %v4261_v21 = vmul.f32 %v4260_v17, %v8056_v22  ;;  %v4262_v24 = vmul.f32 %v4260_v17, %v8058_v23  ;;  %v4263_v59 = vmul.f32 %v4260_v17, %v8060_v12 }
 0x61b   :  { %v4269_v18 = vsel %vm4259_vm10, 0.992016, %v8068_v49 }
 0x61c   :  { %v4266_v2 = vsel %vm4259_vm10, %v4261_v21, %v8056_v22  ;;  %v4267_v26 = vsel %vm4259_vm10, %v4262_v24, %v8058_v23  ;;  %v4268_v25 = vsel %vm4259_vm10, %v4263_v59, %v8060_v12  ;;  %v2911_v22 = vmul.f32 %v8080_v19, %v8080_v19 }
 0x61d   :  { %v4330_v27 = vpack.c.bf16 %v4266_v2, %v4266_v2  ;;  %v4331_v28 = vpack.c.bf16 %v4267_v26, %v4267_v26  ;;  %v4332_v33 = vpack.c.bf16 %v4268_v25, %v4268_v25  ;;  %v4318_v10 = vmax.f32 %v4269_v18, 1e-30 }
 0x61e   :  { %v2913_v36 = vperm.slane %v2911_v22, 0  ;;  %v2914_v37 = vperm.slane %v2911_v22, 1 }
 0x61f   :  { %4581 = vmatmul.bf16.vlgmr.msrb.gmra.mxu0 %v4330_v27  ;;  %4594 = vmatmul.bf16.vlgmr.msrb.gmra.mxu1 %v4331_v28  ;;  %7499 = vrsqrt.f32 %v4318_v10  ;;  %vm4325_vm12 = vweird.f32 %v4318_v10 }
 0x620   :  { %4607 = vmatmul.bf16.vlgmr.msrb.gmra.mxu2 %v4332_v33  ;;  %4620 = vmatmul.bf16.vlgmr.msrb.gmra.mxu3 %v4330_v27  ;;  %v2917_v23 = vsel %vm2902_vm11, %v2913_v36, 0.0  ;;  %v2918_v12 = vsel %vm2902_vm11, %v2914_v37, 0.0 }
 0x621   :  { %v2919_v30 = vadd.f32 %v2918_v12, %v2917_v23 }
 0x623   :  { %2920 = vadd.xlane.f32.xlu2 %v2919_v30 }
 0x625   :  { %v7500_v58 = vpop.eup %7499 }
 0x626   :  { %v4320_v47 = vmul.f32 %v7500_v58, %v4318_v10  ;;  %vm4326_vm11 = vweird.f32 %v7500_v58 }
 0x627   :  { %vm4327_vm13 = vmor %vm4325_vm12, %vm4326_vm11 }
 0x628   :  { %v4321_v13 = vmul.f32 %v7500_v58, %v4320_v47 }
 0x62a   :  { %v4322_v60 = vmul.f32 0.5, %v4321_v13 }
 0x62c   :  { %v4323_v61 = vsub.f32 1.5, %v4322_v60 }
 0x62e   :  { %v4324_v0 = vmul.f32 %v7500_v58, %v4323_v61 }
 0x62f   :  { %4633 = vmatmul.bf16.vlgmr.msra.gmra.mxu0 %v4331_v28  ;;  %4646 = vmatmul.bf16.vlgmr.msra.gmra.mxu1 %v4332_v33 }
 0x630   :  { %v4328_v3 = vsel %vm4327_vm13, %v7500_v58, %v4324_v0 }
 0x631   :  { %v4329_v63 = vmul.f32 %v4328_v3, %v4318_v10 }
 0x633   :  { %v6891_v29 = vclamps-f32 %v4329_v63, 0.9999999 }
 0x635   :  { %v4671_v31 = vadd.f32 1.0, %v6891_v29  ;;  %v4674_v34 = vsub.f32 1.0, %v6891_v29 }
 0x696   :  { %v2921_v18 = vpop.xlane.xlu2 %2920 }
 0x697   :  { %v4725_v10 = vperm.slane %v2921_v18, 0 }
 0x69c   :  { %v4582_v5 = vpop.f32.mrf.mxu0  ;;  %v4595_v38 = vpop.f32.mrf.mxu1 }
 0x69d   :  { %v4596_v42 = vadd.f32 %v4595_v38, %v4582_v5 }
 0x6a3   :  { %v4608_v35 = vpop.f32.mrf.mxu2  ;;  %v4621_v39 = vpop.f32.mrf.mxu3 }
 0x6a4   :  { %v4584_v40 = vpop.f32.mrf.mxu0  ;;  %v4597_v41 = vpop.f32.mrf.mxu1  ;;  %v8086_v48 = vadd.f32 %v4608_v35, %v4596_v42  ;;  %v4714_v42 = vperm.slane %v8080_v19, 0 }
 0x6a6   :  { %v4651_v53 = vmul.f32 %v8086_v48, %v8086_v48 }
 0x6ab   :  { %v4610_v43 = vpop.f32.mrf.mxu2  ;;  %v4623_v44 = vpop.f32.mrf.mxu3 }
 0x6ac   :  { %v4634_v50 = vpop.f32.mrf.mxu0  ;;  %v4647_v45 = vpop.f32.mrf.mxu1  ;;  %v4715_v43 = vperm.slane %v8080_v19, 1 }
 0x6ad   :  { %v4635_v14 = vadd.f32 %v4634_v50, %v4621_v39 }
 0x6af   :  { %v8088_v52 = vadd.f32 %v4647_v45, %v4635_v14 }
 0x6b1   :  { %v4652_v55 = vmul.f32 %v8088_v52, %v8088_v52 }
 0x6b3   :  { %v4653_v56 = vadd.f32 %v4652_v55, %v4651_v53 }
 0x6b4   :  { %v4636_v57 = vpop.f32.mrf.mxu0  ;;  %v4649_v15 = vpop.f32.mrf.mxu1 }
 0x6b5   :  { %4654 = vadd.xlane.f32.xlu1 %v4653_v56 }
 0x728   :  { %v4655_v32 = vpop.xlane.xlu1 %4654 }
 0x729   :  { %v4656_v46 = vmax.f32 %v4655_v32, 1e-30  ;;  %vm4686_vm1 = vcmp.eq.f32.partialorder %v4655_v32, 0.0 }
 0x72b   :  { %7501 = vrsqrt.f32 %v4656_v46  ;;  %vm4663_vm15 = vweird.f32 %v4656_v46 }
 0x72c   :  { %7503 = vlog2.f32 %v4671_v31 }
 0x72d   :  { %7505 = vlog2.f32 %v4674_v34 }
 0x731   :  { %v7502_v49 = vpop.eup %7501 }
 0x732   :  { %v4658_v62 = vmul.f32 %v7502_v49, %v4656_v46  ;;  %v7504_v6 = vpop.eup %7503  ;;  %vm4664_vm14 = vweird.f32 %v7502_v49 }
 0x733   :  { %v7506_v4 = vpop.eup %7505  ;;  %v4673_v8 = vmul.f32 0.6931472, %v7504_v6  ;;  %vm4665_vm0 = vmor %vm4663_vm15, %vm4664_vm14 }
 0x734   :  { %v4659_v51 = vmul.f32 %v7502_v49, %v4658_v62  ;;  %v4676_v9 = vmul.f32 0.6931472, %v7506_v4 }
 0x736   :  { %v4660_v7 = vmul.f32 0.5, %v4659_v51  ;;  %v4677_v20 = vsub.f32 %v4673_v8, %v4676_v9 }
 0x738   :  { %v4661_v1 = vsub.f32 1.5, %v4660_v7  ;;  %v4678_v17 = vmul.f32 0.5, %v4677_v20 }
 0x73a   :  { %v4662_v11 = vmul.f32 %v7502_v49, %v4661_v1 }
 0x73c   :  { %v4666_v54 = vsel %vm4665_vm0, %v7502_v49, %v4662_v11 }
 0x73d   :  { %v4667_v16 = vmul.f32 %v4666_v54, %v4656_v46 }
 0x73f   :  { %v4668_v21 = vmul.f32 %v4667_v16, %v4328_v3 }
 0x741   :  { %v4679_v24 = vmul.f32 %v4678_v17, %v4668_v21 }
 0x743   :  { %7507 = vtanh.f32 %v4679_v24 }
 0x749   :  { %v7508_v59 = vpop.eup %7507 }
 0x74a   :  { %v4681_v2 = vmul.f32 %v7508_v59, %v4666_v54 }
 0x74c   :  { %v4684_v26 = vmul.f32 %v4681_v2, %v4681_v2  ;;  %v4682_v12 = vmul.f32 %v4681_v2, %v8086_v48  ;;  %v4683_v30 = vmul.f32 %v4681_v2, %v8088_v52 }
 0x74e   :  { %v4685_v25 = vmul.f32 %v4684_v26, %v4655_v32  ;;  %v4689_v40 = vsel %vm4686_vm1, 0.0, %v4682_v12  ;;  %v4690_v41 = vsel %vm4686_vm1, 0.0, %v4683_v30 }
 0x750   :  { %v4691_v27 = vsel %vm4686_vm1, 0.0, %v4685_v25 }
 0x751   :  { %v4692_v28 = vmax.f32 %v4691_v27, 1e-30 }
 0x753   :  { %7509 = vrsqrt.f32 %v4692_v28  ;;  %vm4699_vm3 = vweird.f32 %v4692_v28 }
 0x759   :  { %v7510_v33 = vpop.eup %7509 }
 0x75a   :  { %v4694_v22 = vmul.f32 %v7510_v33, %v4692_v28  ;;  %vm4700_vm2 = vweird.f32 %v7510_v33 }
 0x75b   :  { %vm4701_vm4 = vmor %vm4699_vm3, %vm4700_vm2 }
 0x75c   :  { %v4695_v36 = vmul.f32 %v7510_v33, %v4694_v22 }
 0x75e   :  { %v4696_v37 = vmul.f32 0.5, %v4695_v36 }
 0x760   :  { %v4697_v23 = vsub.f32 1.5, %v4696_v37 }
 0x762   :  { %v4698_v5 = vmul.f32 %v7510_v33, %v4697_v23 }
 0x764   :  { %v4702_v38 = vsel %vm4701_vm4, %v7510_v33, %v4698_v5 }
 0x765   :  { %v4703_v35 = vmul.f32 %v4702_v38, %v4692_v28  ;;  %v4705_v39 = vmul.f32 0.996, %v4702_v38 }
 0x767   :  { %vm4704_vm5 = vcmp.gt.f32.partialorder %v4703_v35, 0.996  ;;  %v4706_v44 = vmul.f32 %v4705_v39, %v4689_v40  ;;  %v4707_v50 = vmul.f32 %v4705_v39, %v4690_v41 }
 0x768   :  { %v4712_v45 = vsel %vm4704_vm5, 0.992016, %v4691_v27 }
 0x769   :  { %v4729_v48 = vsub.f32 1.0, %v4712_v45  ;;  %v4710_v14 = vsel %vm4704_vm5, %v4706_v44, %v4689_v40  ;;  %v4711_v52 = vsel %vm4704_vm5, %v4707_v50, %v4690_v41  ;;  %v4734_v13 = vmul.f32 %v4725_v10, %v4712_v45 }
 0x76a   :  { %v4718_v53 = vmul.f32 %v4714_v42, %v4710_v14  ;;  %v4719_v55 = vmul.f32 %v4715_v43, %v4711_v52 }
 0x76b   :  { %v4730_v56 = vmul.f32 %v4729_v48, %v4714_v42  ;;  %v4731_v57 = vmul.f32 %v4729_v48, %v4715_v43 }
 0x76c   :  { %v4720_v15 = vadd.f32 %v4719_v55, %v4718_v53 }
 0x76e   :  { %4721 = vadd.xlane.f32.xlu0 %v4720_v15 }
 0x7e1   :  { %v4722_v58 = vpop.xlane.xlu0 %4721 }
 0x7e2   :  { %v4723_v47 = vmul.f32 2.0, %v4722_v58 }
 0x7e4   :  { %v4724_v60 = vadd.f32 1.0, %v4723_v47 }
 0x7e6   :  { %v4735_v19 = vadd.f32 %v4734_v13, %v4724_v60  ;;  %v4726_v0 = vadd.f32 %v4725_v10, %v4724_v60 }
 0x7e8   :  { %v4736_v61 = vmax.f32 %v4735_v19, 1e-15  ;;  %v4727_v63 = vmul.f32 %v4726_v0, %v4710_v14  ;;  %v4728_v29 = vmul.f32 %v4726_v0, %v4711_v52 }
 0x7ea   :  { %7511 = vrcp.f32 %v4736_v61  ;;  %v4732_v46 = vadd.f32 %v4730_v56, %v4727_v63  ;;  %v4733_v34 = vadd.f32 %v4731_v57, %v4728_v29 }
 0x7f0   :  { %v7512_v3 = vpop.eup %7511 }
 0x7f1   :  { %v4738_v32 = vmul.f32 %v7512_v3, %v4736_v61 }
 0x7f3   :  { %v4739_v31 = vsub.f32 2.0, %v4738_v32 }
 0x7f5   :  { %v4740_v49 = vmul.f32 %v7512_v3, %v4739_v31 }
 0x7f7   :  { %v4741_v62 = vmul.f32 %v4740_v49, %v4732_v46  ;;  %v4742_v6 = vmul.f32 %v4740_v49, %v4733_v34 }
 0x7f9   :  { %v4743_v4 = vmul.f32 %v4741_v62, %v4741_v62  ;;  %v4744_v51 = vmul.f32 %v4742_v6, %v4742_v6 }
 0x7fb   :  { %v4745_v7 = vadd.f32 %v4744_v51, %v4743_v4 }
 0x7fd   :  { %4746 = vadd.xlane.f32.xlu1 %v4745_v7 }
 0x870   :  { %v4747_v8 = vpop.xlane.xlu1 %4746 }
 0x871   :  { %v4748_v9 = vmax.f32 %v4747_v8, 1e-30 }
 0x873   :  { %7513 = vrsqrt.f32 %v4748_v9  ;;  %vm4755_vm7 = vweird.f32 %v4748_v9 }
 0x879   :  { %v7514_v1 = vpop.eup %7513 }
 0x87a   :  { %v4750_v11 = vmul.f32 %v7514_v1, %v4748_v9  ;;  %vm4756_vm6 = vweird.f32 %v7514_v1 }
 0x87b   :  { %vm4757_vm8 = vmor %vm4755_vm7, %vm4756_vm6 }
 0x87c   :  { %v4751_v20 = vmul.f32 %v7514_v1, %v4750_v11 }
 0x87e   :  { %v4752_v54 = vmul.f32 0.5, %v4751_v20 }
 0x880   :  { %v4753_v16 = vsub.f32 1.5, %v4752_v54 }
 0x882   :  { %v4754_v17 = vmul.f32 %v7514_v1, %v4753_v16 }
 0x884   :  { %v4758_v21 = vsel %vm4757_vm8, %v7514_v1, %v4754_v17 }
 0x885   :  { %v4759_v24 = vmul.f32 %v4758_v21, %v4748_v9  ;;  %v4761_v59 = vmul.f32 0.996, %v4758_v21 }
 0x887   :  { %vm4760_vm9 = vcmp.gt.f32.partialorder %v4759_v24, 0.996  ;;  %v4762_v2 = vmul.f32 %v4761_v59, %v4741_v62  ;;  %v4763_v26 = vmul.f32 %v4761_v59, %v4742_v6 }
 0x889   :  { %v4766_v25 = vsel %vm4760_vm9, %v4762_v2, %v4741_v62  ;;  %v4767_v27 = vsel %vm4760_vm9, %v4763_v26, %v4742_v6 }
 0x88a   :  { %4768 = vst [vmem:[%s8118_s9] sm:$0xff] %v4766_v25 }
 0x88b   :  { %4769 = vst [vmem:[%s8118_s9 + $0x8] sm:$0xff] %v4767_v27 }
 0x88c   :  { %4774 = vsyncpa [#allocation3], 1 }
 0x88d   :  { %4775 = vsyncpa [#allocation5], 1 }
 0x88e   :  { %4776 = vsyncpa [#allocation8], 1 }
 0x88f   :  { %4777 = vsyncpa [#allocation11], 1 }

</bundles_post_ra>
